<compile_context>
chip_gen: v7x
topology: tpu7x:2x2x1
jax: 0.10.0
libtpu: 0.0.40
codegen_flags: <defaults>
</compile_context>

<pallas_src>
import math

import numpy as np
import jax
import jax.numpy as jnp
from jax import lax
from jax.experimental import pallas as pl
from jax.experimental.pallas import tpu as pltpu

# Scaled-down VGG-style config ('M' = 2x2 maxpool).
CFG = [8, 8, "M", 16, 16]
IN_CH = 3          # RGB input like the original
IMG = 28           # input spatial size
HIDDEN = 64        # stands in for 4096
NUM_CLASSES = 10   # stands in for 1000
POOL_OUT = 7       # nn.AdaptiveAvgPool2d((7, 7))

LANE = 128         # TPU lane width
BASE = 128         # lane-aligned offset of the image interior inside every flat buffer


# --------------------------- static layout helpers --------------------------- #

def _geom(h, w):
    """Padded-flat geometry: (row stride, interior length, total buffer length)."""
    wp = w + 2
    r = h * wp
    total = BASE + r + wp + 2      # room for every shifted 3x3 / 2x2 window read
    return wp, r, total


def _valid_col_mask(h, w):
    """(1, h*(w+2)) f32 mask zeroing the two wrap-around columns of every row."""
    wp = w + 2
    m = np.zeros((1, h * wp), np.float32)
    for y in range(h):
        m[0, y * wp:y * wp + w] = 1.0
    return jnp.asarray(m)


def _pool_select(h_in, wp_in, out_h, out_w, col_stride, out_cols, scale):
    """bf16 0/scale gather matrix: column yo*col_stride+xo picks flat position
    2*yo*wp_in + 2*xo of the (already 2x2-reduced) slab; other columns stay all-zero."""
    s = np.zeros((h_in * wp_in, out_cols), np.float32)
    for yo in range(out_h):
        for xo in range(out_w):
            s[2 * yo * wp_in + 2 * xo, yo * col_stride + xo] = scale
    return jnp.asarray(s, dtype=jnp.bfloat16)


def _feature_plan(cfg, in_ch, img, pool_out):
    steps = []
    c, h, w = in_ch, img, img
    for v in cfg:
        if v == "M":
            steps.append(("max", c, h, w))
            h, w = h // 2, w // 2
        else:
            steps.append(("conv", c, v, h, w))
            c = v
    # TODO(synk): general AdaptiveAvgPool2d bins; only the exact 2x2-bin case is implemented.
    assert h == w == 2 * pool_out, "final avg-pool written for exact 2x2 bins"
    steps.append(("avg", c, h, w))
    return steps, c


# ------------------------------ fused feature kernel -------------------------- #

def _make_feature_kernel(steps):
    n_aux = sum(3 if s[0] == "conv" else 1 for s in steps)

    def kernel(*refs):
        x_ref = refs[0]                      # (1, Cin, L0) pre-padded flat input block
        aux = refs[1:1 + n_aux]              # conv (w, b, mask) triples + pool selectors
        o_ref = refs[1 + n_aux]              # (1, C_out, 128) lane-dense pooled features
        scratch = refs[2 + n_aux:]           # VMEM activation buffers + im2col slabs

        def reader(buf):
            return lambda shift, size: buf[:, pl.ds(shift, size)]

        src_read = lambda shift, size: x_ref[0, :, pl.ds(shift, size)]

        ai = 0
        si = 0
        for st in steps:
            if st[0] == "conv":
                _, cin, cout, h, w = st
                wp, r, total = _geom(h, w)
                w_ref, b_ref, m_ref = aux[ai], aux[ai + 1], aux[ai + 2]
                ai += 3
                dst, col = scratch[si], scratch[si + 1]
                si += 2
                # im2col: 9 shifted slabs -> (9*cin, r); ONE MXU matmul per conv layer.
                for k in range(9):
                    shift = BASE - wp - 1 + (k // 3) * wp + (k % 3)
                    col[pl.ds(k * cin, cin), :] = src_read(shift, r)
                acc = jnp.dot(w_ref[...], col[...].astype(jnp.bfloat16),
                              preferred_element_type=jnp.float32)
                acc = jnp.maximum(acc + b_ref[...], 0.0) * m_ref[...]
                # one lane-aligned interior store + two tiny pad stores (no re-zeroing)
                dst[:, pl.ds(0, BASE)] = jnp.zeros((cout, BASE), jnp.float32)
                dst[:, pl.ds(BASE, r)] = acc
                dst[:, pl.ds(BASE + r, total - BASE - r)] = jnp.zeros(
                    (cout, total - BASE - r), jnp.float32)
                src_read = reader(dst)
            elif st[0] == "max":
                _, c, h, w = st
                wp, r, _ = _geom(h, w)
                h2, w2 = h // 2, w // 2
                _, r2, total2 = _geom(h2, w2)
                sel = aux[ai]
                ai += 1
                dst = scratch[si]
                si += 1
                m = jnp.maximum(
                    jnp.maximum(src_read(BASE, r), src_read(BASE + 1, r)),
                    jnp.maximum(src_read(BASE + wp, r), src_read(BASE + wp + 1, r)))
                pooled = jnp.dot(m.astype(jnp.bfloat16), sel[...],
                                 preferred_element_type=jnp.float32)
                dst[:, pl.ds(0, BASE)] = jnp.zeros((c, BASE), jnp.float32)
                dst[:, pl.ds(BASE, r2)] = pooled
                dst[:, pl.ds(BASE + r2, total2 - BASE - r2)] = jnp.zeros(
                    (c, total2 - BASE - r2), jnp.float32)
                src_read = reader(dst)
            else:  # "avg": exact 2x2 average pool -> lane-dense (C, 128) output
                _, c, h, w = st
                wp, r, _ = _geom(h, w)
                sel = aux[ai]                # 0.25 scale folded into the selector
                ai += 1
                s4 = (src_read(BASE, r) + src_read(BASE + 1, r)
                      + src_read(BASE + wp, r) + src_read(BASE + wp + 1, r))
                o_ref[0] = jnp.dot(s4.astype(jnp.bfloat16), sel[...],
                                   preferred_element_type=jnp.float32)

    return kernel


def features(params, x_nchw):
    """Fused feature extractor: NCHW input -> (N, C_out, 128) lane-dense pooled features.
    Columns [0, 49) of each channel row hold the torch.flatten(NCHW, 1) layout; the rest
    are zero padding."""
    n = x_nchw.shape[0]
    steps, out_ch = _feature_plan(CFG, IN_CH, IMG, POOL_OUT)

    # Pre-lay-out the input in the zero-bordered, lane-aligned padded-flat format in the
    # wrapper so the kernel never does per-row copies.
    _, r0, total0 = _geom(IMG, IMG)
    x = x_nchw.astype(jnp.float32)
    x = jnp.pad(x, ((0, 0), (0, 0), (0, 0), (0, 2)))          # width 28 -> 30
    x = x.reshape(n, IN_CH, r0)
    x = jnp.pad(x, ((0, 0), (0, 0), (BASE, total0 - BASE - r0)))

    inputs = [x]
    in_specs = [pl.BlockSpec((1, IN_CH, total0), lambda b: (b, 0, 0))]
    scratch_shapes = []

    conv_it = iter(params["features"])
    for st in steps:
        if st[0] == "conv":
            _, cin, cout, h, w = st
            _, r, total = _geom(h, w)
            w_flat, bias = next(conv_it)
            mask = _valid_col_mask(h, w)
            inputs += [w_flat, bias, mask]
            in_specs += [pl.BlockSpec(w_flat.shape, lambda b: (0, 0)),
                         pl.BlockSpec(bias.shape, lambda b: (0, 0)),
                         pl.BlockSpec(mask.shape, lambda b: (0, 0))]
            scratch_shapes += [pltpu.VMEM((cout, total), jnp.float32),
                               pltpu.VMEM((9 * cin, r), jnp.float32)]
        elif st[0] == "max":
            _, c, h, w = st
            wp, _, _ = _geom(h, w)
            h2, w2 = h // 2, w // 2
            wp2, r2, total2 = _geom(h2, w2)
            sel = _pool_select(h, wp, h2, w2, wp2, r2, 1.0)
            inputs.append(sel)
            in_specs.append(pl.BlockSpec(sel.shape, lambda b: (0, 0)))
            scratch_shapes.append(pltpu.VMEM((c, total2), jnp.float32))
        else:  # "avg"
            _, c, h, w = st
            wp, _, _ = _geom(h, w)
            sel = _pool_select(h, wp, POOL_OUT, POOL_OUT, POOL_OUT, LANE, 0.25)
            inputs.append(sel)
            in_specs.append(pl.BlockSpec(sel.shape, lambda b: (0, 0)))

    return pl.pallas_call(
        _make_feature_kernel(steps),
        out_shape=jax.ShapeDtypeStruct((n, out_ch, LANE), jnp.float32),
        grid=(n,),
        in_specs=in_specs,
        out_specs=pl.BlockSpec((1, out_ch, LANE), lambda b: (b, 0, 0)),
        scratch_shapes=scratch_shapes,
        compiler_params=pltpu.CompilerParams(dimension_semantics=("parallel",)),
    )(*inputs)


# ------------------------------ fused classifier kernel ----------------------- #

def _classifier_kernel(f_ref, w1, b1, w2, b2, w3, b3, o_ref):
    h = jnp.maximum(jnp.dot(f_ref[...], w1[...],
                            preferred_element_type=jnp.float32) + b1[...], 0.0)
    h = jnp.maximum(jnp.dot(h, w2[...],
                            preferred_element_type=jnp.float32) + b2[...], 0.0)
    o_ref[...] = jnp.dot(h, w3[...], preferred_element_type=jnp.float32) + b3[...]


def classifier(params, feat_pad):
    """Fused Linear+ReLU -> Linear+ReLU -> Linear (Dropouts are identity at inference).
    Consumes the lane-dense (N, C, 128) feature slab directly: the 49->128 lane padding is
    folded into W1, classes are padded to a full 128-lane vreg, the batch to 8 sublanes."""
    (w1, b1), (w2, b2), (w3, b3) = params["fc"]
    n, c, lane = feat_pad.shape
    kk = POOL_OUT * POOL_OUT
    w1p = jnp.pad(w1.reshape(c, kk, HIDDEN), ((0, 0), (0, lane - kk), (0, 0)))
    w1p = w1p.reshape(c * lane, HIDDEN)
    ncp = LANE
    w3p = jnp.pad(w3, ((0, 0), (0, ncp - w3.shape[1])))
    b3p = jnp.pad(b3, ((0, 0), (0, ncp - b3.shape[1])))
    nb = max(8, n)
    f = jnp.pad(feat_pad.reshape(n, c * lane), ((0, nb - n), (0, 0)))

    args = (f, w1p, b1, w2, b2, w3p, b3p)
    out = pl.pallas_call(
        _classifier_kernel,
        out_shape=jax.ShapeDtypeStruct((nb, ncp), jnp.float32),
        grid=(1,),
        in_specs=[pl.BlockSpec(a.shape, lambda i: (0, 0)) for a in args],
        out_specs=pl.BlockSpec((nb, ncp), lambda i: (0, 0)),
        compiler_params=pltpu.CompilerParams(dimension_semantics=("arbitrary",)),
    )(*args)
    return out[:n, :NUM_CLASSES]


def vgg_forward(params, x_nchw):
    return classifier(params, features(params, x_nchw))


# ------------------------------ params / reference ---------------------------- #

def init_params(key):
    """Deterministic init mirroring _initialize_weights(). Conv weights are stored
    prepacked for the im2col matmul: (cout, 9*cin) bf16 with column k*cin + ci equal to
    torch_weight[:, ci, k//3, k%3]."""
    feats = []
    cin = IN_CH
    for v in CFG:
        if v == "M":
            continue
        key, wk = jax.random.split(key)
        std = math.sqrt(2.0 / (v * 3 * 3))   # kaiming_normal_, mode='fan_out', relu
        w_oihw = std * jax.random.normal(wk, (v, cin, 3, 3), jnp.float32)
        w_flat = jnp.transpose(w_oihw, (0, 2, 3, 1)).reshape(v, 9 * cin)
        feats.append((w_flat.astype(jnp.bfloat16), jnp.zeros((v, 1), jnp.float32)))
        cin = v
    fcs = []
    dims = [(cin * POOL_OUT * POOL_OUT, HIDDEN), (HIDDEN, HIDDEN), (HIDDEN, NUM_CLASSES)]
    for din, dout in dims:
        key, wk = jax.random.split(key)
        w = 0.01 * jax.random.normal(wk, (dout, din), jnp.float32)  # normal(0, 0.01)
        fcs.append((jnp.transpose(w), jnp.zeros((1, dout), jnp.float32)))
    return {"features": feats, "fc": fcs}


def vgg_reference(params, x_nchw):
    """Pure-JAX reference (NCHW, f32 activations, default matmul/conv precision)."""
    x = x_nchw.astype(jnp.float32)
    it = iter(params["features"])
    cin = IN_CH
    for v in CFG:
        if v == "M":
            n, c, h, w = x.shape
            x = x.reshape(n, c, h // 2, 2, w // 2, 2).max(axis=(3, 5))
        else:
            w_flat, b = next(it)
            cout = w_flat.shape[0]
            w_oihw = jnp.transpose(
                w_flat.astype(jnp.float32).reshape(cout, 3, 3, cin), (0, 3, 1, 2))
            x = lax.conv_general_dilated(
                x, w_oihw, (1, 1), "SAME",
                dimension_numbers=("NCHW", "OIHW", "NCHW"))
            x = jnp.maximum(x + b.reshape(1, cout, 1, 1), 0.0)
            cin = cout
    n, c, h, w = x.shape
    x = x.reshape(n, c, POOL_OUT, h // POOL_OUT, POOL_OUT, w // POOL_OUT).mean(axis=(3, 5))
    f = x.reshape(n, -1)
    (w1, b1), (w2, b2), (w3, b3) = params["fc"]
    h1 = jnp.maximum(jnp.dot(f, w1) + b1, 0.0)
    h2 = jnp.maximum(jnp.dot(h1, w2) + b2, 0.0)
    return f, jnp.dot(h2, w3) + b3


# ----------------------------------- main ------------------------------------- #

if __name__ == "__main__":
    key = jax.random.PRNGKey(0)
    pkey, xkey = jax.random.split(key)
    params = init_params(pkey)

    # NCHW input like PyTorch; 28x28 so features -> 14x14 -> adaptive avg-pool 7x7.
    # Batch 4 keeps the grid even (v7x 2-TC split) with >1 step per core.
    n = 4
    x = jax.random.normal(xkey, (n, IN_CH, IMG, IMG), dtype=jnp.float32)

    feat_pad = features(params, x)            # (n, 16, 128) lane-dense
    logits = classifier(params, feat_pad)
    logits = jax.block_until_ready(logits)

    kk = POOL_OUT * POOL_OUT
    feats = feat_pad[:, :, :kk].reshape(n, -1)
    feats_ref, logits_ref = vgg_reference(params, x)

    assert logits.shape == (n, NUM_CLASSES)
    assert bool(jnp.allclose(feats, feats_ref, atol=2e-2, rtol=2e-2)), "features mismatch"
    assert bool(jnp.allclose(logits, logits_ref, atol=2e-2, rtol=2e-2)), "logits mismatch"
    print("KERNEL_OK")
</pallas_src>

<mosaic_0001>
module attributes {stable_mosaic.version = 11 : i64} {
  func.func @kernel(%arg0: i32, %arg1: memref<1x3x1000xf32, #tpu.memory_space<vmem>>, %arg2: memref<8x27xbf16, #tpu.memory_space<vmem>>, %arg3: memref<8x1xf32, #tpu.memory_space<vmem>>, %arg4: memref<1x840xf32, #tpu.memory_space<vmem>>, %arg5: memref<8x72xbf16, #tpu.memory_space<vmem>>, %arg6: memref<8x1xf32, #tpu.memory_space<vmem>>, %arg7: memref<1x840xf32, #tpu.memory_space<vmem>>, %arg8: memref<840x224xbf16, #tpu.memory_space<vmem>>, %arg9: memref<16x72xbf16, #tpu.memory_space<vmem>>, %arg10: memref<16x1xf32, #tpu.memory_space<vmem>>, %arg11: memref<1x224xf32, #tpu.memory_space<vmem>>, %arg12: memref<16x144xbf16, #tpu.memory_space<vmem>>, %arg13: memref<16x1xf32, #tpu.memory_space<vmem>>, %arg14: memref<1x224xf32, #tpu.memory_space<vmem>>, %arg15: memref<224x128xbf16, #tpu.memory_space<vmem>>, %arg16: memref<1x16x128xf32, #tpu.memory_space<vmem>>, %arg17: memref<8x1000xf32, #tpu.memory_space<vmem>>, %arg18: memref<27x840xf32, #tpu.memory_space<vmem>>, %arg19: memref<8x1000xf32, #tpu.memory_space<vmem>>, %arg20: memref<72x840xf32, #tpu.memory_space<vmem>>, %arg21: memref<8x370xf32, #tpu.memory_space<vmem>>, %arg22: memref<16x370xf32, #tpu.memory_space<vmem>>, %arg23: memref<72x224xf32, #tpu.memory_space<vmem>>, %arg24: memref<16x370xf32, #tpu.memory_space<vmem>>, %arg25: memref<144x224xf32, #tpu.memory_space<vmem>>) attributes {dimension_semantics = [#tpu.dimension_semantics<parallel>], iteration_bounds = array<i64: 4>, scalar_prefetch = 0 : i64, scratch_operands = 9 : i64, tpu.core_type = #tpu.core_type<tc>, window_params = [{transform_indices = @transform_0, window_bounds = array<i64: 1, 3, 1000>}, {pipeline_mode = #tpu.pipeline_mode<synchronous>, transform_indices = @transform_1, window_bounds = array<i64: 8, 27>}, {pipeline_mode = #tpu.pipeline_mode<synchronous>, transform_indices = @transform_2, window_bounds = array<i64: 8, 1>}, {pipeline_mode = #tpu.pipeline_mode<synchronous>, transform_indices = @transform_3, window_bounds = array<i64: 1, 840>}, {pipeline_mode = #tpu.pipeline_mode<synchronous>, transform_indices = @transform_4, window_bounds = array<i64: 8, 72>}, {pipeline_mode = #tpu.pipeline_mode<synchronous>, transform_indices = @transform_5, window_bounds = array<i64: 8, 1>}, {pipeline_mode = #tpu.pipeline_mode<synchronous>, transform_indices = @transform_6, window_bounds = array<i64: 1, 840>}, {pipeline_mode = #tpu.pipeline_mode<synchronous>, transform_indices = @transform_7, window_bounds = array<i64: 840, 224>}, {pipeline_mode = #tpu.pipeline_mode<synchronous>, transform_indices = @transform_8, window_bounds = array<i64: 16, 72>}, {pipeline_mode = #tpu.pipeline_mode<synchronous>, transform_indices = @transform_9, window_bounds = array<i64: 16, 1>}, {pipeline_mode = #tpu.pipeline_mode<synchronous>, transform_indices = @transform_10, window_bounds = array<i64: 1, 224>}, {pipeline_mode = #tpu.pipeline_mode<synchronous>, transform_indices = @transform_11, window_bounds = array<i64: 16, 144>}, {pipeline_mode = #tpu.pipeline_mode<synchronous>, transform_indices = @transform_12, window_bounds = array<i64: 16, 1>}, {pipeline_mode = #tpu.pipeline_mode<synchronous>, transform_indices = @transform_13, window_bounds = array<i64: 1, 224>}, {pipeline_mode = #tpu.pipeline_mode<synchronous>, transform_indices = @transform_14, window_bounds = array<i64: 224, 128>}, {transform_indices = @transform_15, window_bounds = array<i64: 1, 16, 128>}]} {
    %c0 = arith.constant 0 : index
    %c0_0 = arith.constant 0 : index
    %c97 = arith.constant 97 : index
    %0 = vector.load %arg1[%c0, %c0_0, %c97] : memref<1x3x1000xf32, #tpu.memory_space<vmem>>, vector<1x3x840xf32>
    %1 = vector.shape_cast %0 : vector<1x3x840xf32> to vector<3x840xf32>
    %c0_1 = arith.constant 0 : index
    %c0_2 = arith.constant 0 : index
    %2 = vector.load %arg18[%c0_1, %c0_2] : memref<27x840xf32, #tpu.memory_space<vmem>>, vector<3x840xf32>
    tpu.vector_store %arg18[%c0_1, %c0_2], %1 {strides = array<i32>} : memref<27x840xf32, #tpu.memory_space<vmem>>, vector<3x840xf32>,
    %c0_3 = arith.constant 0 : index
    %c0_4 = arith.constant 0 : index
    %c98 = arith.constant 98 : index
    %3 = vector.load %arg1[%c0_3, %c0_4, %c98] : memref<1x3x1000xf32, #tpu.memory_space<vmem>>, vector<1x3x840xf32>
    %4 = vector.shape_cast %3 : vector<1x3x840xf32> to vector<3x840xf32>
    %c3 = arith.constant 3 : index
    %c0_5 = arith.constant 0 : index
    %5 = vector.load %arg18[%c3, %c0_5] : memref<27x840xf32, #tpu.memory_space<vmem>>, vector<3x840xf32>
    tpu.vector_store %arg18[%c3, %c0_5], %4 {strides = array<i32>} : memref<27x840xf32, #tpu.memory_space<vmem>>, vector<3x840xf32>,
    %c0_6 = arith.constant 0 : index
    %c0_7 = arith.constant 0 : index
    %c99 = arith.constant 99 : index
    %6 = vector.load %arg1[%c0_6, %c0_7, %c99] : memref<1x3x1000xf32, #tpu.memory_space<vmem>>, vector<1x3x840xf32>
    %7 = vector.shape_cast %6 : vector<1x3x840xf32> to vector<3x840xf32>
    %c6 = arith.constant 6 : index
    %c0_8 = arith.constant 0 : index
    %8 = vector.load %arg18[%c6, %c0_8] : memref<27x840xf32, #tpu.memory_space<vmem>>, vector<3x840xf32>
    tpu.vector_store %arg18[%c6, %c0_8], %7 {strides = array<i32>} : memref<27x840xf32, #tpu.memory_space<vmem>>, vector<3x840xf32>,
    %c0_9 = arith.constant 0 : index
    %c0_10 = arith.constant 0 : index
    %c127 = arith.constant 127 : index
    %9 = vector.load %arg1[%c0_9, %c0_10, %c127] : memref<1x3x1000xf32, #tpu.memory_space<vmem>>, vector<1x3x840xf32>
    %10 = vector.shape_cast %9 : vector<1x3x840xf32> to vector<3x840xf32>
    %c9 = arith.constant 9 : index
    %c0_11 = arith.constant 0 : index
    %11 = vector.load %arg18[%c9, %c0_11] : memref<27x840xf32, #tpu.memory_space<vmem>>, vector<3x840xf32>
    tpu.vector_store %arg18[%c9, %c0_11], %10 {strides = array<i32>} : memref<27x840xf32, #tpu.memory_space<vmem>>, vector<3x840xf32>,
    %c0_12 = arith.constant 0 : index
    %c0_13 = arith.constant 0 : index
    %c128 = arith.constant 128 : index
    %12 = vector.load %arg1[%c0_12, %c0_13, %c128] : memref<1x3x1000xf32, #tpu.memory_space<vmem>>, vector<1x3x840xf32>
    %13 = vector.shape_cast %12 : vector<1x3x840xf32> to vector<3x840xf32>
    %c12 = arith.constant 12 : index
    %c0_14 = arith.constant 0 : index
    %14 = vector.load %arg18[%c12, %c0_14] : memref<27x840xf32, #tpu.memory_space<vmem>>, vector<3x840xf32>
    tpu.vector_store %arg18[%c12, %c0_14], %13 {strides = array<i32>} : memref<27x840xf32, #tpu.memory_space<vmem>>, vector<3x840xf32>,
    %c0_15 = arith.constant 0 : index
    %c0_16 = arith.constant 0 : index
    %c129 = arith.constant 129 : index
    %15 = vector.load %arg1[%c0_15, %c0_16, %c129] : memref<1x3x1000xf32, #tpu.memory_space<vmem>>, vector<1x3x840xf32>
    %16 = vector.shape_cast %15 : vector<1x3x840xf32> to vector<3x840xf32>
    %c15 = arith.constant 15 : index
    %c0_17 = arith.constant 0 : index
    %17 = vector.load %arg18[%c15, %c0_17] : memref<27x840xf32, #tpu.memory_space<vmem>>, vector<3x840xf32>
    tpu.vector_store %arg18[%c15, %c0_17], %16 {strides = array<i32>} : memref<27x840xf32, #tpu.memory_space<vmem>>, vector<3x840xf32>,
    %c0_18 = arith.constant 0 : index
    %c0_19 = arith.constant 0 : index
    %c157 = arith.constant 157 : index
    %18 = vector.load %arg1[%c0_18, %c0_19, %c157] : memref<1x3x1000xf32, #tpu.memory_space<vmem>>, vector<1x3x840xf32>
    %19 = vector.shape_cast %18 : vector<1x3x840xf32> to vector<3x840xf32>
    %c18 = arith.constant 18 : index
    %c0_20 = arith.constant 0 : index
    %20 = vector.load %arg18[%c18, %c0_20] : memref<27x840xf32, #tpu.memory_space<vmem>>, vector<3x840xf32>
    tpu.vector_store %arg18[%c18, %c0_20], %19 {strides = array<i32>} : memref<27x840xf32, #tpu.memory_space<vmem>>, vector<3x840xf32>,
    %c0_21 = arith.constant 0 : index
    %c0_22 = arith.constant 0 : index
    %c158 = arith.constant 158 : index
    %21 = vector.load %arg1[%c0_21, %c0_22, %c158] : memref<1x3x1000xf32, #tpu.memory_space<vmem>>, vector<1x3x840xf32>
    %22 = vector.shape_cast %21 : vector<1x3x840xf32> to vector<3x840xf32>
    %c21 = arith.constant 21 : index
    %c0_23 = arith.constant 0 : index
    %23 = vector.load %arg18[%c21, %c0_23] : memref<27x840xf32, #tpu.memory_space<vmem>>, vector<3x840xf32>
    tpu.vector_store %arg18[%c21, %c0_23], %22 {strides = array<i32>} : memref<27x840xf32, #tpu.memory_space<vmem>>, vector<3x840xf32>,
    %c0_24 = arith.constant 0 : index
    %c0_25 = arith.constant 0 : index
    %c159 = arith.constant 159 : index
    %24 = vector.load %arg1[%c0_24, %c0_25, %c159] : memref<1x3x1000xf32, #tpu.memory_space<vmem>>, vector<1x3x840xf32>
    %25 = vector.shape_cast %24 : vector<1x3x840xf32> to vector<3x840xf32>
    %c24 = arith.constant 24 : index
    %c0_26 = arith.constant 0 : index
    %26 = vector.load %arg18[%c24, %c0_26] : memref<27x840xf32, #tpu.memory_space<vmem>>, vector<3x840xf32>
    tpu.vector_store %arg18[%c24, %c0_26], %25 {strides = array<i32>} : memref<27x840xf32, #tpu.memory_space<vmem>>, vector<3x840xf32>,
    %c0_27 = arith.constant 0 : index
    %c0_28 = arith.constant 0 : index
    %27 = vector.load %arg2[%c0_27, %c0_28] : memref<8x27xbf16, #tpu.memory_space<vmem>>, vector<8x27xbf16>
    %c0_29 = arith.constant 0 : index
    %c0_30 = arith.constant 0 : index
    %28 = vector.load %arg18[%c0_29, %c0_30] : memref<27x840xf32, #tpu.memory_space<vmem>>, vector<27x840xf32>
    %29 = arith.truncf %28 : vector<27x840xf32> to vector<27x840xbf16>
    %cst = arith.constant dense<0.000000e+00> : vector<8x840xf32>
    %30 = tpu.matmul %27, %29, %cst {dimension_numbers = #tpu.dot_dimension_numbers<[1], [0], [0], [1], [0, 0, 1, 1], [], []>} : vector<8x27xbf16>, vector<27x840xbf16>, vector<8x840xf32> -> vector<8x840xf32>
    %c0_31 = arith.constant 0 : index
    %c0_32 = arith.constant 0 : index
    %31 = vector.load %arg3[%c0_31, %c0_32] : memref<8x1xf32, #tpu.memory_space<vmem>>, vector<8x1xf32>
    %32 = vector.broadcast %31 : vector<8x1xf32> to vector<8x840xf32>
    %33 = arith.addf %30, %32 : vector<8x840xf32>
    %cst_33 = arith.constant 0.000000e+00 : f32
    %34 = vector.broadcast %cst_33 : f32 to vector<8x840xf32>
    %35 = arith.maximumf %33, %34 : vector<8x840xf32>
    %c0_34 = arith.constant 0 : index
    %c0_35 = arith.constant 0 : index
    %36 = vector.load %arg4[%c0_34, %c0_35] : memref<1x840xf32, #tpu.memory_space<vmem>>, vector<1x840xf32>
    %37 = vector.broadcast %36 : vector<1x840xf32> to vector<8x840xf32>
    %38 = arith.mulf %35, %37 : vector<8x840xf32>
    %cst_36 = arith.constant 0.000000e+00 : f32
    %39 = vector.broadcast %cst_36 : f32 to vector<8x128xf32>
    %c0_37 = arith.constant 0 : index
    %c0_38 = arith.constant 0 : index
    %40 = vector.load %arg17[%c0_37, %c0_38] : memref<8x1000xf32, #tpu.memory_space<vmem>>, vector<8x128xf32>
    tpu.vector_store %arg17[%c0_37, %c0_38], %39 {strides = array<i32>} : memref<8x1000xf32, #tpu.memory_space<vmem>>, vector<8x128xf32>,
    %c0_39 = arith.constant 0 : index
    %c128_40 = arith.constant 128 : index
    %41 = vector.load %arg17[%c0_39, %c128_40] : memref<8x1000xf32, #tpu.memory_space<vmem>>, vector<8x840xf32>
    tpu.vector_store %arg17[%c0_39, %c128_40], %38 {strides = array<i32>} : memref<8x1000xf32, #tpu.memory_space<vmem>>, vector<8x840xf32>,
    %cst_41 = arith.constant 0.000000e+00 : f32
    %42 = vector.broadcast %cst_41 : f32 to vector<8x32xf32>
    %c0_42 = arith.constant 0 : index
    %c968 = arith.constant 968 : index
    %43 = vector.load %arg17[%c0_42, %c968] : memref<8x1000xf32, #tpu.memory_space<vmem>>, vector<8x32xf32>
    tpu.vector_store %arg17[%c0_42, %c968], %42 {strides = array<i32>} : memref<8x1000xf32, #tpu.memory_space<vmem>>, vector<8x32xf32>,
    %c0_43 = arith.constant 0 : index
    %c97_44 = arith.constant 97 : index
    %44 = vector.load %arg17[%c0_43, %c97_44] : memref<8x1000xf32, #tpu.memory_space<vmem>>, vector<8x840xf32>
    %c0_45 = arith.constant 0 : index
    %c0_46 = arith.constant 0 : index
    %45 = vector.load %arg20[%c0_45, %c0_46] : memref<72x840xf32, #tpu.memory_space<vmem>>, vector<8x840xf32>
    tpu.vector_store %arg20[%c0_45, %c0_46], %44 {strides = array<i32>} : memref<72x840xf32, #tpu.memory_space<vmem>>, vector<8x840xf32>,
    %c0_47 = arith.constant 0 : index
    %c98_48 = arith.constant 98 : index
    %46 = vector.load %arg17[%c0_47, %c98_48] : memref<8x1000xf32, #tpu.memory_space<vmem>>, vector<8x840xf32>
    %c8 = arith.constant 8 : index
    %c0_49 = arith.constant 0 : index
    %47 = vector.load %arg20[%c8, %c0_49] : memref<72x840xf32, #tpu.memory_space<vmem>>, vector<8x840xf32>
    tpu.vector_store %arg20[%c8, %c0_49], %46 {strides = array<i32>} : memref<72x840xf32, #tpu.memory_space<vmem>>, vector<8x840xf32>,
    %c0_50 = arith.constant 0 : index
    %c99_51 = arith.constant 99 : index
    %48 = vector.load %arg17[%c0_50, %c99_51] : memref<8x1000xf32, #tpu.memory_space<vmem>>, vector<8x840xf32>
    %c16 = arith.constant 16 : index
    %c0_52 = arith.constant 0 : index
    %49 = vector.load %arg20[%c16, %c0_52] : memref<72x840xf32, #tpu.memory_space<vmem>>, vector<8x840xf32>
    tpu.vector_store %arg20[%c16, %c0_52], %48 {strides = array<i32>} : memref<72x840xf32, #tpu.memory_space<vmem>>, vector<8x840xf32>,
    %c0_53 = arith.constant 0 : index
    %c127_54 = arith.constant 127 : index
    %50 = vector.load %arg17[%c0_53, %c127_54] : memref<8x1000xf32, #tpu.memory_space<vmem>>, vector<8x840xf32>
    %c24_55 = arith.constant 24 : index
    %c0_56 = arith.constant 0 : index
    %51 = vector.load %arg20[%c24_55, %c0_56] : memref<72x840xf32, #tpu.memory_space<vmem>>, vector<8x840xf32>
    tpu.vector_store %arg20[%c24_55, %c0_56], %50 {strides = array<i32>} : memref<72x840xf32, #tpu.memory_space<vmem>>, vector<8x840xf32>,
    %c0_57 = arith.constant 0 : index
    %c128_58 = arith.constant 128 : index
    %52 = vector.load %arg17[%c0_57, %c128_58] : memref<8x1000xf32, #tpu.memory_space<vmem>>, vector<8x840xf32>
    %c32 = arith.constant 32 : index
    %c0_59 = arith.constant 0 : index
    %53 = vector.load %arg20[%c32, %c0_59] : memref<72x840xf32, #tpu.memory_space<vmem>>, vector<8x840xf32>
    tpu.vector_store %arg20[%c32, %c0_59], %52 {strides = array<i32>} : memref<72x840xf32, #tpu.memory_space<vmem>>, vector<8x840xf32>,
    %c0_60 = arith.constant 0 : index
    %c129_61 = arith.constant 129 : index
    %54 = vector.load %arg17[%c0_60, %c129_61] : memref<8x1000xf32, #tpu.memory_space<vmem>>, vector<8x840xf32>
    %c40 = arith.constant 40 : index
    %c0_62 = arith.constant 0 : index
    %55 = vector.load %arg20[%c40, %c0_62] : memref<72x840xf32, #tpu.memory_space<vmem>>, vector<8x840xf32>
    tpu.vector_store %arg20[%c40, %c0_62], %54 {strides = array<i32>} : memref<72x840xf32, #tpu.memory_space<vmem>>, vector<8x840xf32>,
    %c0_63 = arith.constant 0 : index
    %c157_64 = arith.constant 157 : index
    %56 = vector.load %arg17[%c0_63, %c157_64] : memref<8x1000xf32, #tpu.memory_space<vmem>>, vector<8x840xf32>
    %c48 = arith.constant 48 : index
    %c0_65 = arith.constant 0 : index
    %57 = vector.load %arg20[%c48, %c0_65] : memref<72x840xf32, #tpu.memory_space<vmem>>, vector<8x840xf32>
    tpu.vector_store %arg20[%c48, %c0_65], %56 {strides = array<i32>} : memref<72x840xf32, #tpu.memory_space<vmem>>, vector<8x840xf32>,
    %c0_66 = arith.constant 0 : index
    %c158_67 = arith.constant 158 : index
    %58 = vector.load %arg17[%c0_66, %c158_67] : memref<8x1000xf32, #tpu.memory_space<vmem>>, vector<8x840xf32>
    %c56 = arith.constant 56 : index
    %c0_68 = arith.constant 0 : index
    %59 = vector.load %arg20[%c56, %c0_68] : memref<72x840xf32, #tpu.memory_space<vmem>>, vector<8x840xf32>
    tpu.vector_store %arg20[%c56, %c0_68], %58 {strides = array<i32>} : memref<72x840xf32, #tpu.memory_space<vmem>>, vector<8x840xf32>,
    %c0_69 = arith.constant 0 : index
    %c159_70 = arith.constant 159 : index
    %60 = vector.load %arg17[%c0_69, %c159_70] : memref<8x1000xf32, #tpu.memory_space<vmem>>, vector<8x840xf32>
    %c64 = arith.constant 64 : index
    %c0_71 = arith.constant 0 : index
    %61 = vector.load %arg20[%c64, %c0_71] : memref<72x840xf32, #tpu.memory_space<vmem>>, vector<8x840xf32>
    tpu.vector_store %arg20[%c64, %c0_71], %60 {strides = array<i32>} : memref<72x840xf32, #tpu.memory_space<vmem>>, vector<8x840xf32>,
    %c0_72 = arith.constant 0 : index
    %c0_73 = arith.constant 0 : index
    %62 = vector.load %arg5[%c0_72, %c0_73] : memref<8x72xbf16, #tpu.memory_space<vmem>>, vector<8x72xbf16>
    %c0_74 = arith.constant 0 : index
    %c0_75 = arith.constant 0 : index
    %63 = vector.load %arg20[%c0_74, %c0_75] : memref<72x840xf32, #tpu.memory_space<vmem>>, vector<72x840xf32>
    %64 = arith.truncf %63 : vector<72x840xf32> to vector<72x840xbf16>
    %cst_76 = arith.constant dense<0.000000e+00> : vector<8x840xf32>
    %65 = tpu.matmul %62, %64, %cst_76 {dimension_numbers = #tpu.dot_dimension_numbers<[1], [0], [0], [1], [0, 0, 1, 1], [], []>} : vector<8x72xbf16>, vector<72x840xbf16>, vector<8x840xf32> -> vector<8x840xf32>
    %c0_77 = arith.constant 0 : index
    %c0_78 = arith.constant 0 : index
    %66 = vector.load %arg6[%c0_77, %c0_78] : memref<8x1xf32, #tpu.memory_space<vmem>>, vector<8x1xf32>
    %67 = vector.broadcast %66 : vector<8x1xf32> to vector<8x840xf32>
    %68 = arith.addf %65, %67 : vector<8x840xf32>
    %cst_79 = arith.constant 0.000000e+00 : f32
    %69 = vector.broadcast %cst_79 : f32 to vector<8x840xf32>
    %70 = arith.maximumf %68, %69 : vector<8x840xf32>
    %c0_80 = arith.constant 0 : index
    %c0_81 = arith.constant 0 : index
    %71 = vector.load %arg7[%c0_80, %c0_81] : memref<1x840xf32, #tpu.memory_space<vmem>>, vector<1x840xf32>
    %72 = vector.broadcast %71 : vector<1x840xf32> to vector<8x840xf32>
    %73 = arith.mulf %70, %72 : vector<8x840xf32>
    %cst_82 = arith.constant 0.000000e+00 : f32
    %74 = vector.broadcast %cst_82 : f32 to vector<8x128xf32>
    %c0_83 = arith.constant 0 : index
    %c0_84 = arith.constant 0 : index
    %75 = vector.load %arg19[%c0_83, %c0_84] : memref<8x1000xf32, #tpu.memory_space<vmem>>, vector<8x128xf32>
    tpu.vector_store %arg19[%c0_83, %c0_84], %74 {strides = array<i32>} : memref<8x1000xf32, #tpu.memory_space<vmem>>, vector<8x128xf32>,
    %c0_85 = arith.constant 0 : index
    %c128_86 = arith.constant 128 : index
    %76 = vector.load %arg19[%c0_85, %c128_86] : memref<8x1000xf32, #tpu.memory_space<vmem>>, vector<8x840xf32>
    tpu.vector_store %arg19[%c0_85, %c128_86], %73 {strides = array<i32>} : memref<8x1000xf32, #tpu.memory_space<vmem>>, vector<8x840xf32>,
    %cst_87 = arith.constant 0.000000e+00 : f32
    %77 = vector.broadcast %cst_87 : f32 to vector<8x32xf32>
    %c0_88 = arith.constant 0 : index
    %c968_89 = arith.constant 968 : index
    %78 = vector.load %arg19[%c0_88, %c968_89] : memref<8x1000xf32, #tpu.memory_space<vmem>>, vector<8x32xf32>
    tpu.vector_store %arg19[%c0_88, %c968_89], %77 {strides = array<i32>} : memref<8x1000xf32, #tpu.memory_space<vmem>>, vector<8x32xf32>,
    %c0_90 = arith.constant 0 : index
    %c128_91 = arith.constant 128 : index
    %79 = vector.load %arg19[%c0_90, %c128_91] : memref<8x1000xf32, #tpu.memory_space<vmem>>, vector<8x840xf32>
    %c0_92 = arith.constant 0 : index
    %c129_93 = arith.constant 129 : index
    %80 = vector.load %arg19[%c0_92, %c129_93] : memref<8x1000xf32, #tpu.memory_space<vmem>>, vector<8x840xf32>
    %81 = arith.maximumf %79, %80 : vector<8x840xf32>
    %c0_94 = arith.constant 0 : index
    %c158_95 = arith.constant 158 : index
    %82 = vector.load %arg19[%c0_94, %c158_95] : memref<8x1000xf32, #tpu.memory_space<vmem>>, vector<8x840xf32>
    %c0_96 = arith.constant 0 : index
    %c159_97 = arith.constant 159 : index
    %83 = vector.load %arg19[%c0_96, %c159_97] : memref<8x1000xf32, #tpu.memory_space<vmem>>, vector<8x840xf32>
    %84 = arith.maximumf %82, %83 : vector<8x840xf32>
    %85 = arith.maximumf %81, %84 : vector<8x840xf32>
    %86 = arith.truncf %85 : vector<8x840xf32> to vector<8x840xbf16>
    %c0_98 = arith.constant 0 : index
    %c0_99 = arith.constant 0 : index
    %87 = vector.load %arg8[%c0_98, %c0_99] : memref<840x224xbf16, #tpu.memory_space<vmem>>, vector<840x224xbf16>
    %cst_100 = arith.constant dense<0.000000e+00> : vector<8x224xf32>
    %88 = tpu.matmul %86, %87, %cst_100 {dimension_numbers = #tpu.dot_dimension_numbers<[1], [0], [0], [1], [0, 0, 1, 1], [], []>} : vector<8x840xbf16>, vector<840x224xbf16>, vector<8x224xf32> -> vector<8x224xf32>
    %cst_101 = arith.constant 0.000000e+00 : f32
    %89 = vector.broadcast %cst_101 : f32 to vector<8x128xf32>
    %c0_102 = arith.constant 0 : index
    %c0_103 = arith.constant 0 : index
    %90 = vector.load %arg21[%c0_102, %c0_103] : memref<8x370xf32, #tpu.memory_space<vmem>>, vector<8x128xf32>
    tpu.vector_store %arg21[%c0_102, %c0_103], %89 {strides = array<i32>} : memref<8x370xf32, #tpu.memory_space<vmem>>, vector<8x128xf32>,
    %c0_104 = arith.constant 0 : index
    %c128_105 = arith.constant 128 : index
    %91 = vector.load %arg21[%c0_104, %c128_105] : memref<8x370xf32, #tpu.memory_space<vmem>>, vector<8x224xf32>
    tpu.vector_store %arg21[%c0_104, %c128_105], %88 {strides = array<i32>} : memref<8x370xf32, #tpu.memory_space<vmem>>, vector<8x224xf32>,
    %cst_106 = arith.constant 0.000000e+00 : f32
    %92 = vector.broadcast %cst_106 : f32 to vector<8x18xf32>
    %c0_107 = arith.constant 0 : index
    %c352 = arith.constant 352 : index
    %93 = vector.load %arg21[%c0_107, %c352] : memref<8x370xf32, #tpu.memory_space<vmem>>, vector<8x18xf32>
    tpu.vector_store %arg21[%c0_107, %c352], %92 {strides = array<i32>} : memref<8x370xf32, #tpu.memory_space<vmem>>, vector<8x18xf32>,
    %c0_108 = arith.constant 0 : index
    %c111 = arith.constant 111 : index
    %94 = vector.load %arg21[%c0_108, %c111] : memref<8x370xf32, #tpu.memory_space<vmem>>, vector<8x224xf32>
    %c0_109 = arith.constant 0 : index
    %c0_110 = arith.constant 0 : index
    %95 = vector.load %arg23[%c0_109, %c0_110] : memref<72x224xf32, #tpu.memory_space<vmem>>, vector<8x224xf32>
    tpu.vector_store %arg23[%c0_109, %c0_110], %94 {strides = array<i32>} : memref<72x224xf32, #tpu.memory_space<vmem>>, vector<8x224xf32>,
    %c0_111 = arith.constant 0 : index
    %c112 = arith.constant 112 : index
    %96 = vector.load %arg21[%c0_111, %c112] : memref<8x370xf32, #tpu.memory_space<vmem>>, vector<8x224xf32>
    %c8_112 = arith.constant 8 : index
    %c0_113 = arith.constant 0 : index
    %97 = vector.load %arg23[%c8_112, %c0_113] : memref<72x224xf32, #tpu.memory_space<vmem>>, vector<8x224xf32>
    tpu.vector_store %arg23[%c8_112, %c0_113], %96 {strides = array<i32>} : memref<72x224xf32, #tpu.memory_space<vmem>>, vector<8x224xf32>,
    %c0_114 = arith.constant 0 : index
    %c113 = arith.constant 113 : index
    %98 = vector.load %arg21[%c0_114, %c113] : memref<8x370xf32, #tpu.memory_space<vmem>>, vector<8x224xf32>
    %c16_115 = arith.constant 16 : index
    %c0_116 = arith.constant 0 : index
    %99 = vector.load %arg23[%c16_115, %c0_116] : memref<72x224xf32, #tpu.memory_space<vmem>>, vector<8x224xf32>
    tpu.vector_store %arg23[%c16_115, %c0_116], %98 {strides = array<i32>} : memref<72x224xf32, #tpu.memory_space<vmem>>, vector<8x224xf32>,
    %c0_117 = arith.constant 0 : index
    %c127_118 = arith.constant 127 : index
    %100 = vector.load %arg21[%c0_117, %c127_118] : memref<8x370xf32, #tpu.memory_space<vmem>>, vector<8x224xf32>
    %c24_119 = arith.constant 24 : index
    %c0_120 = arith.constant 0 : index
    %101 = vector.load %arg23[%c24_119, %c0_120] : memref<72x224xf32, #tpu.memory_space<vmem>>, vector<8x224xf32>
    tpu.vector_store %arg23[%c24_119, %c0_120], %100 {strides = array<i32>} : memref<72x224xf32, #tpu.memory_space<vmem>>, vector<8x224xf32>,
    %c0_121 = arith.constant 0 : index
    %c128_122 = arith.constant 128 : index
    %102 = vector.load %arg21[%c0_121, %c128_122] : memref<8x370xf32, #tpu.memory_space<vmem>>, vector<8x224xf32>
    %c32_123 = arith.constant 32 : index
    %c0_124 = arith.constant 0 : index
    %103 = vector.load %arg23[%c32_123, %c0_124] : memref<72x224xf32, #tpu.memory_space<vmem>>, vector<8x224xf32>
    tpu.vector_store %arg23[%c32_123, %c0_124], %102 {strides = array<i32>} : memref<72x224xf32, #tpu.memory_space<vmem>>, vector<8x224xf32>,
    %c0_125 = arith.constant 0 : index
    %c129_126 = arith.constant 129 : index
    %104 = vector.load %arg21[%c0_125, %c129_126] : memref<8x370xf32, #tpu.memory_space<vmem>>, vector<8x224xf32>
    %c40_127 = arith.constant 40 : index
    %c0_128 = arith.constant 0 : index
    %105 = vector.load %arg23[%c40_127, %c0_128] : memref<72x224xf32, #tpu.memory_space<vmem>>, vector<8x224xf32>
    tpu.vector_store %arg23[%c40_127, %c0_128], %104 {strides = array<i32>} : memref<72x224xf32, #tpu.memory_space<vmem>>, vector<8x224xf32>,
    %c0_129 = arith.constant 0 : index
    %c143 = arith.constant 143 : index
    %106 = vector.load %arg21[%c0_129, %c143] : memref<8x370xf32, #tpu.memory_space<vmem>>, vector<8x224xf32>
    %c48_130 = arith.constant 48 : index
    %c0_131 = arith.constant 0 : index
    %107 = vector.load %arg23[%c48_130, %c0_131] : memref<72x224xf32, #tpu.memory_space<vmem>>, vector<8x224xf32>
    tpu.vector_store %arg23[%c48_130, %c0_131], %106 {strides = array<i32>} : memref<72x224xf32, #tpu.memory_space<vmem>>, vector<8x224xf32>,
    %c0_132 = arith.constant 0 : index
    %c144 = arith.constant 144 : index
    %108 = vector.load %arg21[%c0_132, %c144] : memref<8x370xf32, #tpu.memory_space<vmem>>, vector<8x224xf32>
    %c56_133 = arith.constant 56 : index
    %c0_134 = arith.constant 0 : index
    %109 = vector.load %arg23[%c56_133, %c0_134] : memref<72x224xf32, #tpu.memory_space<vmem>>, vector<8x224xf32>
    tpu.vector_store %arg23[%c56_133, %c0_134], %108 {strides = array<i32>} : memref<72x224xf32, #tpu.memory_space<vmem>>, vector<8x224xf32>,
    %c0_135 = arith.constant 0 : index
    %c145 = arith.constant 145 : index
    %110 = vector.load %arg21[%c0_135, %c145] : memref<8x370xf32, #tpu.memory_space<vmem>>, vector<8x224xf32>
    %c64_136 = arith.constant 64 : index
    %c0_137 = arith.constant 0 : index
    %111 = vector.load %arg23[%c64_136, %c0_137] : memref<72x224xf32, #tpu.memory_space<vmem>>, vector<8x224xf32>
    tpu.vector_store %arg23[%c64_136, %c0_137], %110 {strides = array<i32>} : memref<72x224xf32, #tpu.memory_space<vmem>>, vector<8x224xf32>,
    %c0_138 = arith.constant 0 : index
    %c0_139 = arith.constant 0 : index
    %112 = vector.load %arg9[%c0_138, %c0_139] : memref<16x72xbf16, #tpu.memory_space<vmem>>, vector<16x72xbf16>
    %c0_140 = arith.constant 0 : index
    %c0_141 = arith.constant 0 : index
    %113 = vector.load %arg23[%c0_140, %c0_141] : memref<72x224xf32, #tpu.memory_space<vmem>>, vector<72x224xf32>
    %114 = arith.truncf %113 : vector<72x224xf32> to vector<72x224xbf16>
    %cst_142 = arith.constant dense<0.000000e+00> : vector<16x224xf32>
    %115 = tpu.matmul %112, %114, %cst_142 {dimension_numbers = #tpu.dot_dimension_numbers<[1], [0], [0], [1], [0, 0, 1, 1], [], []>} : vector<16x72xbf16>, vector<72x224xbf16>, vector<16x224xf32> -> vector<16x224xf32>
    %c0_143 = arith.constant 0 : index
    %c0_144 = arith.constant 0 : index
    %116 = vector.load %arg10[%c0_143, %c0_144] : memref<16x1xf32, #tpu.memory_space<vmem>>, vector<16x1xf32>
    %117 = vector.broadcast %116 : vector<16x1xf32> to vector<16x224xf32>
    %118 = arith.addf %115, %117 : vector<16x224xf32>
    %cst_145 = arith.constant 0.000000e+00 : f32
    %119 = vector.broadcast %cst_145 : f32 to vector<16x224xf32>
    %120 = arith.maximumf %118, %119 : vector<16x224xf32>
    %c0_146 = arith.constant 0 : index
    %c0_147 = arith.constant 0 : index
    %121 = vector.load %arg11[%c0_146, %c0_147] : memref<1x224xf32, #tpu.memory_space<vmem>>, vector<1x224xf32>
    %122 = vector.broadcast %121 : vector<1x224xf32> to vector<16x224xf32>
    %123 = arith.mulf %120, %122 : vector<16x224xf32>
    %cst_148 = arith.constant 0.000000e+00 : f32
    %124 = vector.broadcast %cst_148 : f32 to vector<16x128xf32>
    %c0_149 = arith.constant 0 : index
    %c0_150 = arith.constant 0 : index
    %125 = vector.load %arg22[%c0_149, %c0_150] : memref<16x370xf32, #tpu.memory_space<vmem>>, vector<16x128xf32>
    tpu.vector_store %arg22[%c0_149, %c0_150], %124 {strides = array<i32>} : memref<16x370xf32, #tpu.memory_space<vmem>>, vector<16x128xf32>,
    %c0_151 = arith.constant 0 : index
    %c128_152 = arith.constant 128 : index
    %126 = vector.load %arg22[%c0_151, %c128_152] : memref<16x370xf32, #tpu.memory_space<vmem>>, vector<16x224xf32>
    tpu.vector_store %arg22[%c0_151, %c128_152], %123 {strides = array<i32>} : memref<16x370xf32, #tpu.memory_space<vmem>>, vector<16x224xf32>,
    %cst_153 = arith.constant 0.000000e+00 : f32
    %127 = vector.broadcast %cst_153 : f32 to vector<16x18xf32>
    %c0_154 = arith.constant 0 : index
    %c352_155 = arith.constant 352 : index
    %128 = vector.load %arg22[%c0_154, %c352_155] : memref<16x370xf32, #tpu.memory_space<vmem>>, vector<16x18xf32>
    tpu.vector_store %arg22[%c0_154, %c352_155], %127 {strides = array<i32>} : memref<16x370xf32, #tpu.memory_space<vmem>>, vector<16x18xf32>,
    %c0_156 = arith.constant 0 : index
    %c111_157 = arith.constant 111 : index
    %129 = vector.load %arg22[%c0_156, %c111_157] : memref<16x370xf32, #tpu.memory_space<vmem>>, vector<16x224xf32>
    %c0_158 = arith.constant 0 : index
    %c0_159 = arith.constant 0 : index
    %130 = vector.load %arg25[%c0_158, %c0_159] : memref<144x224xf32, #tpu.memory_space<vmem>>, vector<16x224xf32>
    tpu.vector_store %arg25[%c0_158, %c0_159], %129 {strides = array<i32>} : memref<144x224xf32, #tpu.memory_space<vmem>>, vector<16x224xf32>,
    %c0_160 = arith.constant 0 : index
    %c112_161 = arith.constant 112 : index
    %131 = vector.load %arg22[%c0_160, %c112_161] : memref<16x370xf32, #tpu.memory_space<vmem>>, vector<16x224xf32>
    %c16_162 = arith.constant 16 : index
    %c0_163 = arith.constant 0 : index
    %132 = vector.load %arg25[%c16_162, %c0_163] : memref<144x224xf32, #tpu.memory_space<vmem>>, vector<16x224xf32>
    tpu.vector_store %arg25[%c16_162, %c0_163], %131 {strides = array<i32>} : memref<144x224xf32, #tpu.memory_space<vmem>>, vector<16x224xf32>,
    %c0_164 = arith.constant 0 : index
    %c113_165 = arith.constant 113 : index
    %133 = vector.load %arg22[%c0_164, %c113_165] : memref<16x370xf32, #tpu.memory_space<vmem>>, vector<16x224xf32>
    %c32_166 = arith.constant 32 : index
    %c0_167 = arith.constant 0 : index
    %134 = vector.load %arg25[%c32_166, %c0_167] : memref<144x224xf32, #tpu.memory_space<vmem>>, vector<16x224xf32>
    tpu.vector_store %arg25[%c32_166, %c0_167], %133 {strides = array<i32>} : memref<144x224xf32, #tpu.memory_space<vmem>>, vector<16x224xf32>,
    %c0_168 = arith.constant 0 : index
    %c127_169 = arith.constant 127 : index
    %135 = vector.load %arg22[%c0_168, %c127_169] : memref<16x370xf32, #tpu.memory_space<vmem>>, vector<16x224xf32>
    %c48_170 = arith.constant 48 : index
    %c0_171 = arith.constant 0 : index
    %136 = vector.load %arg25[%c48_170, %c0_171] : memref<144x224xf32, #tpu.memory_space<vmem>>, vector<16x224xf32>
    tpu.vector_store %arg25[%c48_170, %c0_171], %135 {strides = array<i32>} : memref<144x224xf32, #tpu.memory_space<vmem>>, vector<16x224xf32>,
    %c0_172 = arith.constant 0 : index
    %c128_173 = arith.constant 128 : index
    %137 = vector.load %arg22[%c0_172, %c128_173] : memref<16x370xf32, #tpu.memory_space<vmem>>, vector<16x224xf32>
    %c64_174 = arith.constant 64 : index
    %c0_175 = arith.constant 0 : index
    %138 = vector.load %arg25[%c64_174, %c0_175] : memref<144x224xf32, #tpu.memory_space<vmem>>, vector<16x224xf32>
    tpu.vector_store %arg25[%c64_174, %c0_175], %137 {strides = array<i32>} : memref<144x224xf32, #tpu.memory_space<vmem>>, vector<16x224xf32>,
    %c0_176 = arith.constant 0 : index
    %c129_177 = arith.constant 129 : index
    %139 = vector.load %arg22[%c0_176, %c129_177] : memref<16x370xf32, #tpu.memory_space<vmem>>, vector<16x224xf32>
    %c80 = arith.constant 80 : index
    %c0_178 = arith.constant 0 : index
    %140 = vector.load %arg25[%c80, %c0_178] : memref<144x224xf32, #tpu.memory_space<vmem>>, vector<16x224xf32>
    tpu.vector_store %arg25[%c80, %c0_178], %139 {strides = array<i32>} : memref<144x224xf32, #tpu.memory_space<vmem>>, vector<16x224xf32>,
    %c0_179 = arith.constant 0 : index
    %c143_180 = arith.constant 143 : index
    %141 = vector.load %arg22[%c0_179, %c143_180] : memref<16x370xf32, #tpu.memory_space<vmem>>, vector<16x224xf32>
    %c96 = arith.constant 96 : index
    %c0_181 = arith.constant 0 : index
    %142 = vector.load %arg25[%c96, %c0_181] : memref<144x224xf32, #tpu.memory_space<vmem>>, vector<16x224xf32>
    tpu.vector_store %arg25[%c96, %c0_181], %141 {strides = array<i32>} : memref<144x224xf32, #tpu.memory_space<vmem>>, vector<16x224xf32>,
    %c0_182 = arith.constant 0 : index
    %c144_183 = arith.constant 144 : index
    %143 = vector.load %arg22[%c0_182, %c144_183] : memref<16x370xf32, #tpu.memory_space<vmem>>, vector<16x224xf32>
    %c112_184 = arith.constant 112 : index
    %c0_185 = arith.constant 0 : index
    %144 = vector.load %arg25[%c112_184, %c0_185] : memref<144x224xf32, #tpu.memory_space<vmem>>, vector<16x224xf32>
    tpu.vector_store %arg25[%c112_184, %c0_185], %143 {strides = array<i32>} : memref<144x224xf32, #tpu.memory_space<vmem>>, vector<16x224xf32>,
    %c0_186 = arith.constant 0 : index
    %c145_187 = arith.constant 145 : index
    %145 = vector.load %arg22[%c0_186, %c145_187] : memref<16x370xf32, #tpu.memory_space<vmem>>, vector<16x224xf32>
    %c128_188 = arith.constant 128 : index
    %c0_189 = arith.constant 0 : index
    %146 = vector.load %arg25[%c128_188, %c0_189] : memref<144x224xf32, #tpu.memory_space<vmem>>, vector<16x224xf32>
    tpu.vector_store %arg25[%c128_188, %c0_189], %145 {strides = array<i32>} : memref<144x224xf32, #tpu.memory_space<vmem>>, vector<16x224xf32>,
    %c0_190 = arith.constant 0 : index
    %c0_191 = arith.constant 0 : index
    %147 = vector.load %arg12[%c0_190, %c0_191] : memref<16x144xbf16, #tpu.memory_space<vmem>>, vector<16x144xbf16>
    %c0_192 = arith.constant 0 : index
    %c0_193 = arith.constant 0 : index
    %148 = vector.load %arg25[%c0_192, %c0_193] : memref<144x224xf32, #tpu.memory_space<vmem>>, vector<144x224xf32>
    %149 = arith.truncf %148 : vector<144x224xf32> to vector<144x224xbf16>
    %cst_194 = arith.constant dense<0.000000e+00> : vector<16x224xf32>
    %150 = tpu.matmul %147, %149, %cst_194 {dimension_numbers = #tpu.dot_dimension_numbers<[1], [0], [0], [1], [0, 0, 1, 1], [], []>} : vector<16x144xbf16>, vector<144x224xbf16>, vector<16x224xf32> -> vector<16x224xf32>
    %c0_195 = arith.constant 0 : index
    %c0_196 = arith.constant 0 : index
    %151 = vector.load %arg13[%c0_195, %c0_196] : memref<16x1xf32, #tpu.memory_space<vmem>>, vector<16x1xf32>
    %152 = vector.broadcast %151 : vector<16x1xf32> to vector<16x224xf32>
    %153 = arith.addf %150, %152 : vector<16x224xf32>
    %cst_197 = arith.constant 0.000000e+00 : f32
    %154 = vector.broadcast %cst_197 : f32 to vector<16x224xf32>
    %155 = arith.maximumf %153, %154 : vector<16x224xf32>
    %c0_198 = arith.constant 0 : index
    %c0_199 = arith.constant 0 : index
    %156 = vector.load %arg14[%c0_198, %c0_199] : memref<1x224xf32, #tpu.memory_space<vmem>>, vector<1x224xf32>
    %157 = vector.broadcast %156 : vector<1x224xf32> to vector<16x224xf32>
    %158 = arith.mulf %155, %157 : vector<16x224xf32>
    %cst_200 = arith.constant 0.000000e+00 : f32
    %159 = vector.broadcast %cst_200 : f32 to vector<16x128xf32>
    %c0_201 = arith.constant 0 : index
    %c0_202 = arith.constant 0 : index
    %160 = vector.load %arg24[%c0_201, %c0_202] : memref<16x370xf32, #tpu.memory_space<vmem>>, vector<16x128xf32>
    tpu.vector_store %arg24[%c0_201, %c0_202], %159 {strides = array<i32>} : memref<16x370xf32, #tpu.memory_space<vmem>>, vector<16x128xf32>,
    %c0_203 = arith.constant 0 : index
    %c128_204 = arith.constant 128 : index
    %161 = vector.load %arg24[%c0_203, %c128_204] : memref<16x370xf32, #tpu.memory_space<vmem>>, vector<16x224xf32>
    tpu.vector_store %arg24[%c0_203, %c128_204], %158 {strides = array<i32>} : memref<16x370xf32, #tpu.memory_space<vmem>>, vector<16x224xf32>,
    %cst_205 = arith.constant 0.000000e+00 : f32
    %162 = vector.broadcast %cst_205 : f32 to vector<16x18xf32>
    %c0_206 = arith.constant 0 : index
    %c352_207 = arith.constant 352 : index
    %163 = vector.load %arg24[%c0_206, %c352_207] : memref<16x370xf32, #tpu.memory_space<vmem>>, vector<16x18xf32>
    tpu.vector_store %arg24[%c0_206, %c352_207], %162 {strides = array<i32>} : memref<16x370xf32, #tpu.memory_space<vmem>>, vector<16x18xf32>,
    %c0_208 = arith.constant 0 : index
    %c128_209 = arith.constant 128 : index
    %164 = vector.load %arg24[%c0_208, %c128_209] : memref<16x370xf32, #tpu.memory_space<vmem>>, vector<16x224xf32>
    %c0_210 = arith.constant 0 : index
    %c129_211 = arith.constant 129 : index
    %165 = vector.load %arg24[%c0_210, %c129_211] : memref<16x370xf32, #tpu.memory_space<vmem>>, vector<16x224xf32>
    %166 = arith.addf %164, %165 : vector<16x224xf32>
    %c0_212 = arith.constant 0 : index
    %c144_213 = arith.constant 144 : index
    %167 = vector.load %arg24[%c0_212, %c144_213] : memref<16x370xf32, #tpu.memory_space<vmem>>, vector<16x224xf32>
    %168 = arith.addf %166, %167 : vector<16x224xf32>
    %c0_214 = arith.constant 0 : index
    %c145_215 = arith.constant 145 : index
    %169 = vector.load %arg24[%c0_214, %c145_215] : memref<16x370xf32, #tpu.memory_space<vmem>>, vector<16x224xf32>
    %170 = arith.addf %168, %169 : vector<16x224xf32>
    %171 = arith.truncf %170 : vector<16x224xf32> to vector<16x224xbf16>
    %c0_216 = arith.constant 0 : index
    %c0_217 = arith.constant 0 : index
    %172 = vector.load %arg15[%c0_216, %c0_217] : memref<224x128xbf16, #tpu.memory_space<vmem>>, vector<224x128xbf16>
    %cst_218 = arith.constant dense<0.000000e+00> : vector<16x128xf32>
    %173 = tpu.matmul %171, %172, %cst_218 {dimension_numbers = #tpu.dot_dimension_numbers<[1], [0], [0], [1], [0, 0, 1, 1], [], []>} : vector<16x224xbf16>, vector<224x128xbf16>, vector<16x128xf32> -> vector<16x128xf32>
    %c0_219 = arith.constant 0 : index
    %c0_220 = arith.constant 0 : index
    %c0_221 = arith.constant 0 : index
    %174 = vector.load %arg16[%c0_219, %c0_220, %c0_221] : memref<1x16x128xf32, #tpu.memory_space<vmem>>, vector<1x16x128xf32>
    %175 = vector.shape_cast %174 : vector<1x16x128xf32> to vector<16x128xf32>
    %176 = vector.shape_cast %173 : vector<16x128xf32> to vector<1x16x128xf32>
    tpu.vector_store %arg16[%c0_219, %c0_220, %c0_221], %176 {strides = array<i32>} : memref<1x16x128xf32, #tpu.memory_space<vmem>>, vector<1x16x128xf32>,
    return
  }
  func.func @transform_0(%arg0: i32) -> (i32, i32, i32) {
    %c0_i32 = arith.constant 0 : i32
    %c0_i32_0 = arith.constant 0 : i32
    %c0_i32_1 = arith.constant 0 : i32
    return %arg0, %c0_i32, %c0_i32_0 : i32, i32, i32
  }
  func.func @transform_1(%arg0: i32) -> (i32, i32) {
    %c0_i32 = arith.constant 0 : i32
    %c0_i32_0 = arith.constant 0 : i32
    %c0_i32_1 = arith.constant 0 : i32
    return %c0_i32, %c0_i32_0 : i32, i32
  }
  func.func @transform_2(%arg0: i32) -> (i32, i32) {
    %c0_i32 = arith.constant 0 : i32
    %c0_i32_0 = arith.constant 0 : i32
    %c0_i32_1 = arith.constant 0 : i32
    return %c0_i32, %c0_i32_0 : i32, i32
  }
  func.func @transform_3(%arg0: i32) -> (i32, i32) {
    %c0_i32 = arith.constant 0 : i32
    %c0_i32_0 = arith.constant 0 : i32
    %c0_i32_1 = arith.constant 0 : i32
    return %c0_i32, %c0_i32_0 : i32, i32
  }
  func.func @transform_4(%arg0: i32) -> (i32, i32) {
    %c0_i32 = arith.constant 0 : i32
    %c0_i32_0 = arith.constant 0 : i32
    %c0_i32_1 = arith.constant 0 : i32
    return %c0_i32, %c0_i32_0 : i32, i32
  }
  func.func @transform_5(%arg0: i32) -> (i32, i32) {
    %c0_i32 = arith.constant 0 : i32
    %c0_i32_0 = arith.constant 0 : i32
    %c0_i32_1 = arith.constant 0 : i32
    return %c0_i32, %c0_i32_0 : i32, i32
  }
  func.func @transform_6(%arg0: i32) -> (i32, i32) {
    %c0_i32 = arith.constant 0 : i32
    %c0_i32_0 = arith.constant 0 : i32
    %c0_i32_1 = arith.constant 0 : i32
    return %c0_i32, %c0_i32_0 : i32, i32
  }
  func.func @transform_7(%arg0: i32) -> (i32, i32) {
    %c0_i32 = arith.constant 0 : i32
    %c0_i32_0 = arith.constant 0 : i32
    %c0_i32_1 = arith.constant 0 : i32
    return %c0_i32, %c0_i32_0 : i32, i32
  }
  func.func @transform_8(%arg0: i32) -> (i32, i32) {
    %c0_i32 = arith.constant 0 : i32
    %c0_i32_0 = arith.constant 0 : i32
    %c0_i32_1 = arith.constant 0 : i32
    return %c0_i32, %c0_i32_0 : i32, i32
  }
  func.func @transform_9(%arg0: i32) -> (i32, i32) {
    %c0_i32 = arith.constant 0 : i32
    %c0_i32_0 = arith.constant 0 : i32
    %c0_i32_1 = arith.constant 0 : i32
    return %c0_i32, %c0_i32_0 : i32, i32
  }
  func.func @transform_10(%arg0: i32) -> (i32, i32) {
    %c0_i32 = arith.constant 0 : i32
    %c0_i32_0 = arith.constant 0 : i32
    %c0_i32_1 = arith.constant 0 : i32
    return %c0_i32, %c0_i32_0 : i32, i32
  }
  func.func @transform_11(%arg0: i32) -> (i32, i32) {
    %c0_i32 = arith.constant 0 : i32
    %c0_i32_0 = arith.constant 0 : i32
    %c0_i32_1 = arith.constant 0 : i32
    return %c0_i32, %c0_i32_0 : i32, i32
  }
  func.func @transform_12(%arg0: i32) -> (i32, i32) {
    %c0_i32 = arith.constant 0 : i32
    %c0_i32_0 = arith.constant 0 : i32
    %c0_i32_1 = arith.constant 0 : i32
    return %c0_i32, %c0_i32_0 : i32, i32
  }
  func.func @transform_13(%arg0: i32) -> (i32, i32) {
    %c0_i32 = arith.constant 0 : i32
    %c0_i32_0 = arith.constant 0 : i32
    %c0_i32_1 = arith.constant 0 : i32
    return %c0_i32, %c0_i32_0 : i32, i32
  }
  func.func @transform_14(%arg0: i32) -> (i32, i32) {
    %c0_i32 = arith.constant 0 : i32
    %c0_i32_0 = arith.constant 0 : i32
    %c0_i32_1 = arith.constant 0 : i32
    return %c0_i32, %c0_i32_0 : i32, i32
  }
  func.func @transform_15(%arg0: i32) -> (i32, i32, i32) {
    %c0_i32 = arith.constant 0 : i32
    %c0_i32_0 = arith.constant 0 : i32
    %c0_i32_1 = arith.constant 0 : i32
    return %arg0, %c0_i32, %c0_i32_0 : i32, i32, i32
  }
}

</mosaic_0001>

<bundles_post_ra>
// kernel: tpu_custom_call.1
= control target key start
LH: loop header
LB: loop body
LE: loop exit
PB: predicated region body
PF: predicated region fallthrough
CT: control target
= control target key end

     0   :  { %s6035_s0 = inlined_call_operand.vmem [shape: f32[4,3,1000], index: 0, kind: input, shape index: {}]   ;;  %s6036_s1 = inlined_call_operand.vmem [shape: bf16[8,27], index: 1, kind: input, shape index: {}]   ;;  %s6037_s2 = inlined_call_operand.vmem [shape: f32[8,1], index: 2, kind: input, shape index: {}]   ;;  %s6038_s3 = inlined_call_operand.vmem [shape: f32[1,840], index: 3, kind: input, shape index: {}]   ;;  %s6039_s4 = inlined_call_operand.vmem [shape: bf16[8,72], index: 4, kind: input, shape index: {}]   ;;  %s6040_s5 = inlined_call_operand.vmem [shape: f32[8,1], index: 5, kind: input, shape index: {}]   ;;  %s6041_s6 = inlined_call_operand.vmem [shape: f32[1,840], index: 6, kind: input, shape index: {}]   ;;  %s6042_s7 = inlined_call_operand.vmem [shape: bf16[840,224], index: 7, kind: input, shape index: {}]   ;;  %s6043_s8 = inlined_call_operand.vmem [shape: bf16[16,72], index: 8, kind: input, shape index: {}]   ;;  %s6044_s9 = inlined_call_operand.vmem [shape: f32[16,1], index: 9, kind: input, shape index: {}]   ;;  %s6045_s10 = inlined_call_operand.vmem [shape: f32[1,224], index: 10, kind: input, shape index: {}]   ;;  %s6046_s11 = inlined_call_operand.vmem [shape: bf16[16,144], index: 11, kind: input, shape index: {}]   ;;  %s6047_s12 = inlined_call_operand.vmem [shape: f32[16,1], index: 12, kind: input, shape index: {}]   ;;  %s6048_s13 = inlined_call_operand.vmem [shape: f32[1,224], index: 13, kind: input, shape index: {}]   ;;  %s6049_s14 = inlined_call_operand.vmem [shape: bf16[224,128], index: 14, kind: input, shape index: {}]   ;;  %s6050_s15 = inlined_call_operand.hbm [shape: f32[4,16,128], index: 15, kind: output, shape index: {}]  }
   0x1   :  { %6070 = sst [smem:[#allocation17_spill]] %s6035_s0 }
   0x2   :  { %6071 = sst [smem:[#allocation18_spill]] %s6036_s1 }
   0x3   :  { %6072 = sst [smem:[#allocation19_spill]] %s6037_s2 }
   0x4   :  { %6073 = sst [smem:[#allocation20_spill]] %s6038_s3 }
   0x5   :  { %20 = vsyncpa [#allocation12], 0 }
   0x6   :  { %22 = vsyncpa [#allocation12 + $0x1], 0  ;;  %s4596_s18 = smov 0   ;;  %s4598_s19 = smov 0  }
   0x7   :  { %s4600_s20 = smov 0   ;;  %s4602_s21 = smov 0  }
   0x8 LB: > { %6074 = sst [smem:[#allocation14_spill]] %s4489_s20  ;;  %s4617_s22 = sadd.s32 4294967295, %s4493_s21   ;;  %s4493_s21 = sphi %s4602_s21, %s6091_s21   ;;  %s4489_s20 = sphi %s4600_s20, %s6096_s20   ;;  %s4485_s19 = sphi %s4598_s19, %s6095_s19   ;;  %s4481_s18 = sphi %s4596_s18, %s6094_s18  }
   0x9   : > { %s3915_s23 = sadd.s32 4294967294, %s4493_s21   ;;  %s4621_s24 = sadd.s32 1, %s4493_s21  }
   0xa   : > { %6075 = sst [smem:[#allocation15_spill]] %s4621_s24  ;;  %s355_s25 = sadd.s32 1, %s4489_s20 }
   0xb   : > { %s352_s26 = ssub.s32 %s4493_s21, %s4621_s24  ;;  %p365_p0 = scmp.ne.s32.totalorder %s4489_s20, %s4485_s19 }
   0xc   : > { %p353_p1 = scmp.eq.s32.totalorder %s352_s26, 0  ;;  %p366_p2 = scmp.eq.s32.totalorder %s4617_s22, 3 }
   0xd   : > { %p371_p3 = scmp.ne.s32.totalorder %s4485_s19, %s4481_s18  ;;  %p372_p4 = scmp.eq.s32.totalorder %s3915_s23, 3 }
   0xe   : > { %s4632_s27 = scalar_select %p353_p1, %s4489_s20, %s355_s25  }
   0xf   : > { %p4634_p5 = por %p366_p2, %p365_p0  ;;  %p4638_p6 = por %p372_p4, %p371_p3 }
  0x10   : > { %6076 = sst [smem:[#allocation16_spill]] %s4632_s27  ;;  %p3918_p7 = scmp.ge.s32.totalorder %s4493_s21, 1 }
  0x11   : > { %p440_p8 = scmp.lt.s32.totalorder %s4493_s21, 5 }
  0x13   : > { %p441_p9 = pnand %p3918_p7, %p440_p8 }
  0x14   : > { %p488_p10 = scmp.lt.s32.totalorder (!%p441_p9), %s4617_s22, 3  ;;  %s6079_s0 = sld [smem:[#allocation17_spill]] (!%p441_p9)  ;;  %v4503_v56 = vmov (!%p441_p9), 0   ;;  %vm752_vm0 = vcmask (!%p441_p9), 587780   ;;  %vm522_vm1 = vcmask (!%p441_p9), 252928   ;;  %vm640_vm2 = vcmask (!%p441_p9), 236544  }
  0x15   : > { %444 = sbr.rel (%p441_p9) target bundleno = 2657 (0xa61), region = 80  ;;  %s6059_s26 = smov (!%p441_p9), 31   ;;  %1080 = vmatprep.mubr.bf16.mxu0 (!%p441_p9), %v4503_v56  ;;  %4169 = vset.pattern.permute.xlu0 (!%p441_p9), %v4503_v56  ;;  %vm581_vm3 = vcmask (!%p441_p9), 244736   ;;  %vm707_vm4 = vcmask (!%p441_p9), 7168   ;;  %vm786_vm5 = vcmask (!%p441_p9), 1039360   ;;  %vm848_vm6 = vcmask (!%p441_p9), 809984  }
  0x16   : > { %s6053_s17 = smov (!%p441_p9), 1   ;;  %s6055_s23 = smov (!%p441_p9), 127   ;;  %1894 = vmatprep.mubr.bf16.mxu1 (!%p441_p9), %v4503_v56  ;;  %4200 = vset.pattern.permute.xlu1 (!%p441_p9), %v4503_v56  ;;  %vm902_vm7 = vcmask (!%p441_p9), 801792   ;;  %vm949_vm8 = vcmask (!%p441_p9), 793600   ;;  %vm1023_vm9 = vcmask (!%p441_p9), 1044480   ;;  %vm1024_vm10 = vcmask (!%p441_p9), 1045504  }
  0x17   : > { %s6085_s27 = smov (!%p441_p9), 31   ;;  %s6087_s20 = smov (!%p441_p9), 99   ;;  %vm1019_vm11 = vcmask (!%p441_p9), 220160   ;;  %vm806_vm12 = vcmask (!%p441_p9), 588807   ;;  %vm814_vm13 = vcmask (!%p441_p9), 582656   ;;  %vm868_vm14 = vcmask (!%p441_p9), 585730  }
  0x18   : > { %s6088_s2 = sld [smem:[#allocation19_spill]] (!%p441_p9)  ;;  %s6089_s1 = sld [smem:[#allocation18_spill]] (!%p441_p9)  ;;  %vm922_vm15 = vcmask (!%p441_p9), 588805  }
  0x19   : > { %s6090_s3 = sld [smem:[#allocation20_spill]] (!%p441_p9) }
  0x1c   : > { %s489_s30 = scalar_select %p488_p10, %s4617_s22, 3 }
  0x1e   : > { %s4067_s16 = sshll.u32 %s489_s30, 5  ;;  %s6051_s30 = smov 30  }
  0x1f   : > { %s4649_s25 = scalar_lea.vmem %s6079_s0, %s4067_s16  ;;  %s6063_s16 = smov 29  }
  0x20   : > { %v4652_v0 = vld [vmem:[%s4649_s25 + $0x8] sm:$0x77]  ;;  %v494_v2 = vld [vmem:[%s4649_s25] sm:$0x77]  ;;  %v547_v45 = vld [vmem:[%s4649_s25 + $0x10] sm:$0x77] }
  0x21   : > { %v4655_v1 = vld [vmem:[%s4649_s25 + $0x8] sm:$0x77]  ;;  %510 = vrot.lane.b32.xlu0 %v4652_v0, %s6059_s26  ;;  %v502_v4 = vcombine.high %v494_v2, %v494_v2  ;;  %v604_v6 = vld [vmem:[%s4649_s25] sm:$0x77]  ;;  %v4715_v46 = vld [vmem:[%s4649_s25 + $0x10] sm:$0x77]  ;;  %v503_v47 = vcombine.high %v4652_v0, %v4652_v0 }
  0x22   : > { %v559_v3 = vrot.slane %v4655_v1, 5  ;;  %v4662_v5 = vld [vmem:[%s4649_s25 + $0x8] sm:$0x77]  ;;  %v612_v7 = vcombine.high %v604_v6, %v604_v6  ;;  %v545_v8 = vld [vmem:[%s4649_s25] sm:$0x77]  ;;  %v616_v27 = vrot.slane %v604_v6, 2  ;;  %v554_v44 = vcombine.high %v4655_v1, %v4655_v1 }
  0x23   : > { %v671_v9 = vld [vmem:[%s4649_s25] sm:$0x77]  ;;  %v618_v10 = vrot.slane %v4662_v5, 2  ;;  %v553_v11 = vcombine.high %v545_v8, %v545_v8  ;;  %v4673_v16 = vld [vmem:[%s4649_s25 + $0x8] sm:$0x77]  ;;  %v557_v24 = vrot.slane %v545_v8, 5  ;;  %v613_v48 = vcombine.high %v4662_v5, %v4662_v5 }
  0x24   : > { %569 = vrot.lane.b32.xlu1 %v559_v3, %s6051_s30  ;;  %v617_v12 = vrot.slane %v612_v7, 2  ;;  %v679_v13 = vcombine.high %v671_v9, %v671_v9  ;;  %v754_v14 = vld [vmem:[%s4649_s25 + $0x4] sm:$0x77]  ;;  %v685_v19 = vrot.slane %v4673_v16, 7  ;;  %v4679_v20 = vld [vmem:[%s4649_s25 + $0xc] sm:$0x77]  ;;  %v680_v49 = vcombine.high %v4673_v16, %v4673_v16 }
  0x25   : > { %508 = vrot.lane.b32.xlu0 %v502_v4, %s6059_s26  ;;  %v558_v15 = vrot.slane %v553_v11, 5  ;;  %v762_v18 = vcombine.high %v754_v14, %v754_v14  ;;  %v767_v22 = vrot.slane %v4679_v20, 1  ;;  %v730_v23 = vld [vmem:[%s4649_s25 + $0x4] sm:$0x77]  ;;  %v683_v29 = vrot.slane %v671_v9, 7  ;;  %s6084_s0 = smov 97  }
  0x26   : > { %v684_v17 = vrot.slane %v679_v13, 7  ;;  %v816_v25 = vld [vmem:[%s4649_s25 + $0x4] sm:$0x77]  ;;  %747 = vst [vmem:[#allocation3 + $0x40] sm:$0x70] %v730_v23  ;;  %v738_v26 = vcombine.low %v730_v23, %v730_v23  ;;  %v765_v32 = vrot.slane %v754_v14, 1  ;;  %v763_v60 = vcombine.high %v4679_v20, %v4679_v20 }
  0x27   : > { %v766_v21 = vrot.slane %v762_v18, 1  ;;  %v870_v28 = vld [vmem:[%s4649_s25 + $0x4] sm:$0x77]  ;;  %v824_v30 = vcombine.high %v816_v25, %v816_v25  ;;  %v4692_v31 = vld [vmem:[%s4649_s25 + $0xc] sm:$0x77]  ;;  %v827_v42 = vrot.slane %v816_v25, 6  ;;  %v614_v16 = vcombine.high %v4715_v46, %v4715_v46 }
  0x28   : > { %628 = vrot.lane.b32.xlu1 %v618_v10, %s6063_s16  ;;  %746 = vst [vmem:[#allocation3 + $0x38] sm:$0x70] %v738_v26  ;;  %v878_v34 = vcombine.high %v870_v28, %v870_v28  ;;  %v4697_v35 = vld [vmem:[%s4649_s25 + $0xc] sm:$0x77]  ;;  %v829_v36 = vrot.slane %v4692_v31, 6  ;;  %v881_v43 = vrot.slane %v870_v28, 3  ;;  %v825_v0 = vcombine.high %v4692_v31, %v4692_v31 }
  0x29   : > { %626 = vrot.lane.b32.xlu0 %v617_v12, %s6063_s16  ;;  %v828_v33 = vrot.slane %v824_v30, 6  ;;  %v924_v37 = vld [vmem:[%s4649_s25 + $0x4] sm:$0x77]  ;;  %v883_v39 = vrot.slane %v4697_v35, 3  ;;  %v925_v41 = vld [vmem:[%s4649_s25 + $0xc] sm:$0x77]  ;;  %v879_v4 = vcombine.high %v4697_v35, %v4697_v35  ;;  %v555_v12 = vcombine.high %v547_v45, %v547_v45 }
  0x2a   : > { %v882_v38 = vrot.slane %v878_v34, 3  ;;  %v932_v40 = vcombine.high %v924_v37, %v924_v37  ;;  %v496_v50 = vld [vmem:[%s4649_s25 + $0x10] sm:$0x77]  ;;  %v560_v51 = vrot.slane %v554_v44, 5  ;;  %v561_v52 = vrot.slane %v547_v45, 5 }
  0x2b   : > { %v619_v53 = vrot.slane %v613_v48, 2  ;;  %v620_v54 = vrot.slane %v4715_v46, 2  ;;  %v686_v55 = vrot.slane %v680_v49, 7  ;;  %v731_v57 = vld [vmem:[%s4649_s25 + $0xc] sm:$0x77]  ;;  %v768_v63 = vrot.slane %v763_v60, 1 }
  0x2c   : > { %567 = vrot.lane.b32.xlu1 %v558_v15, %s6051_s30  ;;  %v739_v58 = vcombine.low %v731_v57, %v731_v57  ;;  %749 = vst [vmem:[#allocation3 + $0x50] sm:$0x70] %v731_v57  ;;  %v673_v59 = vld [vmem:[%s4649_s25 + $0x10] sm:$0x77]  ;;  %v830_v3 = vrot.slane %v825_v0, 6  ;;  %v884_v7 = vrot.slane %v879_v4, 3  ;;  %v933_v9 = vcombine.high %v925_v41, %v925_v41 }
  0x2d   : > { %693 = vrot.lane.b32.xlu0 %v684_v17, %s6053_s17  ;;  %v687_v61 = vrot.slane %v673_v59, 7  ;;  %v756_v62 = vld [vmem:[%s4649_s25 + $0x14] sm:$0x77]  ;;  %v504_v11 = vcombine.high %v496_v50, %v496_v50  ;;  %v562_v15 = vrot.slane %v555_v12, 5  ;;  %v757_v28 = vld [vmem:[%s4649_s25 + $0x1c] sm:$0x7] }
  0x2e   : > { %748 = vst [vmem:[#allocation3 + $0x48] sm:$0x70] %v739_v58  ;;  %v769_v1 = vrot.slane %v756_v62, 1  ;;  %v872_v6 = vld [vmem:[%s4649_s25 + $0x14] sm:$0x77]  ;;  %v764_v26 = vcombine.high %v756_v62, %v756_v62  ;;  %v771_v31 = vrot.slane %v757_v28, 1 }
  0x2f   : > { %v885_v8 = vrot.slane %v872_v6, 3  ;;  %v926_v10 = vld [vmem:[%s4649_s25 + $0x14] sm:$0x77]  ;;  %v880_v34 = vcombine.high %v872_v6, %v872_v6  ;;  %v1013_v58 = vld [vmem:[%s6088_s2] sm:$0xff]  ;;  %s4507_s2 = smov 17  }
  0x30   : > { %695 = vrot.lane.b32.xlu1 %v685_v19, %s6053_s17  ;;  %v497_v13 = vld [vmem:[%s4649_s25 + $0x18] sm:$0x77] }
  0x31   : > { %774 = vrot.lane.b32.xlu0 %v766_v21, %s6055_s23  ;;  %v548_v14 = vld [vmem:[%s4649_s25 + $0x18] sm:$0x77]  ;;  %v621_v21 = vrot.slane %v614_v16, 2 }
  0x32   : > { %v732_v17 = vld [vmem:[%s4649_s25 + $0x14] sm:$0x77]  ;;  %v563_v18 = vrot.slane %v548_v14, 5 }
  0x33   : > { %v740_v19 = vcombine.low %v732_v17, %v732_v17  ;;  %751 = vst [vmem:[#allocation3 + $0x60] sm:$0x70] %v732_v17  ;;  %v607_v20 = vld [vmem:[%s4649_s25 + $0x18] sm:$0x77] }
  0x34   : > { %776 = vrot.lane.b32.xlu1 %v767_v22, %s6055_s23  ;;  %v681_v22 = vcombine.high %v673_v59, %v673_v59  ;;  %v622_v23 = vrot.slane %v607_v20, 2  ;;  %v615_v44 = vcombine.high %v607_v20, %v607_v20 }
  0x35   : > { %506 = vrot.lane.b32.xlu0 %v494_v2, %s6059_s26  ;;  %v818_v2 = vld [vmem:[%s4649_s25 + $0x14] sm:$0x77]  ;;  %750 = vst [vmem:[#allocation3 + $0x58] sm:$0x70] %v740_v19 }
  0x36   : > { %v831_v5 = vrot.slane %v818_v2, 6  ;;  %v688_v25 = vrot.slane %v681_v22, 7  ;;  %v826_v30 = vcombine.high %v818_v2, %v818_v2 }
  0x38   : > { %565 = vrot.lane.b32.xlu1 %v557_v24, %s6051_s30  ;;  %s6065_s30 = smov 99   ;;  %v674_v24 = vld [vmem:[%s4649_s25 + $0x18] sm:$0x77] }
  0x39   : > { %624 = vrot.lane.b32.xlu0 %v616_v27, %s6063_s16  ;;  %v689_v27 = vrot.slane %v674_v24, 7  ;;  %v682_v46 = vcombine.high %v674_v24, %v674_v24 }
  0x3b   : > { %v690_v49 = vrot.slane %v682_v46, 7 }
  0x3c   : > { %691 = vrot.lane.b32.xlu1 %v683_v29, %s6053_s17  ;;  %s6061_s17 = smov 98   ;;  %v770_v29 = vrot.slane %v764_v26, 1 }
  0x3d   : > { %772 = vrot.lane.b32.xlu0 %v765_v32, %s6055_s23  ;;  %s6057_s23 = smov 97   ;;  %v819_v32 = vld [vmem:[%s4649_s25 + $0x1c] sm:$0x7] }
  0x3e   : > { %v833_v35 = vrot.slane %v819_v32, 6 }
  0x40   : > { %836 = vrot.lane.b32.xlu1 %v828_v33, %s6065_s30  ;;  %v832_v33 = vrot.slane %v826_v30, 6 }
  0x41   : > { %838 = vrot.lane.b32.xlu0 %v829_v36, %s6065_s30  ;;  %v873_v36 = vld [vmem:[%s4649_s25 + $0x1c] sm:$0x7] }
  0x44   : > { %890 = vrot.lane.b32.xlu1 %v882_v38, %s6061_s17  ;;  %v887_v38 = vrot.slane %v873_v36, 3 }
  0x45   : > { %892 = vrot.lane.b32.xlu0 %v883_v39, %s6061_s17  ;;  %v934_v39 = vcombine.high %v926_v10, %v926_v10 }
  0x48   : > { %937 = vrot.lane.b32.xlu1 %v932_v40, %s6057_s23  ;;  %v4252_v40 = vld [vmem:[%s4649_s25 + $0x1c] ss:$0 sps:$4 sm:$0x77]  }
  0x49   : > { %939 = vrot.lane.b32.xlu0 %v925_v41, %s6057_s23  ;;  %v556_v41 = vcombine.high %v548_v14, %v548_v14  ;;  %753 = vst.msk [vmem:[#allocation3 + $0x68] sm:$0x70] %vm752_vm0, %v4252_v40  ;;  %vm543_vm0 = vcmask 583680  }
  0x4b   : > { %v564_v45 = vrot.slane %v556_v41, 5 }
  0x4c   : > { %834 = vrot.lane.b32.xlu1 %v827_v42, %s6065_s30  ;;  %v927_v42 = vld [vmem:[%s4649_s25 + $0x1c] sm:$0x7] }
  0x4d   : > { %888 = vrot.lane.b32.xlu0 %v881_v43, %s6061_s17  ;;  %s6082_s17 = smov 127   ;;  %v505_v43 = vcombine.high %v497_v13, %v497_v13 }
  0x50   : > { %935 = vrot.lane.b32.xlu1 %v924_v37, %s6057_s23  ;;  %s6080_s23 = smov 30   ;;  %v886_v37 = vrot.slane %v880_v34, 3 }
  0x51   : > { %512 = vrot.lane.b32.xlu0 %v503_v47, %s6059_s26  ;;  %v623_v47 = vrot.slane %v615_v44, 2 }
  0x54   : > { %514 = vrot.lane.b32.xlu1 %v496_v50, %s6059_s26  ;;  %s6081_s26 = smov 1   ;;  %v4504_v50 = vmov 0.0  }
  0x55   : > { %571 = vrot.lane.b32.xlu0 %v560_v51, %s6080_s23  ;;  %2035 = vst [vmem:[#allocation4] sm:$0xff] %v4504_v50 }
  0x58   : > { %573 = vrot.lane.b32.xlu1 %v561_v52, %s6080_s23 }
  0x59   : > { %630 = vrot.lane.b32.xlu0 %v619_v53, %s6063_s16 }
  0x5c   : > { %632 = vrot.lane.b32.xlu1 %v620_v54, %s6063_s16  ;;  %s6083_s16 = smov 98  }
  0x5d   : > { %697 = vrot.lane.b32.xlu0 %v686_v55, %s6081_s26 }
  0x60   : > { %699 = vrot.lane.b32.xlu1 %v687_v61, %s6081_s26 }
  0x61   : > { %778 = vrot.lane.b32.xlu0 %v768_v63, %s6082_s17 }
  0x64   : > { %780 = vrot.lane.b32.xlu1 %v769_v1, %s6082_s17 }
  0x65   : > { %840 = vrot.lane.b32.xlu0 %v830_v3, %s6065_s30 }
  0x68   : > { %842 = vrot.lane.b32.xlu1 %v831_v5, %s6065_s30  ;;  %s6086_s30 = smov 29  }
  0x69   : > { %894 = vrot.lane.b32.xlu0 %v884_v7, %s6083_s16 }
  0x6c   : > { %896 = vrot.lane.b32.xlu1 %v885_v8, %s6083_s16 }
  0x6d   : > { %941 = vrot.lane.b32.xlu0 %v933_v9, %s6084_s0 }
  0x70   : > { %943 = vrot.lane.b32.xlu1 %v926_v10, %s6084_s0 }
  0x71   : > { %516 = vrot.lane.b32.xlu0 %v504_v11, %s6085_s27 }
  0x74   : > { %518 = vrot.lane.b32.xlu1 %v497_v13, %s6085_s27 }
  0x75   : > { %575 = vrot.lane.b32.xlu0 %v562_v15, %s6080_s23 }
  0x78   : > { %577 = vrot.lane.b32.xlu1 %v563_v18, %s6080_s23 }
  0x79   : > { %634 = vrot.lane.b32.xlu0 %v621_v21, %s6086_s30 }
  0x7c   : > { %636 = vrot.lane.b32.xlu1 %v622_v23, %s6086_s30 }
  0x7d   : > { %701 = vrot.lane.b32.xlu0 %v688_v25, %s6081_s26 }
  0x80   : > { %703 = vrot.lane.b32.xlu1 %v689_v27, %s6081_s26 }
  0x81   : > { %782 = vrot.lane.b32.xlu0 %v770_v29, %s6082_s17 }
  0x84   : > { %784 = vrot.lane.b32.xlu1 %v771_v31, %s6082_s17 }
  0x85   : > { %844 = vrot.lane.b32.xlu0 %v832_v33, %s6087_s20  ;;  %v4505_v33 = vmov 65535  }
  0x86   : > { %v1025_v34 = vsel %vm1023_vm9, 4294967295, %v4505_v33  ;;  %vm602_vm9 = vcmask 586755  }
  0x87   : > { %v4845_v40 = vsel %vm1024_vm10, %v1025_v34, 0  ;;  %vm661_vm10 = vcmask 588806  }
  0x88   : > { %846 = vrot.lane.b32.xlu1 %v833_v35, %s6087_s20 }
  0x89   : > { %898 = vrot.lane.b32.xlu0 %v886_v37, %s6083_s16 }
  0x8c   : > { %900 = vrot.lane.b32.xlu1 %v887_v38, %s6083_s16 }
  0x8d   : > { %945 = vrot.lane.b32.xlu0 %v934_v39, %s6084_s0 }
  0x90   : > { %947 = vrot.lane.b32.xlu1 %v927_v42, %s6084_s0 }
  0x91   : > { %520 = vrot.lane.b32.xlu0 %v505_v43, %s6085_s27 }
  0x93   : > { %v4789_v48 = vpop.permute.xlu0 %510 }
  0x94   : > { %579 = vrot.lane.b32.xlu1 %v564_v45, %s6080_s23 }
  0x95   : > { %638 = vrot.lane.b32.xlu0 %v623_v47, %s6086_s30 }
  0x96   : > { %v4792_v51 = vpop.permute.xlu1 %569 }
  0x97   : > { %v509_v52 = vpop.permute.xlu0 %508 }
  0x98   : > { %705 = vrot.lane.b32.xlu1 %v690_v49, %s6081_s26  ;;  %v524_v53 = vsel %vm522_vm1, %v509_v52, %v4789_v48 }
  0x99   : > { %538 = vst [vmem:[#allocation3 + $0x8] sm:$0x7] %v524_v53  ;;  %1016 = vperm.xlu0 %4169, %v1013_v58  }
  0x9a   : > { %v4798_v54 = vpop.permute.xlu1 %628 }
  0x9b   : > { %v627_v55 = vpop.permute.xlu0 %626 }
  0x9c   : > { %1342 = vrot.lane.b32.xlu1 %v4504_v50, %s6080_s23  ;;  %v642_v57 = vsel %vm640_vm2, %v627_v55, %v4798_v54 }
  0x9d   : > { %656 = vst [vmem:[#allocation3 + $0x40] ss:$-52 sps:$4 sm:$0xc1] %v642_v57   ;;  %1289 = vrot.lane.b32.xlu0 %v4504_v50, %s6085_s27 }
  0x9e   : > { %v568_v59 = vpop.permute.xlu1 %567 }
  0x9f   : > { %v583_v60 = vsel %vm581_vm3, %v568_v59, %v4792_v51  ;;  %v694_v61 = vpop.permute.xlu0 %693 }
  0xa0   : > { %597 = vst [vmem:[#allocation3 + $0x8] sm:$0x38] %v583_v60  ;;  %1448 = vrot.lane.b32.xlu1 %v4504_v50, %s6081_s26 }
  0xa1   : > { %1395 = vrot.lane.b32.xlu0 %v4504_v50, %s6086_s30 }
  0xa2   : > { %v4811_v62 = vpop.permute.xlu1 %695 }
  0xa3   : > { %v709_v63 = vsel %vm707_vm4, %v694_v61, %v4811_v62  ;;  %v775_v0 = vpop.permute.xlu0 %774 }
  0xa4   : > { %723 = vst [vmem:[#allocation3 + $0x40] sm:$0xe] %v709_v63 }
  0xa6   : > { %v4817_v1 = vpop.permute.xlu1 %776 }
  0xa7   : > { %v788_v2 = vsel %vm786_vm5, %v775_v0, %v4817_v1  ;;  %v507_v3 = vpop.permute.xlu0 %506  ;;  %v972_v11 = vld [vmem:[#allocation3 + $0x8] sm:$0xff] }
  0xa8   : > { %801 = vst [vmem:[#allocation3 + $0x78] ss:$-52 sps:$4 sm:$0x83] %v788_v2   ;;  %v523_v4 = vsel %vm522_vm1, %v507_v3, %v509_v52 }
  0xa9   : > { %537 = vst [vmem:[#allocation3] sm:$0x7] %v523_v4 }
  0xaa   : > { %v566_v5 = vpop.permute.xlu1 %565 }
  0xab   : > { %v582_v6 = vsel %vm581_vm3, %v566_v5, %v568_v59  ;;  %v625_v7 = vpop.permute.xlu0 %624 }
  0xac   : > { %596 = vst [vmem:[#allocation3] sm:$0x38] %v582_v6  ;;  %v641_v8 = vsel %vm640_vm2, %v625_v7, %v627_v55 }
  0xad   : > { %655 = vst [vmem:[#allocation3 + $0x38] ss:$-52 sps:$4 sm:$0xc1] %v641_v8  }
  0xae   : > { %v692_v9 = vpop.permute.xlu1 %691 }
  0xaf   : > { %v708_v10 = vsel %vm707_vm4, %v692_v9, %v694_v61  ;;  %v979_v12 = vld [vmem:[#allocation3 + $0x40] sm:$0xff]  ;;  %v773_v13 = vpop.permute.xlu0 %772 }
  0xb0   : > { %722 = vst [vmem:[#allocation3 + $0x38] sm:$0xe] %v708_v10  ;;  %v1000_v14 = vpack.c.bf16 %v979_v12, %v972_v11  ;;  %v787_v15 = vsel %vm786_vm5, %v773_v13, %v775_v0  ;;  %v4868_v61 = vld [vmem:[%s6089_s1] sm:$0xf]  ;;  %s4510_s1 = smov 113  }
  0xb1   : > { %800 = vst [vmem:[#allocation3 + $0x70] ss:$-52 sps:$4 sm:$0x83] %v787_v15  }
  0xb2   : > { %v837_v16 = vpop.permute.xlu1 %836  ;;  %1048 = vmatprep.subr.bf16.mxu0 %v1000_v14 }
  0xb3   : > { %v4828_v17 = vpop.permute.xlu0 %838 }
  0xb4   : > { %v850_v18 = vsel %vm848_vm6, %v837_v16, %v4828_v17  ;;  %v971_v22 = vld [vmem:[#allocation3] sm:$0xff] }
  0xb5   : > { %863 = vst [vmem:[#allocation3 + $0x78] sm:$0x1c] %v850_v18 }
  0xb6   : > { %v891_v19 = vpop.permute.xlu1 %890 }
  0xb7   : > { %v4832_v20 = vpop.permute.xlu0 %892 }
  0xb8   : > { %v904_v21 = vsel %vm902_vm7, %v891_v19, %v4832_v20  ;;  %v978_v23 = vld [vmem:[#allocation3 + $0x38] sm:$0xff] }
  0xb9   : > { %917 = vst [vmem:[#allocation3 + $0x78] sm:$0xe0] %v904_v21  ;;  %v999_v25 = vpack.c.bf16 %v978_v23, %v971_v22 }
  0xba   : > { %v938_v24 = vpop.permute.xlu1 %937 }
  0xbb   : > { %1049 = vmatpush1.bf16.msra.mxu0 %v999_v25  ;;  %v4836_v26 = vpop.permute.xlu0 %939 }
  0xbc   : > { %v951_v27 = vsel %vm949_vm8, %v938_v24, %v4836_v26 }
  0xbd   : > { %964 = vst [vmem:[#allocation3 + $0xb0] sm:$0x7] %v951_v27 }
  0xbe   : > { %v835_v28 = vpop.permute.xlu1 %834 }
  0xbf   : > { %v849_v29 = vsel %vm848_vm6, %v835_v28, %v837_v16  ;;  %v889_v30 = vpop.permute.xlu0 %888 }
  0xc0   : > { %862 = vst [vmem:[#allocation3 + $0x70] sm:$0x1c] %v849_v29  ;;  %v903_v31 = vsel %vm902_vm7, %v889_v30, %v891_v19  ;;  %v986_v38 = vld [vmem:[#allocation3 + $0x78] sm:$0xff] }
  0xc1   : > { %916 = vst [vmem:[#allocation3 + $0x70] sm:$0xe0] %v903_v31 }
  0xc2   : > { %v936_v32 = vpop.permute.xlu1 %935 }
  0xc3   : > { %v950_v35 = vsel %vm949_vm8, %v936_v32, %v938_v24  ;;  %v513_v36 = vpop.permute.xlu0 %512 }
  0xc4   : > { %963 = vst [vmem:[#allocation3 + $0xa8] sm:$0x7] %v950_v35  ;;  %v525_v37 = vsel %vm522_vm1, %v4789_v48, %v513_v36  ;;  %v993_v39 = vld [vmem:[#allocation3 + $0xb0] sm:$0x7] }
  0xc5   : > { %539 = vst [vmem:[#allocation3 + $0x10] sm:$0x7] %v525_v37  ;;  %v1007_v42 = vpack.c.bf16 %v993_v39, %v986_v38 }
  0xc6   : > { %v4847_v41 = vpop.permute.xlu1 %514 }
  0xc7   : > { %v526_v43 = vsel %vm522_vm1, %v513_v36, %v4847_v41  ;;  %v572_v44 = vpop.permute.xlu0 %571  ;;  %v1031_v45 = vand.u32 %v4845_v40, %v1007_v42 }
  0xc8   : > { %540 = vst [vmem:[#allocation3 + $0x18] sm:$0x7] %v526_v43  ;;  %v584_v46 = vsel %vm581_vm3, %v4792_v51, %v572_v44  ;;  %v985_v49 = vld [vmem:[#allocation3 + $0x70] sm:$0xff] }
  0xc9   : > { %598 = vst [vmem:[#allocation3 + $0x10] sm:$0x38] %v584_v46  ;;  %1050 = vmatprep.subr.bf16.mxu0 %v1031_v45 }
  0xca   : > { %v4854_v47 = vpop.permute.xlu1 %573 }
  0xcb   : > { %v585_v48 = vsel %vm581_vm3, %v572_v44, %v4854_v47  ;;  %v992_v52 = vld [vmem:[#allocation3 + $0xa8] sm:$0x7]  ;;  %v631_v53 = vpop.permute.xlu0 %630 }
  0xcc   : > { %599 = vst [vmem:[#allocation3 + $0x18] sm:$0x38] %v585_v48  ;;  %v1006_v55 = vpack.c.bf16 %v992_v52, %v985_v49  ;;  %v643_v57 = vsel %vm640_vm2, %v4798_v54, %v631_v53 }
  0xcd   : > { %657 = vst [vmem:[#allocation3 + $0x48] ss:$-52 sps:$4 sm:$0xc1] %v643_v57  }
  0xce   : > { %v4860_v58 = vpop.permute.xlu1 %632  ;;  %v1028_v51 = vand.u32 %v4845_v40, %v1006_v55 }
  0xcf   : > { %v644_v59 = vsel %vm640_vm2, %v631_v53, %v4860_v58  ;;  %v698_v60 = vpop.permute.xlu0 %697 }
  0xd0   : > { %658 = vst [vmem:[#allocation3 + $0x50] ss:$-52 sps:$4 sm:$0xc1] %v644_v59   ;;  %1051 = vmatpush1.bf16.msra.mxu0 %v1028_v51  ;;  %v710_v54 = vsel %vm707_vm4, %v4811_v62, %v698_v60 }
  0xd1   : > { %724 = vst [vmem:[#allocation3 + $0x48] sm:$0xe] %v710_v54 }
  0xd2   : > { %v4872_v63 = vpop.permute.xlu1 %699 }
  0xd3   : > { %v711_v0 = vsel %vm707_vm4, %v698_v60, %v4872_v63  ;;  %3922 = vmatmul.mubr.msk.bf16.vlgmr.msra.gmra.mrb[0].mxu0 %vm1019_vm11, %v4868_v61  ;;  %v779_v2 = vpop.permute.xlu0 %778 }
  0xd4   : > { %725 = vst [vmem:[#allocation3 + $0x50] sm:$0xe] %v711_v0  ;;  %1121 = vmatprep.mubr.bf16.mxu0 %v4503_v56  ;;  %v789_v3 = vsel %vm786_vm5, %v4817_v1, %v779_v2 }
  0xd5   : > { %802 = vst [vmem:[#allocation3 + $0x80] ss:$-52 sps:$4 sm:$0x83] %v789_v3  }
  0xd6   : > { %v4881_v4 = vpop.permute.xlu1 %780 }
  0xd7   : > { %v790_v62 = vsel %vm786_vm5, %v779_v2, %v4881_v4  ;;  %v841_v5 = vpop.permute.xlu0 %840  ;;  %v974_v13 = vld [vmem:[#allocation3 + $0x18] sm:$0xff] }
  0xd8   : > { %803 = vst [vmem:[#allocation3 + $0x88] ss:$-52 sps:$4 sm:$0x83] %v790_v62   ;;  %v851_v6 = vsel %vm848_vm6, %v4828_v17, %v841_v5  ;;  %v973_v17 = vld [vmem:[#allocation3 + $0x10] sm:$0xff] }
  0xd9   : > { %864 = vst [vmem:[#allocation3 + $0x80] sm:$0x1c] %v851_v6 }
  0xda   : > { %v4887_v7 = vpop.permute.xlu1 %842 }
  0xdb   : > { %v852_v8 = vsel %vm848_vm6, %v841_v5, %v4887_v7  ;;  %v895_v9 = vpop.permute.xlu0 %894 }
  0xdc   : > { %865 = vst [vmem:[#allocation3 + $0x88] sm:$0x1c] %v852_v8  ;;  %v905_v1 = vsel %vm902_vm7, %v4832_v20, %v895_v9  ;;  %v980_v11 = vld [vmem:[#allocation3 + $0x48] sm:$0xff] }
  0xdd   : > { %918 = vst [vmem:[#allocation3 + $0x80] sm:$0xe0] %v905_v1  ;;  %v1001_v19 = vpack.c.bf16 %v980_v11, %v973_v17 }
  0xde   : > { %v4893_v10 = vpop.permute.xlu1 %896 }
  0xdf   : > { %v906_v12 = vsel %vm902_vm7, %v895_v9, %v4893_v10  ;;  %v981_v14 = vld [vmem:[#allocation3 + $0x50] sm:$0xff]  ;;  %v942_v15 = vpop.permute.xlu0 %941 }
  0xe0   : > { %919 = vst [vmem:[#allocation3 + $0x88] sm:$0xe0] %v906_v12  ;;  %v1002_v16 = vpack.c.bf16 %v981_v14, %v974_v13  ;;  %v952_v18 = vsel %vm949_vm8, %v4836_v26, %v942_v15 }
  0xe1   : > { %965 = vst [vmem:[#allocation3 + $0xb8] sm:$0x7] %v952_v18 }
  0xe2   : > { %v4899_v21 = vpop.permute.xlu1 %943  ;;  %1089 = vmatprep.subr.bf16.mxu0 %v1002_v16 }
  0xe3   : > { %v953_v20 = vsel %vm949_vm8, %v942_v15, %v4899_v21  ;;  %1090 = vmatpush1.bf16.msra.mxu0 %v1001_v19  ;;  %v517_v22 = vpop.permute.xlu0 %516 }
  0xe4   : > { %966 = vst [vmem:[#allocation3 + $0xc0] sm:$0x7] %v953_v20  ;;  %v527_v23 = vsel %vm522_vm1, %v4847_v41, %v517_v22  ;;  %v987_v30 = vld [vmem:[#allocation3 + $0x80] sm:$0xff] }
  0xe5   : > { %541 = vst [vmem:[#allocation3 + $0x20] sm:$0x7] %v527_v23 }
  0xe6   : > { %v4905_v24 = vpop.permute.xlu1 %518 }
  0xe7   : > { %v528_v25 = vsel %vm522_vm1, %v517_v22, %v4905_v24  ;;  %v576_v26 = vpop.permute.xlu0 %575  ;;  %v988_v32 = vld [vmem:[#allocation3 + $0x88] sm:$0xff] }
  0xe8   : > { %542 = vst [vmem:[#allocation3 + $0x28] sm:$0x7] %v528_v25  ;;  %v586_v27 = vsel %vm581_vm3, %v4854_v47, %v576_v26  ;;  %v994_v28 = vld [vmem:[#allocation3 + $0xb8] sm:$0x7] }
  0xe9   : > { %600 = vst [vmem:[#allocation3 + $0x20] sm:$0x38] %v586_v27  ;;  %v1008_v34 = vpack.c.bf16 %v994_v28, %v987_v30 }
  0xea   : > { %v4911_v29 = vpop.permute.xlu1 %577 }
  0xeb   : > { %v587_v31 = vsel %vm581_vm3, %v576_v26, %v4911_v29  ;;  %v995_v33 = vld [vmem:[#allocation3 + $0xc0] sm:$0x7]  ;;  %v635_v35 = vpop.permute.xlu0 %634  ;;  %v1034_v42 = vand.u32 %v4845_v40, %v1008_v34 }
  0xec   : > { %601 = vst [vmem:[#allocation3 + $0x28] sm:$0x38] %v587_v31  ;;  %v1009_v36 = vpack.c.bf16 %v995_v33, %v988_v32  ;;  %v645_v37 = vsel %vm640_vm2, %v4860_v58, %v635_v35  ;;  %v1220_v31 = vlaneseq }
  0xed   : > { %659 = vst [vmem:[#allocation3 + $0x58] ss:$-52 sps:$4 sm:$0xc1] %v645_v37  }
  0xee   : > { %v4917_v38 = vpop.permute.xlu1 %636  ;;  %v1037_v39 = vand.u32 %v4845_v40, %v1009_v36  ;;  %v4964_v32 = vshrl.u32 %v1220_v31, 7 }
  0xef   : > { %v646_v41 = vsel %vm640_vm2, %v635_v35, %v4917_v38  ;;  %v702_v43 = vpop.permute.xlu0 %701  ;;  %v4974_v35 = vld [vmem:[%s6090_s3] sm:$0x7f]  ;;  %s4508_s3 = smov 15  }
  0xf0   : > { %660 = vst [vmem:[#allocation3 + $0x60] ss:$-52 sps:$4 sm:$0xc1] %v646_v41   ;;  %1091 = vmatprep.subr.bf16.mxu0 %v1037_v39  ;;  %v712_v44 = vsel %vm707_vm4, %v4872_v63, %v702_v43  ;;  %v4967_v33 = vsub.s32 0, %v4964_v32 }
  0xf1   : > { %1092 = vmatpush1.bf16.msra.mxu0 %v1034_v42  ;;  %726 = vst [vmem:[#allocation3 + $0x58] sm:$0xe] %v712_v44 }
  0xf2   : > { %v4925_v45 = vpop.permute.xlu1 %703 }
  0xf3   : > { %v713_v46 = vsel %vm707_vm4, %v702_v43, %v4925_v45  ;;  %v783_v47 = vpop.permute.xlu0 %782 }
  0xf4   : > { %727 = vst [vmem:[#allocation3 + $0x60] sm:$0xe] %v713_v46  ;;  %3923 = vmatmul.mubr.msk.bf16.vlgmr.msra.gmra.mrb[4].mxu0 %vm1019_vm11, %v4868_v61  ;;  %v791_v48 = vsel %vm786_vm5, %v4881_v4, %v783_v47  ;;  %v975_v62 = vld [vmem:[#allocation3 + $0x20] sm:$0xff] }
  0xf5   : > { %1162 = vmatprep.mubr.bf16.mxu0 %v4503_v56  ;;  %804 = vst [vmem:[#allocation3 + $0x90] ss:$-52 sps:$4 sm:$0x83] %v791_v48   ;;  %v1230_v48 = vsub.s32 2, %v4964_v32 }
  0xf6   : > { %v785_v49 = vpop.permute.xlu1 %784 }
  0xf7   : > { %v792_v52 = vsel %vm786_vm5, %v783_v47, %v785_v49  ;;  %807 = vst.msk [vmem:[#allocation3 + $0x68] sm:$0x80] %vm806_vm12, %v785_v49  ;;  %v845_v53 = vpop.permute.xlu0 %844  ;;  %v976_v0 = vld [vmem:[#allocation3 + $0x28] sm:$0xff]  ;;  %vm669_vm12 = vcmask 581632  }
  0xf8   : > { %815 = vst.msk [vmem:[#allocation3 + $0xa0] sm:$0x3] %vm814_vm13, %v785_v49  ;;  %805 = vst [vmem:[#allocation3 + $0x98] ss:$-52 sps:$4 sm:$0x83] %v792_v52   ;;  %v853_v55 = vsel %vm848_vm6, %v4887_v7, %v845_v53  ;;  %vm728_vm13 = vcmask 584705  }
  0xf9   : > { %866 = vst [vmem:[#allocation3 + $0x90] sm:$0x1c] %v853_v55  ;;  %v1234_v49 = vsub.s32 3, %v4964_v32  ;;  %v1231_v55 = vrot.slane %v4974_v35, %v1230_v48 }
  0xfa   : > { %v847_v57 = vpop.permute.xlu1 %846 }
  0xfb   : > { %v854_v58 = vsel %vm848_vm6, %v845_v53, %v847_v57  ;;  %869 = vst.msk [vmem:[#allocation3 + $0xa0] sm:$0x1c] %vm868_vm14, %v847_v57  ;;  %v899_v51 = vpop.permute.xlu0 %898  ;;  %vm4506_vm14 = vmmov 0  }
  0xfc   : > { %867 = vst [vmem:[#allocation3 + $0x98] sm:$0x1c] %v854_v58  ;;  %v907_v59 = vsel %vm902_vm7, %v4893_v10, %v899_v51  ;;  %v982_v54 = vld [vmem:[#allocation3 + $0x58] sm:$0xff] }
  0xfd   : > { %920 = vst [vmem:[#allocation3 + $0x90] sm:$0xe0] %v907_v59  ;;  %v1003_v6 = vpack.c.bf16 %v982_v54, %v975_v62 }
  0xfe   : > { %v901_v60 = vpop.permute.xlu1 %900 }
  0xff   : > { %v908_v63 = vsel %vm902_vm7, %v899_v51, %v901_v60  ;;  %923 = vst.msk [vmem:[#allocation3 + $0xa0] sm:$0xe0] %vm922_vm15, %v901_v60  ;;  %v983_v2 = vld [vmem:[#allocation3 + $0x60] sm:$0xff]  ;;  %v946_v3 = vpop.permute.xlu0 %945  ;;  %v1235_v51 = vrot.slane %v4974_v35, %v1234_v49  ;;  %vm1271_vm15 = vcmask 851520  }
 0x100   : > { %921 = vst [vmem:[#allocation3 + $0x98] sm:$0xe0] %v908_v63  ;;  %v1004_v4 = vpack.c.bf16 %v983_v2, %v976_v0  ;;  %v954_v5 = vsel %vm949_vm8, %v4899_v21, %v946_v3 }
 0x101   : > { %967 = vst [vmem:[#allocation3 + $0xc8] sm:$0x7] %v954_v5 }
 0x102   : > { %v948_v7 = vpop.permute.xlu1 %947  ;;  %1130 = vmatprep.subr.bf16.mxu0 %v1004_v4  ;;  %v1242_v4 = vsub.s32 5, %v4964_v32 }
 0x103   : > { %v955_v8 = vsel %vm949_vm8, %v946_v3, %v948_v7  ;;  %969 = vst.msk [vmem:[#allocation3 + $0xd8] sm:$0x7] %vm543_vm0, %v948_v7  ;;  %1131 = vmatpush1.bf16.msra.mxu0 %v1003_v6  ;;  %v521_v9 = vpop.permute.xlu0 %520  ;;  %v1238_v3 = vsub.s32 4, %v4964_v32 }
 0x104   : > { %968 = vst [vmem:[#allocation3 + $0xd0] sm:$0x7] %v955_v8  ;;  %v529_v1 = vsel %vm522_vm1, %v4905_v24, %v521_v9  ;;  %v989_v16 = vld [vmem:[#allocation3 + $0x90] sm:$0xff]  ;;  %v1243_v9 = vrot.slane %v4974_v35, %v1242_v4 }
 0x105   : > { %544 = vst.msk [vmem:[#allocation3 + $0x30] sm:$0x7] %vm543_vm0, %v529_v1  ;;  %v1239_v6 = vrot.slane %v4974_v35, %v1238_v3  ;;  %vm1799_vm0 = vcmask 1043456  }
 0x106   : > { %v580_v10 = vpop.permute.xlu1 %579  ;;  %v991_v27 = vld [vmem:[#allocation3 + $0xa0] sm:$0xff] }
 0x107   : > { %v588_v11 = vsel %vm581_vm3, %v4911_v29, %v580_v10  ;;  %v639_v12 = vpop.permute.xlu0 %638  ;;  %v990_v18 = vld [vmem:[#allocation3 + $0x98] sm:$0xff] }
 0x108   : > { %603 = vst.msk [vmem:[#allocation3 + $0x30] sm:$0x38] %vm602_vm9, %v588_v11  ;;  %v647_v13 = vsel %vm640_vm2, %v4917_v38, %v639_v12  ;;  %v996_v14 = vld [vmem:[#allocation3 + $0xc8] sm:$0x7]  ;;  %v1223_v38 = vrot.slane %v4974_v35, %v4967_v33  ;;  %vm3063_vm9 = vcmask 916480  }
 0x109   : > { %662 = vst.msk [vmem:[#allocation3 + $0x30] sm:$0xc0] %vm661_vm10, %v647_v13  ;;  %v1010_v21 = vpack.c.bf16 %v996_v14, %v989_v16  ;;  %vm3077_vm10 = vcmask 908288  }
 0x10a   : > { %670 = vst.msk [vmem:[#allocation3 + $0x68] sm:$0x1] %vm669_vm12, %v647_v13  ;;  %v706_v15 = vpop.permute.xlu1 %705  ;;  %v998_v24 = vld [vmem:[#allocation3 + $0xd8] sm:$0x7] }
 0x10b   : > { %v714_v17 = vsel %vm707_vm4, %v4925_v45, %v706_v15  ;;  %v997_v19 = vld [vmem:[#allocation3 + $0xd0] sm:$0x7]  ;;  %v1040_v23 = vand.u32 %v4845_v40, %v1010_v21  ;;  %v1012_v29 = vpack.c.bf16 %v998_v24, %v991_v27  ;;  %v1246_v15 = vsub.s32 6, %v4964_v32 }
 0x10c   : > { %729 = vst.msk [vmem:[#allocation3 + $0x68] sm:$0xe] %vm728_vm13, %v714_v17  ;;  %v1011_v20 = vpack.c.bf16 %v997_v19, %v990_v18 }
 0x10d   : > { %v1046_v30 = vand.u32 %v4845_v40, %v1012_v29  ;;  %v1247_v18 = vrot.slane %v4974_v35, %v1246_v15 }
 0x10e   : > { %v1043_v22 = vand.u32 %v4845_v40, %v1011_v20  ;;  %v4977_v40 = vsub.s32 1, %v4964_v32  ;;  %v4276_v32 = vld [vmem:[%s6042_s7 + $0x174] ss:$8 sps:$4 sm:$0xff]  }
 0x110   : > { %1132 = vmatprep.subr.bf16.mxu0 %v1043_v22  ;;  %v977_v25 = vld [vmem:[#allocation3 + $0x30] sm:$0xff]  ;;  %v1227_v41 = vrot.slane %v4974_v35, %v4977_v40 }
 0x111   : > { %1133 = vmatpush1.bf16.msra.mxu0 %v1040_v23 }
 0x112   : > { %4078 = vmatprep.subr.bf16.mxu0 %v4504_v50 }
 0x113   : > { %v984_v26 = vld [vmem:[#allocation3 + $0x68] sm:$0xff] }
 0x114   : > { %3924 = vmatmul.mubr.msk.bf16.vlgmr.msra.gmra.mrb[8].mxu0 %vm1019_vm11, %v4868_v61  ;;  %v1005_v28 = vpack.c.bf16 %v984_v26, %v977_v25 }
 0x115   : > { %4082 = vmatprep.mubr.msk.bf16.mxu0 %vm4506_vm14, %v4504_v50 }
 0x116   : > { %4079 = vmatpush3.bf16.msra.mxu0 %v1005_v28  ;;  %v1790_v28 = vld [vmem:[%s6040_s5] sm:$0xff] }
 0x117   : > { %4080 = vmatprep.subr.bf16.mxu0 %v4504_v50 }
 0x118   : > { %v4969_v34 = vpop.permute.xlu0 %1016 }
 0x11a   : > { %4081 = vmatpush3.bf16.msra.mxu0 %v1046_v30 }
 0x11c   : > { %v1290_v25 = vpop.permute.xlu0 %1289 }
 0x11d   : > { %4083 = vmatmul.mubr.msk.bf16.vlgmr.msra.gmra.mrb[12].mxu0 %vm1019_vm11, %v4868_v61  ;;  %vm1269_vm11 = vcmask 588800  }
 0x11e   : > { %1853 = vmatprep.mubr.bf16.mxu0 %v4503_v56 }
 0x120   : > { %v1396_v27 = vpop.permute.xlu0 %1395 }
 0x1a6   : > { %v1082_v36 = vpop.f32.mrb[0].mxu0 }
 0x1a7   : > { %v1083_v61 = vadd.f32 %v1082_v36, %v4969_v34  ;;  %v1084_v37 = vpop.f32.mrb[1].mxu0 }
 0x1a8   : > { %v1085_v39 = vadd.f32 %v1084_v37, %v4969_v34  ;;  %v1086_v42 = vpop.f32.mrb[2].mxu0 }
 0x1a9   : > { %v1211_v43 = vmax.f32 %v1083_v61, 0.0  ;;  %v1087_v44 = vpop.f32.mrb[3].mxu0 }
 0x1aa   : > { %v1212_v45 = vmax.f32 %v1085_v39, 0.0 }
 0x1ab   : > { %v4985_v46 = vmul.f32 %v1223_v38, %v1211_v43 }
 0x1ac   : > { %v4987_v47 = vmul.f32 %v1227_v41, %v1212_v45 }
 0x1ad   : > { %1344 = vrot.lane.b32.xlu0 %v4985_v46, %s6080_s23  ;;  %1291 = vrot.lane.b32.xlu1 %v4985_v46, %s6085_s27 }
 0x1b1   : > { %1397 = vrot.lane.b32.xlu0 %v4985_v46, %s6086_s30  ;;  %1561 = vrot.lane.b32.xlu1 %v4985_v46, %s6087_s20 }
 0x1b5   : > { %1450 = vrot.lane.b32.xlu0 %v4985_v46, %s6081_s26  ;;  %1657 = vrot.lane.b32.xlu1 %v4985_v46, %s6084_s0 }
 0x1b9   : > { %1513 = vrot.lane.b32.xlu0 %v4985_v46, %s6082_s17  ;;  %1293 = vrot.lane.b32.xlu1 %v4987_v47, %s6085_s27 }
 0x1bd   : > { %1609 = vrot.lane.b32.xlu0 %v4985_v46, %s6083_s16  ;;  %1346 = vrot.lane.b32.xlu1 %v4987_v47, %s6080_s23 }
 0x1c1   : > { %1515 = vrot.lane.b32.xlu0 %v4987_v47, %s6082_s17  ;;  %1399 = vrot.lane.b32.xlu1 %v4987_v47, %s6086_s30 }
 0x1c5   : > { %1659 = vrot.lane.b32.xlu0 %v4987_v47, %s6084_s0  ;;  %1452 = vrot.lane.b32.xlu1 %v4987_v47, %s6081_s26 }
 0x1c7   : > { %v1123_v52 = vpop.f32.mrb[4].mxu0 }
 0x1c8   : > { %v1124_v53 = vadd.f32 %v1123_v52, %v4969_v34  ;;  %v1125_v57 = vpop.f32.mrb[5].mxu0 }
 0x1c9   : > { %v1126_v58 = vadd.f32 %v1125_v57, %v4969_v34  ;;  %v1127_v59 = vpop.f32.mrb[6].mxu0  ;;  %1563 = vrot.lane.b32.xlu1 %v4987_v47, %s6087_s20 }
 0x1ca   : > { %v1213_v60 = vmax.f32 %v1124_v53, 0.0  ;;  %v1128_v54 = vpop.f32.mrb[7].mxu0 }
 0x1cb   : > { %v1214_v63 = vmax.f32 %v1126_v58, 0.0 }
 0x1cc   : > { %v5029_v0 = vmul.f32 %v1231_v55, %v1213_v60 }
 0x1cd   : > { %v5031_v2 = vmul.f32 %v1235_v51, %v1214_v63  ;;  %1611 = vrot.lane.b32.xlu1 %v4987_v47, %s6083_s16 }
 0x1ce   : > { %1565 = vrot.lane.b32.xlu0 %v5029_v0, %s6087_s20 }
 0x1d1   : > { %1517 = vrot.lane.b32.xlu1 %v5029_v0, %s6082_s17 }
 0x1d2   : > { %1613 = vrot.lane.b32.xlu0 %v5029_v0, %s6083_s16 }
 0x1d5   : > { %1661 = vrot.lane.b32.xlu1 %v5029_v0, %s6084_s0 }
 0x1d6   : > { %1295 = vrot.lane.b32.xlu0 %v5029_v0, %s6085_s27 }
 0x1d9   : > { %1297 = vrot.lane.b32.xlu1 %v5031_v2, %s6085_s27 }
 0x1da   : > { %1348 = vrot.lane.b32.xlu0 %v5029_v0, %s6080_s23 }
 0x1dd   : > { %1350 = vrot.lane.b32.xlu1 %v5031_v2, %s6080_s23 }
 0x1de   : > { %1401 = vrot.lane.b32.xlu0 %v5029_v0, %s6086_s30 }
 0x1e1   : > { %1403 = vrot.lane.b32.xlu1 %v5031_v2, %s6086_s30 }
 0x1e2   : > { %1454 = vrot.lane.b32.xlu0 %v5029_v0, %s6081_s26 }
 0x1e5   : > { %1456 = vrot.lane.b32.xlu1 %v5031_v2, %s6081_s26 }
 0x1e6   : > { %1519 = vrot.lane.b32.xlu0 %v5031_v2, %s6082_s17 }
 0x1e7   : > { %v1164_v62 = vpop.f32.mrb[8].mxu0 }
 0x1e8   : > { %v1165_v5 = vadd.f32 %v1164_v62, %v4969_v34  ;;  %v1166_v7 = vpop.f32.mrb[9].mxu0 }
 0x1e9   : > { %v1167_v8 = vadd.f32 %v1166_v7, %v4969_v34  ;;  %v1168_v1 = vpop.f32.mrb[10].mxu0 }
 0x1ea   : > { %v1215_v10 = vmax.f32 %v1165_v5, 0.0  ;;  %v1169_v11 = vpop.f32.mrb[11].mxu0  ;;  %1567 = vrot.lane.b32.xlu0 %v5031_v2, %s6087_s20 }
 0x1eb   : > { %v1216_v12 = vmax.f32 %v1167_v8, 0.0 }
 0x1ec   : > { %v5073_v13 = vmul.f32 %v1239_v6, %v1215_v10 }
 0x1ed   : > { %v5075_v14 = vmul.f32 %v1243_v9, %v1216_v12 }
 0x1ee   : > { %1615 = vrot.lane.b32.xlu0 %v5031_v2, %s6083_s16  ;;  %1521 = vrot.lane.b32.xlu1 %v5073_v13, %s6082_s17 }
 0x1f0   : > { %v1205_v16 = vpop.f32.mrb[12].mxu0 }
 0x1f1   : > { %v1206_v17 = vadd.f32 %v1205_v16, %v4969_v34  ;;  %v4084_v19 = vpop.f32.mrb[13].mxu0 }
 0x1f2   : > { %1663 = vrot.lane.b32.xlu0 %v5031_v2, %s6084_s0  ;;  %1569 = vrot.lane.b32.xlu1 %v5073_v13, %s6087_s20  ;;  %v1208_v21 = vpop.f32.mrb[14].mxu0 }
 0x1f3   : > { %v1217_v20 = vmax.f32 %v1206_v17, 0.0  ;;  %v4085_v22 = vpop.f32.mrb[15].mxu0 }
 0x1f5   : > { %v1261_v23 = vmul.f32 %v1247_v18, %v1217_v20 }
 0x1f6   : > { %1299 = vrot.lane.b32.xlu0 %v5073_v13, %s6085_s27  ;;  %1617 = vrot.lane.b32.xlu1 %v5073_v13, %s6083_s16 }
 0x1f7   : > { %1270 = vst.msk [vmem:[#allocation2 + $0x38] sm:$0xff] %vm1269_vm11, %v1261_v23 }
 0x1f8   : > { %1272 = vst.msk [vmem:[#allocation2 + $0x38] sm:$0xff] %vm1271_vm15, %v4504_v50  ;;  %v1343_v50 = vpop.permute.xlu1 %1342 }
 0x1fa   : > { %1352 = vrot.lane.b32.xlu0 %v5073_v13, %s6080_s23  ;;  %1665 = vrot.lane.b32.xlu1 %v5073_v13, %s6084_s0 }
 0x1fc   : > { %v1449_v26 = vpop.permute.xlu1 %1448 }
 0x1fe   : > { %1405 = vrot.lane.b32.xlu0 %v5073_v13, %s6086_s30  ;;  %1301 = vrot.lane.b32.xlu1 %v5075_v14, %s6085_s27 }
 0x1ff   : > { %v1491_v24 = vld [vmem:[#allocation2 + $0x38] sm:$0xff] }
 0x200   : > { %1498 = vst.msk [vmem:[#allocation5 + $0x110] sm:$0xff] %vm1269_vm11, %v1491_v24 }
 0x202   : > { %1458 = vrot.lane.b32.xlu0 %v5073_v13, %s6081_s26  ;;  %1354 = vrot.lane.b32.xlu1 %v5075_v14, %s6080_s23 }
 0x206   : > { %1523 = vrot.lane.b32.xlu0 %v5075_v14, %s6082_s17  ;;  %1407 = vrot.lane.b32.xlu1 %v5075_v14, %s6086_s30 }
 0x20a   : > { %1571 = vrot.lane.b32.xlu0 %v5075_v14, %s6087_s20  ;;  %1460 = vrot.lane.b32.xlu1 %v5075_v14, %s6081_s26 }
 0x20e   : > { %1619 = vrot.lane.b32.xlu0 %v5075_v14, %s6083_s16  ;;  %1525 = vrot.lane.b32.xlu1 %v1491_v24, %s6082_s17 }
 0x212   : > { %1667 = vrot.lane.b32.xlu0 %v5075_v14, %s6084_s0  ;;  %1573 = vrot.lane.b32.xlu1 %v1491_v24, %s6087_s20 }
 0x216   : > { %1303 = vrot.lane.b32.xlu0 %v1491_v24, %s6085_s27  ;;  %1621 = vrot.lane.b32.xlu1 %v1491_v24, %s6083_s16  ;;  %s4509_s27 = smov 16  }
 0x21a   : > { %1409 = vrot.lane.b32.xlu0 %v1491_v24, %s6086_s30  ;;  %1669 = vrot.lane.b32.xlu1 %v1491_v24, %s6084_s0  ;;  %s4511_s30 = smov 112   ;;  %s4068_s0 = sshll.u32 %s4617_s22, 8 }
 0x21b   : > { %s4513_s22 = smov [#allocation11]  }
 0x21e   : > { %1793 = vperm.xlu0 %4169, %v1790_v28   ;;  %1356 = vrot.lane.b32.xlu1 %v1491_v24, %s6080_s23  ;;  %s4512_s23 = smov 111  }
 0x21f   : > { %v1292_v29 = vpop.permute.xlu1 %1291  ;;  %v1345_v30 = vpop.permute.xlu0 %1344 }
 0x220   : > { %v1305_v31 = vsel %vm522_vm1, %v1290_v25, %v1292_v29  ;;  %v1358_v34 = vsel %vm581_vm3, %v1343_v50, %v1345_v30 }
 0x221   : > { %v1755_v55 = vpack.c.bf16 %v1358_v34, %v1305_v31 }
 0x222   : > { %1462 = vrot.lane.b32.xlu1 %v1491_v24, %s6081_s26 }
 0x223   : > { %v1562_v35 = vpop.permute.xlu1 %1561  ;;  %v1398_v36 = vpop.permute.xlu0 %1397 }
 0x224   : > { %v1411_v61 = vsel %vm640_vm2, %v1396_v27, %v1398_v36 }
 0x227   : > { %v1658_v37 = vpop.permute.xlu1 %1657  ;;  %v1451_v38 = vpop.permute.xlu0 %1450 }
 0x228   : > { %v1464_v39 = vsel %vm707_vm4, %v1449_v26, %v1451_v38 }
 0x229   : > { %v1762_v6 = vpack.c.bf16 %v1464_v39, %v1411_v61 }
 0x22b   : > { %v1294_v41 = vpop.permute.xlu1 %1293  ;;  %v1514_v42 = vpop.permute.xlu0 %1513 }
 0x22c   : > { %v1306_v43 = vsel %vm522_vm1, %v1292_v29, %v1294_v41 }
 0x22f   : > { %v1347_v44 = vpop.permute.xlu1 %1346  ;;  %v1610_v45 = vpop.permute.xlu0 %1609 }
 0x230   : > { %v1359_v52 = vsel %vm581_vm3, %v1345_v30, %v1347_v44 }
 0x231   : > { %v1756_v53 = vpack.c.bf16 %v1359_v52, %v1306_v43 }
 0x233   : > { %v1400_v57 = vpop.permute.xlu1 %1399  ;;  %v1516_v58 = vpop.permute.xlu0 %1515  ;;  %1821 = vmatprep.subr.bf16.mxu0 %v1756_v53 }
 0x234   : > { %v1412_v51 = vsel %vm640_vm2, %v1398_v36, %v1400_v57  ;;  %v1527_v59 = vsel %vm786_vm5, %v1514_v42, %v1516_v58  ;;  %1822 = vmatpush1.bf16.msra.mxu0 %v1755_v55  ;;  %v5160_v36 = vld [vmem:[%s6039_s4] sm:$0xf] }
 0x235   : > { %v1769_v21 = vpack.c.bf16 %v1527_v59, %v4985_v46 }
 0x237   : > { %v1453_v60 = vpop.permute.xlu1 %1452  ;;  %v1660_v54 = vpop.permute.xlu0 %1659 }
 0x238   : > { %v1465_v63 = vsel %vm707_vm4, %v1451_v38, %v1453_v60  ;;  %v1671_v62 = vsel %vm949_vm8, %v1658_v37, %v1660_v54 }
 0x239   : > { %v1763_v5 = vpack.c.bf16 %v1465_v63, %v1412_v51  ;;  %v1783_v28 = vpack.c.bf16 %v1671_v62, %v1671_v62 }
 0x23b   : > { %v1564_v7 = vpop.permute.xlu1 %1563  ;;  %1823 = vmatprep.subr.bf16.mxu0 %v1763_v5  ;;  %v1801_v31 = vsel %vm1799_vm0, %v1783_v28, 0 }
 0x23c   : > { %v1575_v8 = vsel %vm848_vm6, %v1562_v35, %v1564_v7  ;;  %1824 = vmatpush1.bf16.msra.mxu0 %v1762_v6 }
 0x23f   : > { %v1612_v9 = vpop.permute.xlu1 %1611 }
 0x240   : > { %v1623_v1 = vsel %vm902_vm7, %v1610_v45, %v1612_v9  ;;  %v1566_v10 = vpop.permute.xlu0 %1565 }
 0x241   : > { %v1576_v11 = vsel %vm848_vm6, %v1564_v7, %v1566_v10  ;;  %v1776_v25 = vpack.c.bf16 %v1623_v1, %v1575_v8 }
 0x243   : > { %v1518_v12 = vpop.permute.xlu1 %1517 }
 0x244   : > { %v1528_v16 = vsel %vm786_vm5, %v1516_v58, %v1518_v12  ;;  %v1614_v17 = vpop.permute.xlu0 %1613 }
 0x245   : > { %v1624_v18 = vsel %vm902_vm7, %v1612_v9, %v1614_v17  ;;  %v1770_v19 = vpack.c.bf16 %v1528_v16, %v4987_v47 }
 0x246   : > { %v1777_v20 = vpack.c.bf16 %v1624_v18, %v1576_v11 }
 0x247   : > { %v1662_v22 = vpop.permute.xlu1 %1661  ;;  %1825 = vmatprep.subr.bf16.mxu0 %v1770_v19 }
 0x248   : > { %v1672_v23 = vsel %vm949_vm8, %v1660_v54, %v1662_v22  ;;  %v1296_v24 = vpop.permute.xlu0 %1295  ;;  %1826 = vmatpush1.bf16.msra.mxu0 %v1769_v21 }
 0x249   : > { %v1307_v50 = vsel %vm522_vm1, %v1294_v41, %v1296_v24  ;;  %1827 = vmatprep.subr.bf16.mxu0 %v1777_v20  ;;  %v1784_v27 = vpack.c.bf16 %v1672_v23, %v1672_v23 }
 0x24b   : > { %v1298_v26 = vpop.permute.xlu1 %1297 }
 0x24c   : > { %v1308_v29 = vsel %vm522_vm1, %v1296_v24, %v1298_v26  ;;  %v1349_v30 = vpop.permute.xlu0 %1348  ;;  %1828 = vmatpush1.bf16.msra.mxu0 %v1776_v25 }
 0x24d   : > { %v1360_v46 = vsel %vm581_vm3, %v1347_v44, %v1349_v30  ;;  %3926 = vmatprep.subr.msk.bf16.mxu0 %vm1799_vm0, %v1784_v27 }
 0x24e   : > { %v1757_v38 = vpack.c.bf16 %v1360_v46, %v1307_v50 }
 0x24f   : > { %v1351_v47 = vpop.permute.xlu1 %1350 }
 0x250   : > { %v1361_v34 = vsel %vm581_vm3, %v1349_v30, %v1351_v47  ;;  %v1402_v35 = vpop.permute.xlu0 %1401  ;;  %1830 = vmatpush1.bf16.msra.mxu0 %v1801_v31 }
 0x251   : > { %v1413_v61 = vsel %vm640_vm2, %v1400_v57, %v1402_v35  ;;  %v1758_v37 = vpack.c.bf16 %v1361_v34, %v1308_v29 }
 0x253   : > { %v1404_v39 = vpop.permute.xlu1 %1403  ;;  %3927 = vmatmul.mubr.msk.bf16.vlgmr.msra.gmra.mrb[16].mxu0 %vm1269_vm11, %v5160_v36  ;;  %1862 = vmatprep.subr.bf16.mxu1 %v1758_v37 }
 0x254   : > { %v1414_v41 = vsel %vm640_vm2, %v1402_v35, %v1404_v39  ;;  %v1455_v42 = vpop.permute.xlu0 %1454  ;;  %1863 = vmatpush1.bf16.msra.mxu1 %v1757_v38  ;;  %1935 = vmatprep.mubr.bf16.mxu0 %v4503_v56 }
 0x255   : > { %v1466_v43 = vsel %vm707_vm4, %v1453_v60, %v1455_v42 }
 0x256   : > { %v1764_v57 = vpack.c.bf16 %v1466_v43, %v1413_v61 }
 0x257   : > { %v1457_v44 = vpop.permute.xlu1 %1456 }
 0x258   : > { %v1467_v45 = vsel %vm707_vm4, %v1455_v42, %v1457_v44  ;;  %v1520_v52 = vpop.permute.xlu0 %1519 }
 0x259   : > { %v1529_v53 = vsel %vm786_vm5, %v1518_v12, %v1520_v52  ;;  %v1765_v55 = vpack.c.bf16 %v1467_v45, %v1414_v41 }
 0x25a   : > { %v1771_v5 = vpack.c.bf16 %v1529_v53, %v5029_v0 }
 0x25b   : > { %1864 = vmatprep.subr.bf16.mxu1 %v1765_v55 }
 0x25c   : > { %v1568_v58 = vpop.permute.xlu0 %1567  ;;  %1865 = vmatpush1.bf16.msra.mxu1 %v1764_v57 }
 0x25d   : > { %v1577_v51 = vsel %vm848_vm6, %v1566_v10, %v1568_v58 }
 0x260   : > { %v1522_v59 = vpop.permute.xlu1 %1521  ;;  %v1616_v54 = vpop.permute.xlu0 %1615 }
 0x261   : > { %v1530_v63 = vsel %vm786_vm5, %v1520_v52, %v1522_v59  ;;  %v1625_v62 = vsel %vm902_vm7, %v1614_v17, %v1616_v54 }
 0x262   : > { %v1772_v60 = vpack.c.bf16 %v1530_v63, %v5031_v2  ;;  %v1778_v17 = vpack.c.bf16 %v1625_v62, %v1577_v51 }
 0x264   : > { %v1570_v6 = vpop.permute.xlu1 %1569  ;;  %v1664_v7 = vpop.permute.xlu0 %1663  ;;  %1866 = vmatprep.subr.bf16.mxu1 %v1772_v60 }
 0x265   : > { %v1578_v8 = vsel %vm848_vm6, %v1568_v58, %v1570_v6  ;;  %v1673_v9 = vsel %vm949_vm8, %v1662_v22, %v1664_v7  ;;  %1867 = vmatpush1.bf16.msra.mxu1 %v1771_v5 }
 0x266   : > { %v1785_v0 = vpack.c.bf16 %v1673_v9, %v1673_v9 }
 0x268   : > { %v1618_v1 = vpop.permute.xlu1 %1617  ;;  %v1300_v10 = vpop.permute.xlu0 %1299  ;;  %v1807_v24 = vsel %vm1799_vm0, %v1785_v0, 0 }
 0x269   : > { %v1626_v11 = vsel %vm902_vm7, %v1616_v54, %v1618_v1  ;;  %v1309_v12 = vsel %vm522_vm1, %v1298_v26, %v1300_v10  ;;  %v5185_v26 = vld [vmem:[#allocation4] sm:$0xff] }
 0x26a   : > { %v1779_v16 = vpack.c.bf16 %v1626_v11, %v1578_v8 }
 0x26c   : > { %v1666_v18 = vpop.permute.xlu1 %1665  ;;  %v1353_v2 = vpop.permute.xlu0 %1352  ;;  %1868 = vmatprep.subr.bf16.mxu1 %v1779_v16 }
 0x26d   : > { %v1674_v19 = vsel %vm949_vm8, %v1664_v7, %v1666_v18  ;;  %v1362_v21 = vsel %vm581_vm3, %v1351_v47, %v1353_v2  ;;  %1869 = vmatpush1.bf16.msra.mxu1 %v1778_v17 }
 0x26e   : > { %v1786_v20 = vpack.c.bf16 %v1674_v19, %v1674_v19  ;;  %v1759_v47 = vpack.c.bf16 %v1362_v21, %v1309_v12 }
 0x270   : > { %v1302_v22 = vpop.permute.xlu1 %1301  ;;  %v1406_v23 = vpop.permute.xlu0 %1405  ;;  %3928 = vmatprep.subr.msk.bf16.mxu1 %vm1799_vm0, %v1786_v20 }
 0x271   : > { %v1310_v50 = vsel %vm522_vm1, %v1300_v10, %v1302_v22  ;;  %v1415_v25 = vsel %vm640_vm2, %v1404_v39, %v1406_v23  ;;  %1871 = vmatpush1.bf16.msra.mxu1 %v1807_v24 }
 0x272   : > { %4086 = vmatprep.subr.bf16.mxu1 %v5185_v26 }
 0x274   : > { %v1355_v27 = vpop.permute.xlu1 %1354  ;;  %v1459_v28 = vpop.permute.xlu0 %1458  ;;  %3929 = vmatmul.mubr.msk.bf16.vlgmr.msra.gmra.mrb[0].mxu1 %vm1269_vm11, %v5160_v36 }
 0x275   : > { %v1363_v29 = vsel %vm581_vm3, %v1353_v2, %v1355_v27  ;;  %v1468_v30 = vsel %vm707_vm4, %v1457_v44, %v1459_v28  ;;  %4096 = vmatprep.mubr.msk.bf16.mxu1 %vm4506_vm14, %v5185_v26 }
 0x276   : > { %v1760_v46 = vpack.c.bf16 %v1363_v29, %v1310_v50  ;;  %v1766_v43 = vpack.c.bf16 %v1468_v30, %v1415_v25 }
 0x278   : > { %v1408_v31 = vpop.permute.xlu1 %1407  ;;  %v1524_v34 = vpop.permute.xlu0 %1523  ;;  %1903 = vmatprep.subr.bf16.mxu0 %v1760_v46 }
 0x279   : > { %v1416_v35 = vsel %vm640_vm2, %v1406_v23, %v1408_v31  ;;  %v1531_v61 = vsel %vm786_vm5, %v1522_v59, %v1524_v34  ;;  %1904 = vmatpush1.bf16.msra.mxu0 %v1759_v47  ;;  %v1726_v23 = vld [vmem:[#allocation5 + $0x110] sm:$0xff]  ;;  %v5232_v47 = vld [vmem:[%s6041_s6] sm:$0x7f] }
 0x27a   : > { %v1773_v57 = vpack.c.bf16 %v1531_v61, %v5073_v13  ;;  %v1996_v61 = vrot.slane %v5232_v47, %v4967_v33 }
 0x27c   : > { %v1461_v37 = vpop.permute.xlu1 %1460  ;;  %v1572_v38 = vpop.permute.xlu0 %1571 }
 0x27d   : > { %v1469_v39 = vsel %vm707_vm4, %v1459_v28, %v1461_v37  ;;  %v1579_v41 = vsel %vm848_vm6, %v1570_v6, %v1572_v38 }
 0x27e   : > { %v1767_v42 = vpack.c.bf16 %v1469_v39, %v1416_v35  ;;  %v2000_v39 = vrot.slane %v5232_v47, %v4977_v40 }
 0x280   : > { %v1526_v44 = vpop.permute.xlu1 %1525  ;;  %v1620_v45 = vpop.permute.xlu0 %1619  ;;  %1905 = vmatprep.subr.bf16.mxu0 %v1767_v42 }
 0x281   : > { %v1532_v52 = vsel %vm786_vm5, %v1524_v34, %v1526_v44  ;;  %1546 = vst.msk [vmem:[#allocation5 + $0x148] sm:$0xff] %vm1269_vm11, %v1526_v44  ;;  %v1627_v53 = vsel %vm902_vm7, %v1618_v1, %v1620_v45  ;;  %1906 = vmatpush1.bf16.msra.mxu0 %v1766_v43 }
 0x282   : > { %v1774_v55 = vpack.c.bf16 %v1532_v52, %v5075_v14  ;;  %v1780_v5 = vpack.c.bf16 %v1627_v53, %v1579_v41 }
 0x284   : > { %v1574_v58 = vpop.permute.xlu1 %1573  ;;  %v1668_v51 = vpop.permute.xlu0 %1667  ;;  %1907 = vmatprep.subr.bf16.mxu0 %v1774_v55  ;;  %v2004_v55 = vrot.slane %v5232_v47, %v1230_v48  ;;  %v2012_v48 = vrot.slane %v5232_v47, %v1238_v3 }
 0x285   : > { %v1580_v59 = vsel %vm848_vm6, %v1572_v38, %v1574_v58  ;;  %1594 = vst.msk [vmem:[#allocation5 + $0x180] sm:$0xff] %vm1269_vm11, %v1574_v58  ;;  %v1675_v54 = vsel %vm949_vm8, %v1666_v18, %v1668_v51  ;;  %1908 = vmatpush1.bf16.msra.mxu0 %v1773_v57  ;;  %vm2980_vm6 = vcmask 130048  }
 0x286   : > { %v1787_v8 = vpack.c.bf16 %v1675_v54, %v1675_v54 }
 0x288   : > { %v1622_v63 = vpop.permute.xlu1 %1621  ;;  %v1304_v62 = vpop.permute.xlu0 %1303  ;;  %v1813_v12 = vsel %vm1799_vm0, %v1787_v8, 0  ;;  %v1733_v24 = vld [vmem:[#allocation5 + $0x148] sm:$0xff] }
 0x289   : > { %v1628_v60 = vsel %vm902_vm7, %v1620_v45, %v1622_v63  ;;  %1642 = vst.msk [vmem:[#allocation5 + $0x1b8] sm:$0xff] %vm1269_vm11, %v1622_v63  ;;  %v1311_v14 = vsel %vm522_vm1, %v1302_v22, %v1304_v62  ;;  %v1775_v50 = vpack.c.bf16 %v1733_v24, %v1726_v23  ;;  %v4265_v23 = vld [vmem:[%s6042_s7 + $0x140] ss:$8 sps:$4 sm:$0xff]   ;;  %v4270_v24 = vld [vmem:[%s6042_s7 + $0x154] ss:$8 sps:$4 sm:$0xff]   ;;  %vm2945_vm1 = vcmask 785408  }
 0x28a   : > { %1325 = vst.msk [vmem:[#allocation5 + $0x30] sm:$0xff] %vm1269_vm11, %v1311_v14  ;;  %v1781_v13 = vpack.c.bf16 %v1628_v60, %v1580_v59 }
 0x28c   : > { %v1670_v6 = vpop.permute.xlu1 %1669  ;;  %v1410_v7 = vpop.permute.xlu0 %1409  ;;  %1909 = vmatprep.subr.bf16.mxu0 %v1781_v13  ;;  %v1740_v28 = vld [vmem:[#allocation5 + $0x180] sm:$0xff] }
 0x28d   : > { %v1676_v9 = vsel %vm949_vm8, %v1668_v51, %v1670_v6  ;;  %1690 = vst.msk [vmem:[#allocation5 + $0x1f0] sm:$0xff] %vm1269_vm11, %v1670_v6  ;;  %v1417_v1 = vsel %vm640_vm2, %v1408_v31, %v1410_v7  ;;  %1910 = vmatpush1.bf16.msra.mxu0 %v1780_v5  ;;  %v2008_v51 = vrot.slane %v5232_v47, %v1234_v49  ;;  %vm2947_vm2 = vcmask 933632  }
 0x28e   : > { %1431 = vst.msk [vmem:[#allocation5 + $0xa0] sm:$0xff] %vm1269_vm11, %v1417_v1  ;;  %v1788_v10 = vpack.c.bf16 %v1676_v9, %v1676_v9  ;;  %v2016_v49 = vrot.slane %v5232_v47, %v1242_v4  ;;  %v4255_v4 = vld [vmem:[%s6042_s7 + $0x104] ss:$8 sps:$4 sm:$0xff]   ;;  %vm3049_vm8 = vcmask 924672  }
 0x290   : > { %v1357_v11 = vpop.permute.xlu1 %1356  ;;  %3930 = vmatprep.subr.msk.bf16.mxu0 %vm1799_vm0, %v1788_v10  ;;  %v1747_v25 = vld [vmem:[#allocation5 + $0x1b8] sm:$0xff] }
 0x291   : > { %v1364_v16 = vsel %vm581_vm3, %v1355_v27, %v1357_v11  ;;  %1912 = vmatpush1.bf16.msra.mxu0 %v1813_v12  ;;  %v1698_v2 = vld [vmem:[#allocation5 + $0x30] sm:$0xff]  ;;  %v1782_v29 = vpack.c.bf16 %v1747_v25, %v1740_v28  ;;  %v2020_v28 = vrot.slane %v5232_v47, %v1246_v15  ;;  %v4279_v47 = vld [vmem:[%s6042_s7 + $0x184] ss:$8 sps:$4 sm:$0xff]   ;;  %vm2961_vm3 = vcmask 138240  }
 0x292   : > { %1378 = vst.msk [vmem:[#allocation5 + $0x68] sm:$0xff] %vm1269_vm11, %v1364_v16  ;;  %2820 = vmatprep.subr.bf16.mxu0 %v4255_v4  ;;  %v4268_v25 = vld [vmem:[%s6042_s7 + $0x150] ss:$8 sps:$4 sm:$0xff]  }
 0x293   : > { %v4274_v15 = vld [vmem:[%s6042_s7 + $0x170] ss:$8 sps:$4 sm:$0xff]  }
 0x294   : > { %v1463_v17 = vpop.permute.xlu1 %1462  ;;  %3931 = vmatmul.mubr.msk.bf16.vlgmr.msra.gmra.mrb[20].mxu0 %vm1269_vm11, %v5160_v36  ;;  %v1754_v27 = vld [vmem:[#allocation5 + $0x1f0] sm:$0xff] }
 0x295   : > { %v1470_v18 = vsel %vm707_vm4, %v1461_v37, %v1463_v17  ;;  %v1712_v21 = vld [vmem:[#allocation5 + $0xa0] sm:$0xff]  ;;  %v1789_v30 = vpack.c.bf16 %v1754_v27, %v1754_v27  ;;  %v4310_v4 = vld [vmem:[%s6042_s7 + $0x10] ss:$8 sps:$4 sm:$0xff]  }
 0x296   : > { %1484 = vst.msk [vmem:[#allocation5 + $0xd8] sm:$0xff] %vm1269_vm11, %v1470_v18  ;;  %v4253_v17 = vld [vmem:[%s6042_s7 + $0x100] ss:$8 sps:$4 sm:$0xff]   ;;  %v4258_v18 = vld [vmem:[%s6042_s7 + $0x114] ss:$8 sps:$4 sm:$0xff]  }
 0x297   : > { %v1819_v46 = vsel %vm1799_vm0, %v1789_v30, 0  ;;  %2821 = vmatpush1.bf16.msra.mxu0 %v4253_v17  ;;  %v4273_v30 = vld [vmem:[%s6042_s7 + $0x164] ss:$8 sps:$4 sm:$0xff]  }
 0x298   : > { %2822 = vmatprep.subr.bf16.mxu0 %v4258_v18 }
 0x299   : > { %v1705_v0 = vld [vmem:[#allocation5 + $0x68] sm:$0xff] }
 0x29a   : > { %v1761_v19 = vpack.c.bf16 %v1705_v0, %v1698_v2  ;;  %v4256_v2 = vld [vmem:[%s6042_s7 + $0x110] ss:$8 sps:$4 sm:$0xff]   ;;  %v4261_v0 = vld [vmem:[%s6042_s7 + $0x124] ss:$8 sps:$4 sm:$0xff]  }
 0x29b   : > { %2823 = vmatpush1.bf16.msra.mxu0 %v4256_v2  ;;  %v4318_v2 = vld [vmem:[%s6042_s7 + $0x24] ss:$8 sps:$4 sm:$0xff]  }
 0x29c   : > { %4087 = vmatpush3.bf16.msra.mxu1 %v1761_v19  ;;  %v4259_v19 = vld [vmem:[%s6042_s7 + $0x120] ss:$8 sps:$4 sm:$0xff]   ;;  %2824 = vmatprep.subr.bf16.mxu0 %v4261_v0 }
 0x29d   : > { %4088 = vmatprep.subr.bf16.mxu1 %v5185_v26  ;;  %v1719_v20 = vld [vmem:[#allocation5 + $0xd8] sm:$0xff]  ;;  %v5234_v31 = vpop.permute.xlu0 %1793  ;;  %v4316_v0 = vld [vmem:[%s6042_s7 + $0x20] ss:$8 sps:$4 sm:$0xff]  }
 0x29e   : > { %v1768_v22 = vpack.c.bf16 %v1719_v20, %v1712_v21  ;;  %v4264_v21 = vld [vmem:[%s6042_s7 + $0x134] ss:$8 sps:$4 sm:$0xff]   ;;  %v4262_v20 = vld [vmem:[%s6042_s7 + $0x130] ss:$8 sps:$4 sm:$0xff]  }
 0x29f   : > { %2825 = vmatpush1.bf16.msra.mxu0 %v4259_v19  ;;  %v4324_v19 = vld [vmem:[%s6042_s7 + $0x34] ss:$8 sps:$4 sm:$0xff]  }
 0x2a0   : > { %4089 = vmatpush3.bf16.msra.mxu1 %v1768_v22  ;;  %2826 = vmatprep.subr.bf16.mxu0 %v4264_v21  ;;  %v4267_v22 = vld [vmem:[%s6042_s7 + $0x144] ss:$8 sps:$4 sm:$0xff]   ;;  %v4322_v21 = vld [vmem:[%s6042_s7 + $0x30] ss:$8 sps:$4 sm:$0xff]  }
 0x2a1   : > { %4090 = vmatprep.subr.bf16.mxu1 %v5185_v26 }
 0x2a3   : > { %2827 = vmatpush1.bf16.msra.mxu0 %v4262_v20  ;;  %v4330_v20 = vld [vmem:[%s6042_s7 + $0x44] ss:$8 sps:$4 sm:$0xff]  }
 0x2a4   : > { %4091 = vmatpush3.bf16.msra.mxu1 %v1775_v50  ;;  %2828 = vmatprep.subr.bf16.mxu0 %v4267_v22  ;;  %v4328_v22 = vld [vmem:[%s6042_s7 + $0x40] ss:$8 sps:$4 sm:$0xff]  }
 0x2a5   : > { %4092 = vmatprep.subr.bf16.mxu1 %v5185_v26 }
 0x2a7   : > { %2829 = vmatpush1.bf16.msra.mxu0 %v4265_v23  ;;  %v4336_v23 = vld [vmem:[%s6042_s7 + $0x54] ss:$8 sps:$4 sm:$0xff]  }
 0x2a8   : > { %4093 = vmatpush3.bf16.msra.mxu1 %v1782_v29  ;;  %2830 = vmatprep.subr.bf16.mxu0 %v4270_v24  ;;  %v4334_v24 = vld [vmem:[%s6042_s7 + $0x50] ss:$8 sps:$4 sm:$0xff]  }
 0x2a9   : > { %4094 = vmatprep.subr.bf16.mxu1 %v5185_v26 }
 0x2ab   : > { %2831 = vmatpush1.bf16.msra.mxu0 %v4268_v25  ;;  %v4340_v25 = vld [vmem:[%s6042_s7 + $0x60] ss:$8 sps:$4 sm:$0xff]  }
 0x2ac   : > { %4095 = vmatpush3.bf16.msra.mxu1 %v1819_v46  ;;  %2832 = vmatprep.subr.bf16.mxu0 %v4273_v30  ;;  %v4352_v30 = vld [vmem:[%s6042_s7 + $0x80] ss:$8 sps:$4 sm:$0xff]  }
 0x2af   : > { %4097 = vmatmul.mubr.msk.bf16.vlgmr.msra.gmra.mrb[4].mxu1 %vm1269_vm11, %v5160_v36 }
 0x326   : > { %v1855_v34 = vpop.f32.mrb[16].mxu0 }
 0x327   : > { %v1856_v35 = vadd.f32 %v1855_v34, %v5234_v31  ;;  %v1857_v37 = vpop.f32.mrb[17].mxu0 }
 0x328   : > { %v1858_v38 = vadd.f32 %v1857_v37, %v5234_v31  ;;  %v1859_v36 = vpop.f32.mrb[18].mxu0 }
 0x329   : > { %v1984_v41 = vmax.f32 %v1856_v35, 0.0  ;;  %v1860_v42 = vpop.f32.mrb[19].mxu0  ;;  %v4285_v36 = vld [vmem:[%s6042_s7 + $0x1a4] ss:$8 sps:$4 sm:$0xff]  }
 0x32a   : > { %v1985_v43 = vmax.f32 %v1858_v38, 0.0  ;;  %v4282_v38 = vld [vmem:[%s6042_s7 + $0x194] ss:$8 sps:$4 sm:$0xff]  }
 0x32b   : > { %v5242_v44 = vmul.f32 %v1996_v61, %v1984_v41  ;;  %v4271_v61 = vld [vmem:[%s6042_s7 + $0x160] ss:$8 sps:$4 sm:$0xff]   ;;  %v4288_v42 = vld [vmem:[%s6042_s7 + $0x1b4] ss:$8 sps:$4 sm:$0xff]  }
 0x32c   : > { %v5244_v45 = vmul.f32 %v2000_v39, %v1985_v43  ;;  %2833 = vmatpush1.bf16.msra.mxu0 %v4271_v61  ;;  %v4280_v39 = vld [vmem:[%s6042_s7 + $0x190] ss:$8 sps:$4 sm:$0xff]   ;;  %v4283_v41 = vld [vmem:[%s6042_s7 + $0x1a0] ss:$8 sps:$4 sm:$0xff]  }
 0x32d   : > { %2834 = vmatprep.subr.bf16.mxu0 %v4276_v32  ;;  %v4286_v43 = vld [vmem:[%s6042_s7 + $0x1b0] ss:$8 sps:$4 sm:$0xff]   ;;  %v4364_v61 = vld [vmem:[%s6042_s7 + $0xa0] ss:$8 sps:$4 sm:$0xff]  }
 0x32e   : > { %v4185_v17 = vpack.i.bf16 %v5242_v44, %v5244_v45  ;;  %v4370_v32 = vld [vmem:[%s6042_s7 + $0xb0] ss:$8 sps:$4 sm:$0xff]  }
 0x330   : > { %2835 = vmatpush1.bf16.msra.mxu0 %v4274_v15  ;;  %v4378_v15 = vld [vmem:[%s6042_s7 + $0xc4] ss:$8 sps:$4 sm:$0xff]  }
 0x331   : > { %2836 = vmatprep.subr.bf16.mxu0 %v4279_v47  ;;  %v4376_v47 = vld [vmem:[%s6042_s7 + $0xc0] ss:$8 sps:$4 sm:$0xff]  }
 0x347   : > { %v1896_v52 = vpop.f32.mrb[0].mxu1 }
 0x348   : > { %v1897_v53 = vadd.f32 %v1896_v52, %v5234_v31  ;;  %v1898_v57 = vpop.f32.mrb[1].mxu1  ;;  %v4291_v52 = vld [vmem:[%s6042_s7 + $0x1c4] ss:$8 sps:$4 sm:$0xff]  }
 0x349   : > { %v1899_v58 = vadd.f32 %v1898_v57, %v5234_v31  ;;  %v1900_v59 = vpop.f32.mrb[2].mxu1  ;;  %v4292_v57 = vld [vmem:[%s6042_s7 + $0x1d0] ss:$8 sps:$4 sm:$0xff]  }
 0x34a   : > { %v1986_v54 = vmax.f32 %v1897_v53, 0.0  ;;  %v1901_v63 = vpop.f32.mrb[3].mxu1  ;;  %v4289_v53 = vld [vmem:[%s6042_s7 + $0x1c0] ss:$8 sps:$4 sm:$0xff]   ;;  %v4300_v59 = vld [vmem:[%s6042_s7 + $0x1f4] ss:$8 sps:$4 sm:$0xff]  }
 0x34b   : > { %v1987_v62 = vmax.f32 %v1899_v58, 0.0  ;;  %v4297_v58 = vld [vmem:[%s6042_s7 + $0x1e4] ss:$8 sps:$4 sm:$0xff]  }
 0x34c   : > { %v5254_v60 = vmul.f32 %v2004_v55, %v1986_v54  ;;  %v4294_v55 = vld [vmem:[%s6042_s7 + $0x1d4] ss:$8 sps:$4 sm:$0xff]   ;;  %v4298_v54 = vld [vmem:[%s6042_s7 + $0x1f0] ss:$8 sps:$4 sm:$0xff]  }
 0x34d   : > { %v5256_v14 = vmul.f32 %v2008_v51, %v1987_v62  ;;  %v4295_v51 = vld [vmem:[%s6042_s7 + $0x1e0] ss:$8 sps:$4 sm:$0xff]  }
 0x367   : > { %v1937_v13 = vpop.f32.mrb[20].mxu0 }
 0x368   : > { %v1938_v5 = vadd.f32 %v1937_v13, %v5234_v31  ;;  %v1939_v6 = vpop.f32.mrb[21].mxu0 }
 0x369   : > { %v1940_v7 = vadd.f32 %v1939_v6, %v5234_v31  ;;  %v1941_v8 = vpop.f32.mrb[22].mxu0 }
 0x36a   : > { %v1988_v9 = vmax.f32 %v1938_v5, 0.0  ;;  %v1942_v1 = vpop.f32.mrb[23].mxu0 }
 0x36b   : > { %v1989_v10 = vmax.f32 %v1940_v7, 0.0 }
 0x36c   : > { %v5266_v11 = vmul.f32 %v2012_v48, %v1988_v9 }
 0x36d   : > { %v5268_v12 = vmul.f32 %v2016_v49, %v1989_v10 }
 0x36e   : > { %v4170_v16 = vpack.i.bf16 %v5266_v11, %v5256_v14 }
 0x36f   : > { %v4175_v3 = vpack.i.bf16 %v5254_v60, %v5268_v12 }
 0x370   : > { %4171 = vrot.lane.b32.xlu1 %v4170_v16, %s6082_s17  ;;  %v4303_v16 = vld [vmem:[%s6042_s7 + $0x204] ss:$8 sps:$4 sm:$0xff]  }
 0x371   : > { %4176 = vrot.lane.b32.xlu0 %v4175_v3, %s6082_s17  ;;  %v4306_v3 = vld [vmem:[%s6042_s7 + $0x4] ss:$8 sps:$4 sm:$0xff]  }
 0x372   : > { %2779 = vmatprep.subr.bf16.mxu1 %v4306_v3 }
 0x382   : > { %v1978_v50 = vpop.f32.mrb[4].mxu1 }
 0x383   : > { %v1979_v27 = vadd.f32 %v1978_v50, %v5234_v31  ;;  %v4098_v29 = vpop.f32.mrb[5].mxu1  ;;  %v4277_v31 = vld [vmem:[%s6042_s7 + $0x180] ss:$8 sps:$4 sm:$0xff]   ;;  %v4342_v50 = vld [vmem:[%s6042_s7 + $0x64] ss:$8 sps:$4 sm:$0xff]  }
 0x384   : > { %v1981_v46 = vpop.f32.mrb[6].mxu1  ;;  %2837 = vmatpush1.bf16.msra.mxu0 %v4277_v31  ;;  %v4354_v29 = vld [vmem:[%s6042_s7 + $0x84] ss:$8 sps:$4 sm:$0xff]   ;;  %v4384_v31 = vld [vmem:[%s6042_s7 + $0xd4] ss:$8 sps:$4 sm:$0xff]  }
 0x385   : > { %v1990_v34 = vmax.f32 %v1979_v27, 0.0  ;;  %v4099_v35 = vpop.f32.mrb[7].mxu1  ;;  %2838 = vmatprep.subr.bf16.mxu0 %v4282_v38  ;;  %v4348_v27 = vld [vmem:[%s6042_s7 + $0x74] ss:$8 sps:$4 sm:$0xff]   ;;  %v4382_v38 = vld [vmem:[%s6042_s7 + $0xd0] ss:$8 sps:$4 sm:$0xff]  }
 0x386   : > { %v4360_v46 = vld [vmem:[%s6042_s7 + $0x94] ss:$8 sps:$4 sm:$0xff]   ;;  %v4366_v35 = vld [vmem:[%s6042_s7 + $0xa4] ss:$8 sps:$4 sm:$0xff]  }
 0x387   : > { %v2034_v37 = vmul.f32 %v2020_v28, %v1990_v34  ;;  %v4346_v28 = vld [vmem:[%s6042_s7 + $0x70] ss:$8 sps:$4 sm:$0xff]  }
 0x388   : > { %2839 = vmatpush1.bf16.msra.mxu0 %v4280_v39  ;;  %v4358_v34 = vld [vmem:[%s6042_s7 + $0x90] ss:$8 sps:$4 sm:$0xff]   ;;  %v4390_v39 = vld [vmem:[%s6042_s7 + $0xe4] ss:$8 sps:$4 sm:$0xff]  }
 0x389   : > { %2042 = vst.msk [vmem:[#allocation4 + $0x38] sm:$0xff] %vm1269_vm11, %v2034_v37  ;;  %2840 = vmatprep.subr.bf16.mxu0 %v4285_v36  ;;  %v4372_v37 = vld [vmem:[%s6042_s7 + $0xb4] ss:$8 sps:$4 sm:$0xff]   ;;  %v4388_v36 = vld [vmem:[%s6042_s7 + $0xe0] ss:$8 sps:$4 sm:$0xff]  }
 0x38a   : > { %2043 = vst.msk [vmem:[#allocation4 + $0x38] sm:$0xff] %vm1271_vm15, %v5185_v26 }
 0x38c   : > { %2841 = vmatpush1.bf16.msra.mxu0 %v4283_v41 }
 0x38d   : > { %2842 = vmatprep.subr.bf16.mxu0 %v4288_v42 }
 0x390   : > { %2843 = vmatpush1.bf16.msra.mxu0 %v4286_v43  ;;  %v4396_v43 = vld [vmem:[%s6042_s7 + $0xf4] ss:$8 sps:$4 sm:$0xff]  }
 0x391   : > { %2844 = vmatprep.subr.bf16.mxu0 %v4291_v52  ;;  %v5421_v18 = vld [vmem:[#allocation4 + $0x38] sm:$0xff] }
 0x394   : > { %2845 = vmatpush1.bf16.msra.mxu0 %v4289_v53 }
 0x395   : > { %2846 = vmatprep.subr.bf16.mxu0 %v4294_v55  ;;  %v4394_v55 = vld [vmem:[%s6042_s7 + $0xf0] ss:$8 sps:$4 sm:$0xff]  }
 0x398   : > { %2847 = vmatpush1.bf16.msra.mxu0 %v4292_v57 }
 0x399   : > { %2848 = vmatprep.subr.bf16.mxu0 %v4297_v58 }
 0x39c   : > { %2849 = vmatpush1.bf16.msra.mxu0 %v4295_v51 }
 0x39d   : > { %2850 = vmatprep.subr.bf16.mxu0 %v4300_v59 }
 0x3a0   : > { %2851 = vmatpush1.bf16.msra.mxu0 %v4298_v54 }
 0x3a1   : > { %2861 = vmatprep.subr.bf16.mxu0 %v4303_v16 }
 0x3e2   : > { %v4172_v63 = vpop.permute.xlu1 %4171 }
 0x3e3   : > { %v4174_v62 = vunpack.i.h.bf16 %v4172_v63  ;;  %v4173_v13 = vunpack.i.l.bf16 %v4172_v63  ;;  %v5379_v5 = vpop.permute.xlu0 %4176 }
 0x3e4   : > { %v4179_v48 = vunpack.i.h.bf16 %v5379_v5  ;;  %v4178_v6 = vunpack.i.l.bf16 %v5379_v5  ;;  %v4301_v5 = vld [vmem:[%s6042_s7 + $0x200] ss:$8 sps:$4 sm:$0xff]  }
 0x3e5   : > { %v2075_v7 = vsel %vm786_vm5, %v4173_v13, %v4174_v62 }
 0x3e6   : > { %v5385_v49 = vmax.f32 %v5256_v14, %v2075_v7  ;;  %v2074_v8 = vsel %vm786_vm5, %v4179_v48, %v4173_v13  ;;  %v2076_v9 = vsel %vm786_vm5, %v4174_v62, %v4178_v6  ;;  %v4304_v14 = vld [vmem:[%s6042_s7] ss:$8 sps:$4 sm:$0xff]  }
 0x3e7   : > { %v5394_v1 = vmax.f32 %v5254_v60, %v2074_v8  ;;  %v5397_v10 = vmax.f32 %v5266_v11, %v2076_v9  ;;  %v4312_v11 = vld [vmem:[%s6042_s7 + $0x14] ss:$8 sps:$4 sm:$0xff]   ;;  %2780 = vmatpush1.bf16.msra.mxu1 %v4304_v14 }
 0x3e8   : > { %2781 = vmatprep.subr.bf16.mxu1 %v4312_v11  ;;  %v4313_v11 = vld [vmem:[%s6042_s7 + $0x220] ss:$8 sps:$4 sm:$0xff]  }
 0x3e9   : > { %2103 = vrot.lane.b32.xlu0 %v5394_v1, %s6083_s16  ;;  %v4180_v60 = vpack.i.bf16 %v5397_v10, %v5385_v49 }
 0x3eb   : > { %4181 = vrot.lane.b32.xlu1 %v4180_v60, %s6083_s16  ;;  %2782 = vmatpush1.bf16.msra.mxu1 %v4310_v4  ;;  %v4319_v4 = vld [vmem:[%s6042_s7 + $0x230] ss:$8 sps:$4 sm:$0xff]  }
 0x3ec   : > { %2783 = vmatprep.subr.bf16.mxu1 %v4318_v2  ;;  %v4325_v2 = vld [vmem:[%s6042_s7 + $0x240] ss:$8 sps:$4 sm:$0xff]  }
 0x3ed   : > { %4186 = vrot.lane.b32.xlu0 %v4185_v17, %s6082_s17  ;;  %v4321_v17 = vld [vmem:[%s6042_s7 + $0x234] ss:$8 sps:$4 sm:$0xff]  }
 0x3ef   : > { %2070 = vrot.lane.b32.xlu1 %v5421_v18, %s6082_s17  ;;  %2784 = vmatpush1.bf16.msra.mxu1 %v4316_v0  ;;  %v4333_v0 = vld [vmem:[%s6042_s7 + $0x254] ss:$8 sps:$4 sm:$0xff]  }
 0x3f0   : > { %2785 = vmatprep.subr.bf16.mxu1 %v4324_v19  ;;  %v4331_v19 = vld [vmem:[%s6042_s7 + $0x250] ss:$8 sps:$4 sm:$0xff]  }
 0x3f3   : > { %2786 = vmatpush1.bf16.msra.mxu1 %v4322_v21  ;;  %v4339_v21 = vld [vmem:[%s6042_s7 + $0x264] ss:$8 sps:$4 sm:$0xff]  }
 0x3f4   : > { %2787 = vmatprep.subr.bf16.mxu1 %v4330_v20  ;;  %v4337_v20 = vld [vmem:[%s6042_s7 + $0x260] ss:$8 sps:$4 sm:$0xff]  }
 0x3f7   : > { %2788 = vmatpush1.bf16.msra.mxu1 %v4328_v22  ;;  %v4345_v22 = vld [vmem:[%s6042_s7 + $0x274] ss:$8 sps:$4 sm:$0xff]  }
 0x3f8   : > { %2789 = vmatprep.subr.bf16.mxu1 %v4336_v23  ;;  %v4343_v23 = vld [vmem:[%s6042_s7 + $0x270] ss:$8 sps:$4 sm:$0xff]  }
 0x3fb   : > { %2790 = vmatpush1.bf16.msra.mxu1 %v4334_v24  ;;  %v4351_v24 = vld [vmem:[%s6042_s7 + $0x284] ss:$8 sps:$4 sm:$0xff]  }
 0x3fc   : > { %2791 = vmatprep.subr.bf16.mxu1 %v4342_v50  ;;  %v4349_v50 = vld [vmem:[%s6042_s7 + $0x280] ss:$8 sps:$4 sm:$0xff]  }
 0x3ff   : > { %2792 = vmatpush1.bf16.msra.mxu1 %v4340_v25  ;;  %v4357_v25 = vld [vmem:[%s6042_s7 + $0x294] ss:$8 sps:$4 sm:$0xff]  }
 0x400   : > { %2793 = vmatprep.subr.bf16.mxu1 %v4348_v27  ;;  %v4355_v27 = vld [vmem:[%s6042_s7 + $0x290] ss:$8 sps:$4 sm:$0xff]  }
 0x403   : > { %2794 = vmatpush1.bf16.msra.mxu1 %v4346_v28  ;;  %v4363_v28 = vld [vmem:[%s6042_s7 + $0x2a4] ss:$8 sps:$4 sm:$0xff]  }
 0x404   : > { %2795 = vmatprep.subr.bf16.mxu1 %v4354_v29  ;;  %v4361_v29 = vld [vmem:[%s6042_s7 + $0x2a0] ss:$8 sps:$4 sm:$0xff]  }
 0x407   : > { %2796 = vmatpush1.bf16.msra.mxu1 %v4352_v30  ;;  %v4369_v30 = vld [vmem:[%s6042_s7 + $0x2b4] ss:$8 sps:$4 sm:$0xff]  }
 0x408   : > { %2797 = vmatprep.subr.bf16.mxu1 %v4360_v46  ;;  %v4367_v46 = vld [vmem:[%s6042_s7 + $0x2b0] ss:$8 sps:$4 sm:$0xff]  }
 0x40b   : > { %2798 = vmatpush1.bf16.msra.mxu1 %v4358_v34  ;;  %v4375_v34 = vld [vmem:[%s6042_s7 + $0x2c4] ss:$8 sps:$4 sm:$0xff]  }
 0x40c   : > { %2799 = vmatprep.subr.bf16.mxu1 %v4366_v35  ;;  %v4373_v35 = vld [vmem:[%s6042_s7 + $0x2c0] ss:$8 sps:$4 sm:$0xff]  }
 0x40f   : > { %2800 = vmatpush1.bf16.msra.mxu1 %v4364_v61  ;;  %v4381_v61 = vld [vmem:[%s6042_s7 + $0x2d4] ss:$8 sps:$4 sm:$0xff]  }
 0x410   : > { %2801 = vmatprep.subr.bf16.mxu1 %v4372_v37  ;;  %v4379_v37 = vld [vmem:[%s6042_s7 + $0x2d0] ss:$8 sps:$4 sm:$0xff]  }
 0x413   : > { %2802 = vmatpush1.bf16.msra.mxu1 %v4370_v32  ;;  %v4387_v32 = vld [vmem:[%s6042_s7 + $0x2e4] ss:$8 sps:$4 sm:$0xff]  }
 0x414   : > { %2803 = vmatprep.subr.bf16.mxu1 %v4378_v15  ;;  %v4385_v15 = vld [vmem:[%s6042_s7 + $0x2e0] ss:$8 sps:$4 sm:$0xff]  }
 0x417   : > { %2804 = vmatpush1.bf16.msra.mxu1 %v4376_v47  ;;  %v4393_v47 = vld [vmem:[%s6042_s7 + $0x2f4] ss:$8 sps:$4 sm:$0xff]  }
 0x418   : > { %2805 = vmatprep.subr.bf16.mxu1 %v4384_v31  ;;  %v4391_v31 = vld [vmem:[%s6042_s7 + $0x2f0] ss:$8 sps:$4 sm:$0xff]  }
 0x41b   : > { %2806 = vmatpush1.bf16.msra.mxu1 %v4382_v38  ;;  %v4399_v38 = vld [vmem:[%s6042_s7 + $0x304] ss:$8 sps:$4 sm:$0xff]  }
 0x41c   : > { %2807 = vmatprep.subr.bf16.mxu1 %v4390_v39 }
 0x41f   : > { %2808 = vmatpush1.bf16.msra.mxu1 %v4388_v36 }
 0x420   : > { %2809 = vmatprep.subr.bf16.mxu1 %v4396_v43 }
 0x423   : > { %2810 = vmatpush1.bf16.msra.mxu1 %v4394_v55 }
 0x45b   : > { %v5504_v41 = vpop.permute.xlu0 %2103 }
 0x45d   : > { %v5506_v42 = vpop.permute.xlu1 %4181 }
 0x45e   : > { %v4184_v52 = vunpack.i.h.bf16 %v5506_v42  ;;  %v4183_v53 = vunpack.i.l.bf16 %v5506_v42 }
 0x45f   : > { %v4187_v57 = vpop.permute.xlu0 %4186 }
 0x460   : > { %v2115_v58 = vsel %vm902_vm7, %v5504_v41, %v4183_v53  ;;  %v4189_v51 = vunpack.i.h.bf16 %v4187_v57  ;;  %v4188_v59 = vunpack.i.l.bf16 %v4187_v57  ;;  %v2116_v54 = vsel %vm902_vm7, %v4183_v53, %v4184_v52 }
 0x461   : > { %v2128_v63 = vmax.f32 %v5394_v1, %v2115_v58  ;;  %v2071_v62 = vpop.permute.xlu1 %2070  ;;  %v2129_v13 = vmax.f32 %v5385_v49, %v2116_v54 }
 0x462   : > { %v2072_v7 = vsel %vm786_vm5, %v4189_v51, %v4188_v59  ;;  %v2073_v8 = vsel %vm786_vm5, %v4188_v59, %v4179_v48  ;;  %v2077_v9 = vsel %vm786_vm5, %v4178_v6, %v2071_v62  ;;  %v5531_v16 = vmax.f32 %v5421_v18, %v2071_v62  ;;  %v4315_v6 = vld [vmem:[%s6042_s7 + $0x224] ss:$8 sps:$4 sm:$0xff]  }
 0x463   : > { %v5534_v14 = vmax.f32 %v5242_v44, %v2072_v7  ;;  %v5537_v1 = vmax.f32 %v5244_v45, %v2073_v8  ;;  %v5540_v49 = vmax.f32 %v5268_v12, %v2077_v9  ;;  %v2136_v3 = vpack.c.bf16 %v2129_v13, %v2129_v13  ;;  %v4309_v45 = vld [vmem:[%s6042_s7 + $0x214] ss:$8 sps:$4 sm:$0xff]   ;;  %v4307_v12 = vld [vmem:[%s6042_s7 + $0x210] ss:$8 sps:$4 sm:$0xff]   ;;  %v4327_v18 = vld [vmem:[%s6042_s7 + $0x244] ss:$8 sps:$4 sm:$0xff]  }
 0x464   : > { %v2135_v60 = vpack.c.bf16 %v2128_v63, %v2128_v63 }
 0x465   : > { %v4190_v48 = vpack.i.bf16 %v5531_v16, %v5540_v49  ;;  %2852 = vmatprep.mubr.bf16.mxu0 %v2136_v3  ;;  %v4195_v44 = vpack.i.bf16 %v5534_v14, %v5537_v1 }
 0x466   : > { %2853 = vmatmul.mubr.bf16.vlgmr.msra.gmra.mrb[24].mxu0 %v2135_v60  ;;  %v2244_v60 = vld [vmem:[%s6042_s7 + $0x340] sm:$0xff] }
 0x467   : > { %4191 = vrot.lane.b32.xlu1 %v4190_v48, %s6083_s16  ;;  %4196 = vrot.lane.b32.xlu0 %v4195_v44, %s6083_s16  ;;  %v4038_v48 = vcombine.high %v2244_v60, %v2244_v60  ;;  %v4037_v44 = vcombine.low %v2244_v60, %v2244_v60  ;;  %s4435_s16 = sshll.u32 %s4513_s22, 4  ;;  %s4436_s16 = int_to_ptr.vmem [resolvable:$false] %s4435_s16 }
 0x468   : > { %2862 = vmatpush1.bf16.msra.mxu0 %v4301_v5  ;;  %v4406_v5 = vld [vmem:[%s6042_s7 + $0x330] ss:$8 sps:$4 sm:$0xff]   ;;  %s4437_s20 = scalar_lea.vmem %s4436_s16, 512 }
 0x469   : > { %2863 = vmatprep.subr.bf16.mxu0 %v4309_v45 }
 0x46b   : > { %2955 = vrot.lane.b32.xlu1 %v5185_v26, %s4507_s2  ;;  %2974 = vrot.lane.b32.xlu0 %v5185_v26, %s4509_s27 }
 0x46c   : > { %2864 = vmatpush1.bf16.msra.mxu0 %v4307_v12  ;;  %v2774_v12 = vsel %vm1799_vm0, %v4037_v44, 0 }
 0x46d   : > { %2865 = vmatprep.subr.bf16.mxu0 %v4315_v6 }
 0x46f   : > { %2993 = vrot.lane.b32.xlu1 %v5185_v26, %s4508_s3  ;;  %3012 = vrot.lane.b32.xlu0 %v5185_v26, %s6081_s26 }
 0x470   : > { %2866 = vmatpush1.bf16.msra.mxu0 %v4313_v11 }
 0x471   : > { %2867 = vmatprep.subr.bf16.mxu0 %v4321_v17 }
 0x474   : > { %2868 = vmatpush1.bf16.msra.mxu0 %v4319_v4 }
 0x475   : > { %2869 = vmatprep.subr.bf16.mxu0 %v4327_v18 }
 0x478   : > { %2870 = vmatpush1.bf16.msra.mxu0 %v4325_v2 }
 0x479   : > { %2871 = vmatprep.subr.bf16.mxu0 %v4333_v0 }
 0x47c   : > { %2872 = vmatpush1.bf16.msra.mxu0 %v4331_v19 }
 0x47d   : > { %2873 = vmatprep.subr.bf16.mxu0 %v4339_v21 }
 0x480   : > { %2874 = vmatpush1.bf16.msra.mxu0 %v4337_v20 }
 0x481   : > { %2875 = vmatprep.subr.bf16.mxu0 %v4345_v22 }
 0x484   : > { %2876 = vmatpush1.bf16.msra.mxu0 %v4343_v23  ;;  %v3113_v23 = vld [vmem:[%s6044_s9] sm:$0xff] }
 0x485   : > { %2877 = vmatprep.subr.bf16.mxu0 %v4351_v24 }
 0x488   : > { %2878 = vmatpush1.bf16.msra.mxu0 %v4349_v50 }
 0x489   : > { %2879 = vmatprep.subr.bf16.mxu0 %v4357_v25 }
 0x48c   : > { %2880 = vmatpush1.bf16.msra.mxu0 %v4355_v27 }
 0x48d   : > { %2881 = vmatprep.subr.bf16.mxu0 %v4363_v28 }
 0x490   : > { %2882 = vmatpush1.bf16.msra.mxu0 %v4361_v29 }
 0x491   : > { %2883 = vmatprep.subr.bf16.mxu0 %v4369_v30 }
 0x494   : > { %2884 = vmatpush1.bf16.msra.mxu0 %v4367_v46 }
 0x495   : > { %2885 = vmatprep.subr.bf16.mxu0 %v4375_v34 }
 0x498   : > { %2886 = vmatpush1.bf16.msra.mxu0 %v4373_v35 }
 0x499   : > { %2887 = vmatprep.subr.bf16.mxu0 %v4381_v61 }
 0x49c   : > { %2888 = vmatpush1.bf16.msra.mxu0 %v4379_v37 }
 0x49d   : > { %2889 = vmatprep.subr.bf16.mxu0 %v4387_v32 }
 0x4a0   : > { %2890 = vmatpush1.bf16.msra.mxu0 %v4385_v15 }
 0x4a1   : > { %2891 = vmatprep.subr.bf16.mxu0 %v4393_v47 }
 0x4a4   : > { %2892 = vmatpush1.bf16.msra.mxu0 %v4391_v31 }
 0x4a5   : > { %2902 = vmatprep.subr.bf16.mxu0 %v4399_v38 }
 0x4d9   : > { %v4192_v39 = vpop.permute.xlu1 %4191  ;;  %v4197_v36 = vpop.permute.xlu0 %4196 }
 0x4da   : > { %v4194_v43 = vunpack.i.h.bf16 %v4192_v39  ;;  %v4193_v53 = vunpack.i.l.bf16 %v4192_v39  ;;  %v4199_v55 = vunpack.i.h.bf16 %v4197_v36  ;;  %v4198_v57 = vunpack.i.l.bf16 %v4197_v36 }
 0x4dc   : > { %v2117_v58 = vsel %vm902_vm7, %v4184_v52, %v4193_v53  ;;  %v2113_v51 = vsel %vm902_vm7, %v4199_v55, %v4198_v57  ;;  %v2114_v59 = vsel %vm902_vm7, %v4198_v57, %v5504_v41  ;;  %v2118_v13 = vsel %vm902_vm7, %v4193_v53, %v4194_v43  ;;  %v4397_v52 = vld [vmem:[%s6042_s7 + $0x300] ss:$8 sps:$4 sm:$0xff]   ;;  %v4400_v41 = vld [vmem:[%s6042_s7 + $0x310] ss:$8 sps:$4 sm:$0xff]  }
 0x4dd   : > { %v2130_v54 = vmax.f32 %v5397_v10, %v2117_v58  ;;  %v2126_v63 = vmax.f32 %v5534_v14, %v2113_v51  ;;  %v2127_v62 = vmax.f32 %v5537_v1, %v2114_v59  ;;  %v2131_v7 = vmax.f32 %v5540_v49, %v2118_v13  ;;  %v4402_v10 = vld [vmem:[%s6042_s7 + $0x314] ss:$8 sps:$4 sm:$0xff]   ;;  %v4405_v14 = vld [vmem:[%s6042_s7 + $0x324] ss:$8 sps:$4 sm:$0xff]   ;;  %v4403_v1 = vld [vmem:[%s6042_s7 + $0x320] ss:$8 sps:$4 sm:$0xff]   ;;  %v2956_v24 = vpop.permute.xlu1 %2955  ;;  %v2975_v25 = vpop.permute.xlu0 %2974 }
 0x4de   : > { %v4408_v49 = vld [vmem:[%s6042_s7 + $0x334] ss:$8 sps:$4 sm:$0xff]   ;;  %v2132_v45 = vmax.f32 %v5531_v16, %v4194_v43  ;;  %vm2999_vm7 = vcmask 121856  }
 0x4df   : > { %v2134_v8 = vpack.c.bf16 %v2127_v62, %v2127_v62  ;;  %v2133_v9 = vpack.c.bf16 %v2126_v63, %v2126_v63  ;;  %v2137_v42 = vpack.c.bf16 %v2130_v54, %v2130_v54  ;;  %v2138_v3 = vpack.c.bf16 %v2131_v7, %v2131_v7 }
 0x4e0   : > { %v2139_v6 = vpack.c.bf16 %v2132_v45, %v2132_v45 }
 0x4e1   : > { %2811 = vmatprep.mubr.bf16.mxu1 %v2134_v8  ;;  %2893 = vmatprep.mubr.bf16.mxu0 %v2138_v3  ;;  %v2994_v50 = vpop.permute.xlu1 %2993  ;;  %v3013_v29 = vpop.permute.xlu0 %3012 }
 0x4e2   : > { %2812 = vmatmul.mubr.bf16.vlgmr.msra.gmra.mrb[8].mxu1 %v2133_v9  ;;  %2894 = vmatmul.mubr.bf16.vlgmr.msra.gmra.mrb[24].mxu0 %v2137_v42 }
 0x4e3   : > { %3171 = vmatprep.mubr.bf16.mxu1 %v4503_v56  ;;  %2903 = vmatpush1.bf16.msra.mxu0 %v4397_v52 }
 0x4e4   : > { %2934 = vmatprep.mubr.bf16.mxu0 %v4503_v56  ;;  %2904 = vmatprep.subr.bf16.mxu0 %v4402_v10 }
 0x4e7   : > { %2905 = vmatpush1.bf16.msra.mxu0 %v4400_v41 }
 0x4e8   : > { %2906 = vmatprep.subr.bf16.mxu0 %v4405_v14 }
 0x4eb   : > { %2907 = vmatpush1.bf16.msra.mxu0 %v4403_v1 }
 0x4ec   : > { %2908 = vmatprep.subr.bf16.mxu0 %v4408_v49 }
 0x4ef   : > { %2909 = vmatpush1.bf16.msra.mxu0 %v4406_v5 }
 0x4f0   : > { %4039 = vmatprep.subr.msk.bf16.mxu0 %vm1799_vm0, %v4038_v48 }
 0x4f3   : > { %2911 = vmatpush1.bf16.msra.mxu0 %v2774_v12 }
 0x4f6   : > { %4040 = vmatmul.mubr.msk.bf16.vlgmr.msra.gmra.mrb[24].mxu0 %vm1269_vm11, %v2139_v6 }
 0x5b5   : > { %v2813_v16 = vpop.f32.mrb[8].mxu1 }
 0x5b6   : > { %v2815_v11 = vpop.f32.mrb[9].mxu1 }
 0x5b7   : > { %v2817_v17 = vpop.f32.mrb[10].mxu1 }
 0x5b8   : > { %v2818_v4 = vpop.f32.mrb[11].mxu1 }
 0x5c9   : > { %v2936_v18 = vpop.f32.mrb[24].mxu0 }
 0x5ca   : > { %v5693_v2 = vadd.f32 %v2936_v18, %v2813_v16  ;;  %v2938_v0 = vpop.f32.mrb[25].mxu0  ;;  %v4411_v18 = vld [vmem:[%s6043_s8] sm:$0xff]  }
 0x5cb   : > { %v4101_v19 = vadd.f32 %v2938_v0, %v2815_v11  ;;  %v2940_v21 = vpop.f32.mrb[26].mxu0 }
 0x5cc   : > { %v2941_v20 = vpop.f32.mrb[27].mxu0  ;;  %2957 = vrot.lane.b32.xlu1 %v5693_v2, %s4507_s2  ;;  %v3186_v21 = vld [vmem:[%s6045_s10] sm:$0x3] }
 0x5cd   : > { %2946 = vst.msk [vmem:[#allocation6 + $0x10] sm:$0xff] %vm2945_vm1, %v4101_v19 }
 0x5ce   : > { %2948 = vst.msk [vmem:[#allocation6 + $0x10] sm:$0xff] %vm2947_vm2, %v5185_v26  ;;  %v3114_v26 = vld [vmem:[%s6044_s9 + $0x8] sm:$0xff] }
 0x5d0   : > { %2976 = vrot.lane.b32.xlu1 %v5693_v2, %s4509_s27 }
 0x5d4   : > { %2995 = vrot.lane.b32.xlu1 %v5693_v2, %s4508_s3 }
 0x5d5   : > { %v3025_v22 = vld [vmem:[#allocation6 + $0x10] sm:$0xff] }
 0x5d6   : > { %3027 = vst.msk [vmem:[#allocation8 + $0x48] sm:$0xff] %vm2945_vm1, %v3025_v22  ;;  %2959 = vrot.lane.b32.xlu0 %v3025_v22, %s4507_s2 }
 0x5d8   : > { %3014 = vrot.lane.b32.xlu1 %v5693_v2, %s6081_s26 }
 0x5da   : > { %2978 = vrot.lane.b32.xlu0 %v3025_v22, %s4509_s27 }
 0x5dc   : > { %3032 = vrot.lane.b32.xlu1 %v5693_v2, %s6082_s17 }
 0x5dd   : > { %v3094_v3 = vld [vmem:[#allocation8 + $0x48] sm:$0xff] }
 0x5de   : > { %2997 = vrot.lane.b32.xlu0 %v3025_v22, %s4508_s3 }
 0x5e0   : > { %3045 = vrot.lane.b32.xlu1 %v5693_v2, %s4510_s1 }
 0x5e2   : > { %3016 = vrot.lane.b32.xlu0 %v3025_v22, %s6081_s26 }
 0x5e4   : > { %3059 = vrot.lane.b32.xlu1 %v5693_v2, %s4511_s30 }
 0x5e6   : > { %3034 = vrot.lane.b32.xlu0 %v3025_v22, %s6082_s17 }
 0x5e8   : > { %3073 = vrot.lane.b32.xlu1 %v5693_v2, %s4512_s23 }
 0x5ea   : > { %3047 = vrot.lane.b32.xlu0 %v3025_v22, %s4510_s1 }
 0x5ec   : > { %3117 = vperm.xlu1 %4200, %v3113_v23  }
 0x5ee   : > { %3061 = vrot.lane.b32.xlu0 %v3025_v22, %s4511_s30 }
 0x5f2   : > { %3075 = vrot.lane.b32.xlu0 %v3025_v22, %s4512_s23 }
 0x5f6   : > { %3122 = vperm.xlu0 %4169, %v3114_v26   ;;  %v3191_v26 = vrot.slane %v3186_v21, %v4967_v33 }
 0x63e   : > { %v2958_v27 = vpop.permute.xlu1 %2957 }
 0x63f   : > { %v2962_v28 = vsel %vm2961_vm3, %v2956_v24, %v2958_v27 }
 0x642   : > { %v2977_v30 = vpop.permute.xlu1 %2976 }
 0x643   : > { %v2981_v46 = vsel %vm2980_vm6, %v2975_v25, %v2977_v30  ;;  %v3195_v25 = vrot.slane %v3186_v21, %v4977_v40 }
 0x644   : > { %v3103_v51 = vpack.c.bf16 %v2981_v46, %v2962_v28 }
 0x646   : > { %v2996_v34 = vpop.permute.xlu1 %2995 }
 0x647   : > { %v3000_v35 = vsel %vm2999_vm7, %v2994_v50, %v2996_v34 }
 0x648   : > { %v2960_v61 = vpop.permute.xlu0 %2959 }
 0x649   : > { %v2963_v37 = vsel %vm2961_vm3, %v2958_v27, %v2960_v61 }
 0x64a   : > { %2967 = vst.msk [vmem:[#allocation8 + $0x8] sm:$0xff] %vm2945_vm1, %v2963_v37  ;;  %v3015_v32 = vpop.permute.xlu1 %3014 }
 0x64b   : > { %v3018_v15 = vsel %vm707_vm4, %v3013_v29, %v3015_v32 }
 0x64c   : > { %v2979_v47 = vpop.permute.xlu0 %2978  ;;  %v3105_v52 = vpack.c.bf16 %v3018_v15, %v3000_v35 }
 0x64d   : > { %v2982_v31 = vsel %vm2980_vm6, %v2977_v30, %v2979_v47 }
 0x64e   : > { %2986 = vst.msk [vmem:[#allocation8 + $0x18] sm:$0xff] %vm2945_vm1, %v2982_v31  ;;  %v3033_v36 = vpop.permute.xlu1 %3032 }
 0x650   : > { %v2998_v38 = vpop.permute.xlu0 %2997 }
 0x651   : > { %v3001_v39 = vsel %vm2999_vm7, %v2996_v34, %v2998_v38  ;;  %v3086_v55 = vld [vmem:[#allocation8 + $0x8] sm:$0xff] }
 0x652   : > { %3005 = vst.msk [vmem:[#allocation8 + $0x28] sm:$0xff] %vm2945_vm1, %v3001_v39  ;;  %v3046_v54 = vpop.permute.xlu1 %3045 }
 0x654   : > { %v3017_v43 = vpop.permute.xlu0 %3016 }
 0x655   : > { %v3019_v53 = vsel %vm707_vm4, %v3015_v32, %v3017_v43  ;;  %v3088_v57 = vld [vmem:[#allocation8 + $0x18] sm:$0xff]  ;;  %v3522_v43 = vld [vmem:[%s6047_s12] sm:$0xff] }
 0x656   : > { %3023 = vst.msk [vmem:[#allocation8 + $0x38] sm:$0xff] %vm2945_vm1, %v3019_v53  ;;  %v3104_v58 = vpack.c.bf16 %v3088_v57, %v3086_v55  ;;  %v3060_v9 = vpop.permute.xlu1 %3059  ;;  %v3523_v53 = vld [vmem:[%s6047_s12 + $0x8] sm:$0xff] }
 0x658   : > { %3139 = vmatprep.subr.bf16.mxu1 %v3104_v58  ;;  %v3035_v59 = vpop.permute.xlu0 %3034 }
 0x659   : > { %v3036_v63 = vsel %vm786_vm5, %v3033_v36, %v3035_v59  ;;  %3040 = vst.msk [vmem:[#allocation8 + $0x58] sm:$0xff] %vm2945_vm1, %v3035_v59  ;;  %3140 = vmatpush1.bf16.msra.mxu1 %v3103_v51  ;;  %v3090_v7 = vld [vmem:[#allocation8 + $0x28] sm:$0xff] }
 0x65a   : > { %v3107_v49 = vpack.c.bf16 %v3036_v63, %v5693_v2  ;;  %v3074_v60 = vpop.permute.xlu1 %3073  ;;  %v5756_v2 = vld [vmem:[#allocation4] sm:$0xff] }
 0x65b   : > { %v4201_v0 = vpack.i.bf16 %v5756_v2, %v5756_v2  ;;  %v4412_v36 = vld [vmem:[%s6046_s11 + $0x4] ss:$8 sps:$4 sm:$0xff]  }
 0x65c   : > { %v3048_v62 = vpop.permute.xlu0 %3047 }
 0x65d   : > { %v3050_v13 = vsel %vm3049_vm8, %v3046_v54, %v3048_v62  ;;  %3054 = vst.msk [vmem:[#allocation8 + $0x68] sm:$0xff] %vm2945_vm1, %v3048_v62  ;;  %v3092_v8 = vld [vmem:[#allocation8 + $0x38] sm:$0xff]  ;;  %4202 = vrot.lane.b32.xlu1 %v4201_v0, %s4507_s2  ;;  %4207 = vrot.lane.b32.xlu0 %v4201_v0, %s4509_s27 }
 0x65e   : > { %v3106_v42 = vpack.c.bf16 %v3092_v8, %v3090_v7 }
 0x660   : > { %3141 = vmatprep.subr.bf16.mxu1 %v3106_v42  ;;  %v3062_v10 = vpop.permute.xlu0 %3061  ;;  %v3096_v41 = vld [vmem:[#allocation8 + $0x58] sm:$0xff] }
 0x661   : > { %v3064_v14 = vsel %vm3063_vm9, %v3060_v9, %v3062_v10  ;;  %3068 = vst.msk [vmem:[#allocation8 + $0x78] sm:$0xff] %vm2945_vm1, %v3062_v10  ;;  %3142 = vmatpush1.bf16.msra.mxu1 %v3105_v52  ;;  %v3108_v1 = vpack.c.bf16 %v3096_v41, %v3094_v3  ;;  %4212 = vrot.lane.b32.xlu1 %v4201_v0, %s4508_s3 }
 0x662   : > { %v3109_v6 = vpack.c.bf16 %v3064_v14, %v3050_v13  ;;  %4217 = vrot.lane.b32.xlu0 %v4201_v0, %s6081_s26 }
 0x663   : > { %3143 = vmatprep.subr.bf16.mxu1 %v3108_v1 }
 0x664   : > { %v3076_v5 = vpop.permute.xlu0 %3075  ;;  %v3098_v44 = vld [vmem:[#allocation8 + $0x68] sm:$0xff] }
 0x665   : > { %v3078_v48 = vsel %vm3077_vm10, %v3074_v60, %v3076_v5  ;;  %3082 = vst.msk [vmem:[#allocation8 + $0x88] sm:$0xff] %vm2945_vm1, %v3076_v5  ;;  %3144 = vmatpush1.bf16.msra.mxu1 %v3107_v49 }
 0x666   : > { %v3111_v16 = vpack.c.bf16 %v3078_v48, %v3078_v48 }
 0x668   : > { %v3100_v45 = vld [vmem:[#allocation8 + $0x78] sm:$0xff]  ;;  %v3134_v4 = vsel %vm1799_vm0, %v3111_v16, 0 }
 0x669   : > { %v3110_v12 = vpack.c.bf16 %v3100_v45, %v3098_v44 }
 0x66b   : > { %3145 = vmatprep.subr.bf16.mxu1 %v3110_v12  ;;  %v3118_v19 = vpop.permute.xlu1 %3117 }
 0x66c   : > { %3146 = vmatpush1.bf16.msra.mxu1 %v3109_v6  ;;  %v3102_v11 = vld [vmem:[#allocation8 + $0x88] sm:$0xff] }
 0x66d   : > { %v3112_v17 = vpack.c.bf16 %v3102_v11, %v3102_v11 }
 0x66f   : > { %4042 = vmatprep.subr.msk.bf16.mxu1 %vm1799_vm0, %v3112_v17 }
 0x670   : > { %3148 = vmatpush1.bf16.msra.mxu1 %v3134_v4 }
 0x673   : > { %4043 = vmatmul.mubr.msk.bf16.vlgmr.msra.gmra.mrb[12].mxu1 %vm1269_vm11, %v4411_v18 }
 0x674   : > { %4046 = vmatprep.mubr.msk.bf16.mxu1 %vm2980_vm6, %v4412_v36 }
 0x675   : > { %v3123_v24 = vpop.permute.xlu0 %3122 }
 0x6cf   : > { %v4203_v55 = vpop.permute.xlu1 %4202  ;;  %v4208_v57 = vpop.permute.xlu0 %4207 }
 0x6d0   : > { %v4204_v59 = vunpack.i.l.bf16 %v4203_v55  ;;  %v4209_v54 = vunpack.i.l.bf16 %v4208_v57  ;;  %v4205_v1 = vunpack.i.h.bf16 %v4203_v55  ;;  %v4210_v5 = vunpack.i.h.bf16 %v4208_v57 }
 0x6d3   : > { %v4213_v58 = vpop.permute.xlu1 %4212 }
 0x6d4   : > { %v4218_v51 = vpop.permute.xlu0 %4217  ;;  %v4214_v13 = vunpack.i.l.bf16 %v4213_v58  ;;  %v4215_v11 = vunpack.i.h.bf16 %v4213_v58 }
 0x6d5   : > { %v4219_v9 = vunpack.i.l.bf16 %v4218_v51  ;;  %v4220_v18 = vunpack.i.h.bf16 %v4218_v51 }
 0x746   : > { %v3173_v20 = vpop.f32.mrb[12].mxu1 }
 0x747   : > { %v3174_v22 = vadd.f32 %v3173_v20, %v3118_v19  ;;  %v3175_v23 = vpop.f32.mrb[13].mxu1 }
 0x748   : > { %v3176_v50 = vadd.f32 %v3175_v23, %v3118_v19  ;;  %v3177_v27 = vpop.f32.mrb[14].mxu1 }
 0x749   : > { %v3182_v28 = vmax.f32 %v3174_v22, 0.0  ;;  %v3178_v29 = vadd.f32 %v3177_v27, %v3123_v24  ;;  %v3179_v30 = vpop.f32.mrb[15].mxu1 }
 0x74a   : > { %v3183_v46 = vmax.f32 %v3176_v50, 0.0  ;;  %v3180_v34 = vadd.f32 %v3179_v30, %v3123_v24 }
 0x74b   : > { %v5769_v35 = vmul.f32 %v3191_v26, %v3182_v28  ;;  %v3184_v61 = vmax.f32 %v3178_v29, 0.0 }
 0x74c   : > { %v3199_v37 = vmul.f32 %v3195_v25, %v3183_v46  ;;  %v3185_v32 = vmax.f32 %v3180_v34, 0.0 }
 0x74d   : > { %v5771_v15 = vmul.f32 %v3191_v26, %v3184_v61  ;;  %3260 = vrot.lane.b32.xlu0 %v5769_v35, %s4509_s27  ;;  %3224 = vrot.lane.b32.xlu1 %v5769_v35, %s4507_s2 }
 0x74e   : > { %3205 = vst.msk [vmem:[#allocation7 + $0x10] sm:$0xff] %vm2945_vm1, %v3199_v37  ;;  %v3201_v47 = vmul.f32 %v3195_v25, %v3185_v32 }
 0x74f   : > { %3208 = vst.msk [vmem:[#allocation7 + $0x10] sm:$0xff] %vm2947_vm2, %v5756_v2  ;;  %v3512_v31 = vpack.c.bf16 %v5771_v15, %v5769_v35 }
 0x750   : > { %3207 = vst.msk [vmem:[#allocation7 + $0x28] sm:$0xff] %vm2945_vm1, %v3201_v47 }
 0x751   : > { %3209 = vst.msk [vmem:[#allocation7 + $0x28] sm:$0xff] %vm2947_vm2, %v5756_v2  ;;  %3332 = vrot.lane.b32.xlu0 %v5769_v35, %s6081_s26  ;;  %3296 = vrot.lane.b32.xlu1 %v5769_v35, %s4508_s3 }
 0x755   : > { %3370 = vrot.lane.b32.xlu1 %v5769_v35, %s6082_s17 }
 0x756   : > { %v3212_v38 = vld [vmem:[#allocation7 + $0x10] sm:$0xff] }
 0x757   : > { %3226 = vrot.lane.b32.xlu0 %v3212_v38, %s4507_s2  ;;  %3359 = vst.msk [vmem:[#allocation10 + $0x88] sm:$0xff] %vm2945_vm1, %v3212_v38 }
 0x758   : > { %v3215_v39 = vld [vmem:[#allocation7 + $0x28] sm:$0xff] }
 0x759   : > { %3230 = vrot.lane.b32.xlu1 %v5771_v15, %s4507_s2  ;;  %3361 = vst.msk [vmem:[#allocation10 + $0x98] sm:$0xff] %vm2945_vm1, %v3215_v39 }
 0x75b   : > { %3266 = vrot.lane.b32.xlu0 %v5771_v15, %s4509_s27 }
 0x75d   : > { %3262 = vrot.lane.b32.xlu1 %v3212_v38, %s4509_s27 }
 0x75f   : > { %3298 = vrot.lane.b32.xlu0 %v3212_v38, %s4508_s3 }
 0x761   : > { %3302 = vrot.lane.b32.xlu1 %v5771_v15, %s4508_s3 }
 0x763   : > { %3338 = vrot.lane.b32.xlu0 %v5771_v15, %s6081_s26 }
 0x765   : > { %3334 = vrot.lane.b32.xlu1 %v3212_v38, %s6081_s26 }
 0x767   : > { %3232 = vrot.lane.b32.xlu0 %v3215_v39, %s4507_s2 }
 0x769   : > { %3268 = vrot.lane.b32.xlu1 %v3215_v39, %s4509_s27 }
 0x76b   : > { %3372 = vrot.lane.b32.xlu0 %v3212_v38, %s6082_s17 }
 0x76d   : > { %3374 = vrot.lane.b32.xlu1 %v5771_v15, %s6082_s17 }
 0x76f   : > { %3304 = vrot.lane.b32.xlu0 %v3215_v39, %s4508_s3  ;;  %s5992_s3 = scalar_lea.hbm %s6050_s15, %s4068_s0 }
 0x771   : > { %3340 = vrot.lane.b32.xlu1 %v3215_v39, %s6081_s26 }
 0x773   : > { %3398 = vrot.lane.b32.xlu0 %v3212_v38, %s4510_s1 }
 0x775   : > { %3396 = vrot.lane.b32.xlu1 %v5769_v35, %s4510_s1 }
 0x777   : > { %3424 = vrot.lane.b32.xlu0 %v3212_v38, %s4511_s30 }
 0x779   : > { %3400 = vrot.lane.b32.xlu1 %v5771_v15, %s4510_s1 }
 0x77b   : > { %3450 = vrot.lane.b32.xlu0 %v3212_v38, %s4512_s23 }
 0x77d   : > { %3422 = vrot.lane.b32.xlu1 %v5769_v35, %s4511_s30 }
 0x77f   : > { %3376 = vrot.lane.b32.xlu0 %v3215_v39, %s6082_s17 }
 0x781   : > { %3426 = vrot.lane.b32.xlu1 %v5771_v15, %s4511_s30 }
 0x783   : > { %3402 = vrot.lane.b32.xlu0 %v3215_v39, %s4510_s1 }
 0x785   : > { %3448 = vrot.lane.b32.xlu1 %v5769_v35, %s4512_s23 }
 0x787   : > { %3428 = vrot.lane.b32.xlu0 %v3215_v39, %s4511_s30 }
 0x789   : > { %3452 = vrot.lane.b32.xlu1 %v5771_v15, %s4512_s23 }
 0x78b   : > { %3454 = vrot.lane.b32.xlu0 %v3215_v39, %s4512_s23 }
 0x78d   : > { %3526 = vperm.xlu1 %4200, %v3522_v43  }
 0x78f   : > { %3531 = vperm.xlu0 %4169, %v3523_v53  }
 0x7bf   : > { %v3261_v63 = vpop.permute.xlu0 %3260  ;;  %v3225_v62 = vpop.permute.xlu1 %3224 }
 0x7c0   : > { %v5842_v7 = vsel %vm2980_vm6, %v4209_v54, %v3261_v63  ;;  %v3234_v8 = vsel %vm2961_vm3, %v4204_v59, %v3225_v62 }
 0x7c3   : > { %v3333_v42 = vpop.permute.xlu0 %3332  ;;  %v3297_v3 = vpop.permute.xlu1 %3296 }
 0x7c4   : > { %v5846_v52 = vsel %vm707_vm4, %v4219_v9, %v3333_v42  ;;  %v5849_v10 = vsel %vm2999_vm7, %v4214_v13, %v3297_v3 }
 0x7c7   : > { %v3371_v41 = vpop.permute.xlu1 %3370 }
 0x7c9   : > { %v3227_v14 = vpop.permute.xlu0 %3226 }
 0x7ca   : > { %v3235_v49 = vsel %vm2961_vm3, %v3225_v62, %v3227_v14  ;;  %v3485_v62 = vld [vmem:[#allocation10 + $0x88] sm:$0xff] }
 0x7cb   : > { %3243 = vst.msk [vmem:[#allocation10 + $0x8] sm:$0xff] %vm2945_vm1, %v3235_v49  ;;  %v3231_v60 = vpop.permute.xlu1 %3230 }
 0x7cc   : > { %v3236_v48 = vsel %vm2961_vm3, %v4205_v1, %v3231_v60 }
 0x7cd   : > { %v3267_v44 = vpop.permute.xlu0 %3266  ;;  %v3504_v47 = vpack.c.bf16 %v3236_v48, %v3234_v8 }
 0x7ce   : > { %v3272_v45 = vsel %vm2980_vm6, %v4210_v5, %v3267_v44 }
 0x7cf   : > { %v3263_v12 = vpop.permute.xlu1 %3262  ;;  %v3506_v57 = vpack.c.bf16 %v3272_v45, %v5842_v7 }
 0x7d0   : > { %v3271_v6 = vsel %vm2980_vm6, %v3261_v63, %v3263_v12 }
 0x7d1   : > { %v3299_v16 = vpop.permute.xlu0 %3298  ;;  %3279 = vst.msk [vmem:[#allocation10 + $0x28] sm:$0xff] %vm2945_vm1, %v3271_v6 }
 0x7d2   : > { %v3307_v17 = vsel %vm2999_vm7, %v3297_v3, %v3299_v16  ;;  %v3469_v46 = vld [vmem:[#allocation10 + $0x8] sm:$0xff] }
 0x7d3   : > { %3315 = vst.msk [vmem:[#allocation10 + $0x48] sm:$0xff] %vm2945_vm1, %v3307_v17  ;;  %v3303_v4 = vpop.permute.xlu1 %3302 }
 0x7d4   : > { %v3308_v0 = vsel %vm2999_vm7, %v4215_v11, %v3303_v4 }
 0x7d5   : > { %v3339_v19 = vpop.permute.xlu0 %3338  ;;  %v3508_v13 = vpack.c.bf16 %v3308_v0, %v5849_v10 }
 0x7d6   : > { %v3344_v21 = vsel %vm707_vm4, %v4220_v18, %v3339_v19 }
 0x7d7   : > { %v3335_v20 = vpop.permute.xlu1 %3334  ;;  %v3510_v49 = vpack.c.bf16 %v3344_v21, %v5846_v52 }
 0x7d8   : > { %v3343_v22 = vsel %vm707_vm4, %v3333_v42, %v3335_v20  ;;  %v3473_v38 = vld [vmem:[#allocation10 + $0x28] sm:$0xff]  ;;  %v3487_v42 = vld [vmem:[#allocation10 + $0x98] sm:$0xff] }
 0x7d9   : > { %v3233_v26 = vpop.permute.xlu0 %3232  ;;  %3351 = vst.msk [vmem:[#allocation10 + $0x68] sm:$0xff] %vm2945_vm1, %v3343_v22  ;;  %v3513_v14 = vpack.c.bf16 %v3487_v42, %v3485_v62 }
 0x7da   : > { %v3237_v23 = vsel %vm2961_vm3, %v3231_v60, %v3233_v26  ;;  %v3477_v51 = vld [vmem:[#allocation10 + $0x48] sm:$0xff] }
 0x7db   : > { %3245 = vst.msk [vmem:[#allocation10 + $0x18] sm:$0xff] %vm2945_vm1, %v3237_v23  ;;  %v3269_v24 = vpop.permute.xlu1 %3268 }
 0x7dc   : > { %v3273_v50 = vsel %vm2980_vm6, %v3267_v44, %v3269_v24 }
 0x7dd   : > { %v3373_v25 = vpop.permute.xlu0 %3372  ;;  %3281 = vst.msk [vmem:[#allocation10 + $0x38] sm:$0xff] %vm2945_vm1, %v3273_v50 }
 0x7de   : > { %v5868_v27 = vsel %vm786_vm5, %v3371_v41, %v3373_v25  ;;  %3385 = vst.msk [vmem:[#allocation10 + $0xa8] sm:$0xff] %vm2945_vm1, %v3373_v25 }
 0x7df   : > { %v3375_v28 = vpop.permute.xlu1 %3374 }
 0x7e0   : > { %v3481_v8 = vld [vmem:[#allocation10 + $0x68] sm:$0xff] }
 0x7e1   : > { %v3305_v29 = vpop.permute.xlu0 %3304 }
 0x7e2   : > { %v3309_v30 = vsel %vm2999_vm7, %v3303_v4, %v3305_v29  ;;  %v3471_v34 = vld [vmem:[#allocation10 + $0x18] sm:$0xff]  ;;  %v4415_v29 = vld [vmem:[%s6049_s14] sm:$0xff]  }
 0x7e3   : > { %3317 = vst.msk [vmem:[#allocation10 + $0x58] sm:$0xff] %vm2945_vm1, %v3309_v30  ;;  %v3505_v61 = vpack.c.bf16 %v3471_v34, %v3469_v46  ;;  %v3341_v37 = vpop.permute.xlu1 %3340  ;;  %v4416_v30 = vld [vmem:[%s6049_s14 + $0x8] sm:$0xff]   ;;  %v4417_v46 = vld [vmem:[%s6049_s14 + $0x10] sm:$0xff]   ;;  %v4418_v34 = vld [vmem:[%s6049_s14 + $0x18] sm:$0xff]  }
 0x7e4   : > { %v3345_v32 = vsel %vm707_vm4, %v3339_v19, %v3341_v37  ;;  %v3475_v39 = vld [vmem:[#allocation10 + $0x38] sm:$0xff]  ;;  %v4420_v37 = vld [vmem:[%s6049_s14 + $0x28] sm:$0xff]  }
 0x7e5   : > { %v3399_v36 = vpop.permute.xlu0 %3398  ;;  %3546 = vmatprep.subr.bf16.mxu1 %v3505_v61  ;;  %3353 = vst.msk [vmem:[#allocation10 + $0x78] sm:$0xff] %vm2945_vm1, %v3345_v32  ;;  %v3507_v43 = vpack.c.bf16 %v3475_v39, %v3473_v38  ;;  %v3489_v6 = vld [vmem:[#allocation10 + $0xa8] sm:$0xff]  ;;  %v4419_v61 = vld [vmem:[%s6049_s14 + $0x20] sm:$0xff]   ;;  %v4421_v32 = vld [vmem:[%s6049_s14 + $0x30] sm:$0xff]  }
 0x7e6   : > { %3411 = vst.msk [vmem:[#allocation10 + $0xc8] sm:$0xff] %vm2945_vm1, %v3399_v36  ;;  %3547 = vmatpush1.bf16.msra.mxu1 %v3504_v47  ;;  %v4422_v47 = vld [vmem:[%s6049_s14 + $0x38] sm:$0xff]   ;;  %v3593_v38 = vld [vmem:[%s6048_s13] sm:$0x3] }
 0x7e7   : > { %3548 = vmatprep.subr.bf16.mxu1 %v3507_v43  ;;  %v3397_v53 = vpop.permute.xlu1 %3396 }
 0x7e8   : > { %v3404_v55 = vsel %vm3049_vm8, %v3397_v53, %v3399_v36  ;;  %v3598_v53 = vrot.slane %v3593_v38, %v4967_v33 }
 0x7e9   : > { %v3425_v58 = vpop.permute.xlu0 %3424 }
 0x7ea   : > { %3437 = vst.msk [vmem:[#allocation10 + $0xe8] sm:$0xff] %vm2945_vm1, %v3425_v58  ;;  %3549 = vmatpush1.bf16.msra.mxu1 %v3506_v57  ;;  %v3479_v59 = vld [vmem:[#allocation10 + $0x58] sm:$0xff] }
 0x7eb   : > { %v3509_v54 = vpack.c.bf16 %v3479_v59, %v3477_v51  ;;  %v3401_v63 = vpop.permute.xlu1 %3400  ;;  %v3602_v51 = vrot.slane %v3593_v38, %v4977_v40 }
 0x7ec   : > { %v3483_v9 = vld [vmem:[#allocation10 + $0x78] sm:$0xff] }
 0x7ed   : > { %v3451_v3 = vpop.permute.xlu0 %3450  ;;  %3550 = vmatprep.subr.bf16.mxu1 %v3509_v54  ;;  %v3511_v41 = vpack.c.bf16 %v3483_v9, %v3481_v8  ;;  %v3493_v19 = vld [vmem:[#allocation10 + $0xc8] sm:$0xff]  ;;  %v4423_v9 = vld [vmem:[%s6049_s14 + $0x40] sm:$0xff]  }
 0x7ee   : > { %3463 = vst.msk [vmem:[#allocation10 + $0x108] sm:$0xff] %vm2945_vm1, %v3451_v3  ;;  %3551 = vmatpush1.bf16.msra.mxu1 %v3508_v13 }
 0x7ef   : > { %3552 = vmatprep.subr.bf16.mxu1 %v3511_v41  ;;  %v3423_v7 = vpop.permute.xlu1 %3422 }
 0x7f0   : > { %v3430_v1 = vsel %vm3063_vm9, %v3423_v7, %v3425_v58 }
 0x7f1   : > { %v3377_v60 = vpop.permute.xlu0 %3376  ;;  %v3497_v20 = vld [vmem:[#allocation10 + $0xe8] sm:$0xff] }
 0x7f2   : > { %v3379_v5 = vsel %vm786_vm5, %v3375_v28, %v3377_v60  ;;  %3387 = vst.msk [vmem:[#allocation10 + $0xb8] sm:$0xff] %vm2945_vm1, %v3377_v60  ;;  %3553 = vmatpush1.bf16.msra.mxu1 %v3510_v49  ;;  %v4414_v28 = vld [vmem:[%s6046_s11] ss:$8 sps:$4 sm:$0xff]   ;;  %v4426_v60 = vld [vmem:[%s6049_s14 + $0x58] sm:$0xff]  }
 0x7f3   : > { %3554 = vmatprep.subr.bf16.mxu1 %v3513_v14  ;;  %v3427_v10 = vpop.permute.xlu1 %3426  ;;  %v3514_v4 = vpack.c.bf16 %v3379_v5, %v5868_v27  ;;  %v4424_v14 = vld [vmem:[%s6049_s14 + $0x48] sm:$0xff]  }
 0x7f4   : > { %v4428_v5 = vld [vmem:[%s6049_s14 + $0x68] sm:$0xff]  }
 0x7f5   : > { %v3403_v48 = vpop.permute.xlu0 %3402  ;;  %v3501_v24 = vld [vmem:[#allocation10 + $0x108] sm:$0xff] }
 0x7f6   : > { %v3405_v44 = vsel %vm3049_vm8, %v3401_v63, %v3403_v48  ;;  %3413 = vst.msk [vmem:[#allocation10 + $0xd8] sm:$0xff] %vm2945_vm1, %v3403_v48  ;;  %3555 = vmatpush1.bf16.msra.mxu1 %v3512_v31 }
 0x7f7   : > { %v3449_v45 = vpop.permute.xlu1 %3448  ;;  %v3516_v21 = vpack.c.bf16 %v3405_v44, %v3404_v55 }
 0x7f8   : > { %v3456_v52 = vsel %vm3077_vm10, %v3449_v45, %v3451_v3 }
 0x7f9   : > { %v3429_v12 = vpop.permute.xlu0 %3428  ;;  %v3491_v16 = vld [vmem:[#allocation10 + $0xb8] sm:$0xff] }
 0x7fa   : > { %v3431_v11 = vsel %vm3063_vm9, %v3427_v10, %v3429_v12  ;;  %3439 = vst.msk [vmem:[#allocation10 + $0xf8] sm:$0xff] %vm2945_vm1, %v3429_v12  ;;  %v3515_v17 = vpack.c.bf16 %v3491_v16, %v3489_v6 }
 0x7fb   : > { %v3453_v0 = vpop.permute.xlu1 %3452  ;;  %v3518_v23 = vpack.c.bf16 %v3431_v11, %v3430_v1  ;;  %v4425_v1 = vld [vmem:[%s6049_s14 + $0x50] sm:$0xff]  }
 0x7fc   : > { %3556 = vmatprep.subr.bf16.mxu1 %v3515_v17 }
 0x7fd   : > { %v3455_v18 = vpop.permute.xlu0 %3454  ;;  %3557 = vmatpush1.bf16.msra.mxu1 %v3514_v4  ;;  %v3495_v35 = vld [vmem:[#allocation10 + $0xd8] sm:$0xff] }
 0x7fe   : > { %3465 = vst.msk [vmem:[#allocation10 + $0x118] sm:$0xff] %vm2945_vm1, %v3455_v18  ;;  %v3457_v15 = vsel %vm3077_vm10, %v3453_v0, %v3455_v18  ;;  %v3517_v31 = vpack.c.bf16 %v3495_v35, %v3493_v19 }
 0x7ff   : > { %v3520_v27 = vpack.c.bf16 %v3457_v15, %v3456_v52 }
 0x800   : > { %3558 = vmatprep.subr.bf16.mxu1 %v3517_v31 }
 0x801   : > { %3559 = vmatpush1.bf16.msra.mxu1 %v3516_v21  ;;  %v3499_v22 = vld [vmem:[#allocation10 + $0xf8] sm:$0xff] }
 0x802   : > { %v3519_v26 = vpack.c.bf16 %v3499_v22, %v3497_v20 }
 0x804   : > { %3560 = vmatprep.subr.bf16.mxu1 %v3519_v26 }
 0x805   : > { %3561 = vmatpush1.bf16.msra.mxu1 %v3518_v23  ;;  %v3503_v50 = vld [vmem:[#allocation10 + $0x118] sm:$0xff] }
 0x806   : > { %v3521_v25 = vpack.c.bf16 %v3503_v50, %v3501_v24 }
 0x808   : > { %3562 = vmatprep.subr.bf16.mxu1 %v3521_v25 }
 0x809   : > { %3563 = vmatpush1.bf16.msra.mxu1 %v3520_v27 }
 0x80a   : > { %3796 = vmatprep.subr.bf16.mxu1 %v4503_v56 }
 0x80c   : > { %3579 = vmatmul.mubr.bf16.vlgmr.msra.gmra.mrb[16].mxu1 %v4414_v28  ;;  %v3527_v39 = vpop.permute.xlu1 %3526 }
 0x80d   : > { %3797 = vmatpush1.bf16.msra.mxu1 %v4415_v29 }
 0x80e   : > { %3798 = vmatprep.subr.bf16.mxu1 %v4503_v56  ;;  %v3532_v57 = vpop.permute.xlu0 %3531 }
 0x811   : > { %3799 = vmatpush1.bf16.msra.mxu1 %v4416_v30 }
 0x812   : > { %3800 = vmatprep.subr.bf16.mxu1 %v4503_v56 }
 0x815   : > { %3801 = vmatpush1.bf16.msra.mxu1 %v4417_v46 }
 0x816   : > { %3802 = vmatprep.subr.bf16.mxu1 %v4503_v56 }
 0x819   : > { %3803 = vmatpush1.bf16.msra.mxu1 %v4418_v34 }
 0x81a   : > { %3804 = vmatprep.subr.bf16.mxu1 %v4503_v56 }
 0x81d   : > { %3805 = vmatpush1.bf16.msra.mxu1 %v4419_v61 }
 0x81e   : > { %3806 = vmatprep.subr.bf16.mxu1 %v4503_v56 }
 0x821   : > { %3807 = vmatpush1.bf16.msra.mxu1 %v4420_v37 }
 0x822   : > { %3808 = vmatprep.subr.bf16.mxu1 %v4503_v56 }
 0x825   : > { %3809 = vmatpush1.bf16.msra.mxu1 %v4421_v32 }
 0x826   : > { %3810 = vmatprep.subr.bf16.mxu1 %v4503_v56 }
 0x829   : > { %3811 = vmatpush1.bf16.msra.mxu1 %v4422_v47 }
 0x82a   : > { %3812 = vmatprep.subr.bf16.mxu1 %v4503_v56 }
 0x82d   : > { %3813 = vmatpush1.bf16.msra.mxu1 %v4423_v9 }
 0x82e   : > { %3814 = vmatprep.subr.bf16.mxu1 %v4503_v56 }
 0x831   : > { %3815 = vmatpush1.bf16.msra.mxu1 %v4424_v14 }
 0x832   : > { %3816 = vmatprep.subr.bf16.mxu1 %v4503_v56 }
 0x835   : > { %3817 = vmatpush1.bf16.msra.mxu1 %v4425_v1 }
 0x836   : > { %3818 = vmatprep.subr.bf16.mxu1 %v4503_v56 }
 0x839   : > { %3819 = vmatpush1.bf16.msra.mxu1 %v4426_v60 }
 0x83a   : > { %3820 = vmatprep.subr.bf16.mxu1 %v4503_v56 }
 0x8df   : > { %v3580_v36 = vpop.f32.mrb[16].mxu1 }
 0x8e0   : > { %v3581_v43 = vadd.f32 %v3580_v36, %v3527_v39  ;;  %v3582_v55 = vpop.f32.mrb[17].mxu1 }
 0x8e1   : > { %v3583_v58 = vadd.f32 %v3582_v55, %v3527_v39  ;;  %v3584_v59 = vpop.f32.mrb[18].mxu1 }
 0x8e2   : > { %v3589_v54 = vmax.f32 %v3581_v43, 0.0  ;;  %v3585_v63 = vadd.f32 %v3584_v59, %v3532_v57  ;;  %v3586_v62 = vpop.f32.mrb[19].mxu1 }
 0x8e3   : > { %v3590_v13 = vmax.f32 %v3583_v58, 0.0  ;;  %v3587_v8 = vadd.f32 %v3586_v62, %v3532_v57 }
 0x8e4   : > { %v3605_v42 = vmul.f32 %v3598_v53, %v3589_v54  ;;  %v3591_v3 = vmax.f32 %v3585_v63, 0.0 }
 0x8e5   : > { %v3606_v41 = vmul.f32 %v3602_v51, %v3590_v13  ;;  %v3592_v7 = vmax.f32 %v3587_v8, 0.0 }
 0x8e6   : > { %v3607_v33 = vmul.f32 %v3598_v53, %v3591_v3  ;;  %3625 = vrot.lane.b32.xlu1 %v3605_v42, %s6082_s17 }
 0x8e7   : > { %3612 = vst.msk [vmem:[#allocation9 + $0x10] sm:$0xff] %vm2945_vm1, %v3606_v41  ;;  %v3608_v40 = vmul.f32 %v3602_v51, %v3592_v7 }
 0x8e8   : > { %3615 = vst.msk [vmem:[#allocation9 + $0x10] sm:$0xff] %vm2947_vm2, %v5756_v2 }
 0x8e9   : > { %3614 = vst.msk [vmem:[#allocation9 + $0x28] sm:$0xff] %vm2945_vm1, %v3608_v40 }
 0x8ea   : > { %3616 = vst.msk [vmem:[#allocation9 + $0x28] sm:$0xff] %vm2947_vm2, %v5756_v2  ;;  %3643 = vrot.lane.b32.xlu1 %v3605_v42, %s4511_s30  ;;  %v4427_v2 = vld [vmem:[%s6049_s14 + $0x60] sm:$0xff]  }
 0x8eb   : > { %3821 = vmatpush1.bf16.msra.mxu1 %v4427_v2 }
 0x8ec   : > { %3822 = vmatprep.subr.bf16.mxu1 %v4503_v56 }
 0x8ee   : > { %3661 = vrot.lane.b32.xlu1 %v3605_v42, %s4512_s23 }
 0x8ef   : > { %v3618_v49 = vld [vmem:[#allocation9 + $0x10] sm:$0xff]  ;;  %3823 = vmatpush1.bf16.msra.mxu1 %v4428_v5 }
 0x8f0   : > { %3627 = vrot.lane.b32.xlu0 %v3618_v49, %s6082_s17 }
 0x8f1   : > { %v3620_v10 = vld [vmem:[#allocation9 + $0x28] sm:$0xff] }
 0x8f2   : > { %3629 = vrot.lane.b32.xlu1 %v3607_v33, %s6082_s17 }
 0x8f4   : > { %3645 = vrot.lane.b32.xlu0 %v3618_v49, %s4511_s30 }
 0x8f6   : > { %3647 = vrot.lane.b32.xlu1 %v3607_v33, %s4511_s30 }
 0x8f8   : > { %3663 = vrot.lane.b32.xlu0 %v3618_v49, %s4512_s23 }
 0x8fa   : > { %3665 = vrot.lane.b32.xlu1 %v3607_v33, %s4512_s23 }
 0x8fc   : > { %3631 = vrot.lane.b32.xlu0 %v3620_v10, %s6082_s17  ;;  %s485_s17 = sand.u32 1, %s4485_s19  }
 0x8fd   : > { %s5994_s27 = scalar_lea.sflag [#allocation12], %s485_s17 }
 0x900   : > { %3649 = vrot.lane.b32.xlu0 %v3620_v10, %s4511_s30  ;;  %s3919_s30 = sshll.u32 %s485_s17, 4 }
 0x904   : > { %3667 = vrot.lane.b32.xlu0 %v3620_v10, %s4512_s23  ;;  %s487_s23 = scalar_lea.vmem [#allocation11], %s3919_s30 }
 0x905   : > { %s3853_s25 = sshll.u32 %s487_s23, 4  ;;  %s5987_s25 = int_to_ptr.vmem [resolvable:$true] %s3853_s25 }
 0x906   : > { %s4431_s1 = scalar_lea.vmem %s5987_s25, 256  ;;  %p4438_p0 = scmp.lt.s32.totalorder %s5987_s25, %s4436_s16 }
 0x907   : > { %p4432_p11 = scmp.ne.s32.totalorder %s5987_s25, %s4431_s1  ;;  %p4439_p1 = scmp.lt.s32.totalorder %s4437_s20, %s4431_s1 }
 0x909   : > { %p4433_p12 = pnand %p4432_p11, %p4634_p5  ;;  %p4440_p2 = por %p4439_p1, %p4438_p0 }
 0x90b   : > { %p4434_p13 = pneg %p4433_p12 }
 0x90d   : > { %p4441_p3 = pnand %p4440_p2, %p4434_p13 }
 0x958   : > { %v3626_v48 = vpop.permute.xlu1 %3625 }
 0x95c   : > { %v3644_v44 = vpop.permute.xlu1 %3643 }
 0x960   : > { %v3662_v56 = vpop.permute.xlu1 %3661 }
 0x962   : > { %v3628_v45 = vpop.permute.xlu0 %3627 }
 0x963   : > { %v3633_v17 = vsel %vm786_vm5, %v3626_v48, %v3628_v45  ;;  %v3640_v0 = vadd.f32 %v3628_v45, %v3618_v49 }
 0x964   : > { %v3630_v6 = vpop.permute.xlu1 %3629  ;;  %v3639_v31 = vadd.f32 %v3633_v17, %v3605_v42 }
 0x966   : > { %v3646_v52 = vpop.permute.xlu0 %3645 }
 0x967   : > { %v3651_v19 = vsel %vm3063_vm9, %v3644_v44, %v3646_v52  ;;  %v3658_v20 = vadd.f32 %v3646_v52, %v3640_v0 }
 0x968   : > { %v3648_v11 = vpop.permute.xlu1 %3647  ;;  %v3657_v23 = vadd.f32 %v3651_v19, %v3639_v31 }
 0x96a   : > { %v3664_v12 = vpop.permute.xlu0 %3663 }
 0x96b   : > { %v3669_v22 = vsel %vm3077_vm10, %v3662_v56, %v3664_v12  ;;  %v3676_v27 = vadd.f32 %v3664_v12, %v3658_v20 }
 0x96c   : > { %v3666_v50 = vpop.permute.xlu1 %3665  ;;  %v3675_v30 = vadd.f32 %v3669_v22, %v3657_v23 }
 0x96e   : > { %v3632_v16 = vpop.permute.xlu0 %3631 }
 0x96f   : > { %v3634_v4 = vsel %vm786_vm5, %v3630_v6, %v3632_v16  ;;  %v3642_v35 = vadd.f32 %v3632_v16, %v3620_v10 }
 0x970   : > { %v3641_v21 = vadd.f32 %v3634_v4, %v3607_v33 }
 0x972   : > { %v3650_v18 = vpop.permute.xlu0 %3649 }
 0x973   : > { %v3652_v15 = vsel %vm3063_vm9, %v3648_v11, %v3650_v18  ;;  %v3660_v26 = vadd.f32 %v3650_v18, %v3642_v35 }
 0x974   : > { %v3659_v24 = vadd.f32 %v3652_v15, %v3641_v21 }
 0x976   : > { %v3668_v25 = vpop.permute.xlu0 %3667 }
 0x977   : > { %v3670_v28 = vsel %vm3077_vm10, %v3666_v50, %v3668_v25  ;;  %v3678_v29 = vadd.f32 %v3668_v25, %v3660_v26 }
 0x978   : > { %v3677_v46 = vadd.f32 %v3670_v28, %v3659_v24 }
 0x979   : > { %v3680_v34 = vpack.c.bf16 %v3678_v29, %v3676_v27 }
 0x97a   : > { %v3679_v61 = vpack.c.bf16 %v3677_v46, %v3675_v30 }
 0x97b   : > { %4061 = vmatprep.mubr.msk.bf16.mxu1 %vm2945_vm1, %v3680_v34 }
 0x97c   : > { %3829 = vmatmul.mubr.bf16.vlgmr.msra.gmra.mrb[20].mxu1 %v3679_v61 }
 0xa4f   : > { %v3830_v37 = vpop.f32.mrb[20].mxu1 }
 0xa50   : > { %3837 = vst [vmem:[%s487_s23] sm:$0xff] %v3830_v37  ;;  %v3832_v32 = vpop.f32.mrb[21].mxu1 }
 0xa51   : > { %v3833_v47 = vpop.f32.mrb[22].mxu1 }
 0xa52   : > { %3838 = vst [vmem:[%s487_s23 + $0x8] sm:$0xff] %v3833_v47  ;;  %v3835_v38 = vpop.f32.mrb[23].mxu1 }
 0xa53   : > { %4444 = shalt.err (!%p4441_p3)
}
 0xa54   : > { %s4445_s24 = scalar_lea.hbm %s5992_s3, 256  ;;  %s4449_s23 = scalar_lea.hbm %s6050_s15, 1024 }
 0xa55   : > { %p4446_p4 = scmp.ne.s32.totalorder %s5992_s3, %s4445_s24  ;;  %p4450_p9 = scmp.lt.u32.totalorder %s5992_s3, %s6050_s15 }
 0xa56   : > { %p4451_p10 = scmp.lt.u32.totalorder %s4449_s23, %s4445_s24  ;;  %p4453_p12 = scmp.lt.u32.totalorder %s4445_s24, %s5992_s3 }
 0xa57   : > { %p4447_p7 = pnand %p4446_p4, %p4634_p5 }
 0xa58   : > { %p4452_p11 = por %p4451_p10, %p4450_p9 }
 0xa59   : > { %p4448_p8 = pneg %p4447_p7 }
 0xa5a   : > { %p4454_p13 = por %p4453_p12, %p4452_p11 }
 0xa5c   : > { %p4455_p0 = pnand %p4454_p13, %p4448_p8 }
 0xa5e   : > { %4458 = shalt.err (!%p4455_p0)
}
 0xa5f   : > { %s4514_s2 = smov 128   ;;  %s4515_s1 = smov 8  }
 0xa60   : > { %4110 = dma.vmem_to_hbm [thread:$0]  (%p4634_p5), %s5987_s25, 256, %s5992_s3, %s5994_s27, %s4514_s2, %s4514_s2, %s4515_s1  }
 0xa61 PF: > { %p4116_p1 = scmp.ge.s32.totalorder %s4493_s21, 2  ;;  %s3868_s22 = sand.u32 1, %s4481_s18  }
 0xa62   : > { %s3869_s16 = scalar_lea.sflag [#allocation12], %s3868_s22 }
 0xa63   : > { %p4113_p2 = pnand %p4116_p1, %p4638_p6 }
 0xa65   : > { %4476 = dma.done.wait (!%p4113_p2), %s3869_s16, 256  }
 0xa66   : > { %4478 = vsyncadd (!%p4113_p2), %s3869_s16, 4294967040  ;;  %s6091_s21 = sld [smem:[#allocation15_spill]]  ;;  %s6092_s20 = sld [smem:[#allocation14_spill]] }
 0xa67   : > { %s6093_s24 = sld [smem:[#allocation16_spill]]  ;;  %s6094_s18 = smov %s4485_s19 }
 0xa6c   : > { %p25_p3 = scmp.ge.s32.totalorder %s6091_s21, 6   ;;  %s6095_s19 = smov %s6092_s20 }
 0xa6d   : > { %s6096_s20 = smov %s6093_s24 }
 0xa6e   :  { %27 = sbr.rel (!%p25_p3) target bundleno = 8 (0x8), region = 115 }
 0xa75   :  { %3874 = vsyncpa [#allocation12], 1 }
 0xa76   :  { %3876 = vsyncpa [#allocation12 + $0x1], 1 }

</bundles_post_ra>
